<compile_context>
chip_gen: v7x
topology: tpu7x:2x2x1
jax: 0.10.0
libtpu: 0.0.40
codegen_flags: <defaults>
</compile_context>

<pallas_src>
import numpy as np
import jax
import jax.numpy as jnp
from jax.experimental import pallas as pl
from jax.experimental.pallas import tpu as pltpu

ACTION_DIM = 1
LATENT_DIM = 32
IMG_H, IMG_W, IMG_C = 64, 32, 3


# ----------------------------------------------------------------------------
# Raw (Keras-convention) parameters.
# ----------------------------------------------------------------------------
def _init(key, shape, scale=0.05):
    return scale * jax.random.normal(key, shape, dtype=jnp.float32)


def init_raw_params(key):
    ks = jax.random.split(key, 18)
    p = {}
    p["w1"] = _init(ks[0], (8, 8, 3, 8));              p["b1"] = _init(ks[9], (8,))
    p["w2"] = _init(ks[1], (4, 4, 8, 16));             p["b2"] = _init(ks[10], (16,))
    p["wd1"] = _init(ks[2], (768, LATENT_DIM));        p["bd1"] = _init(ks[11], (LATENT_DIM,))
    p["wd2"] = _init(ks[3], (LATENT_DIM, 768));        p["bd2"] = _init(ks[12], (768,))
    p["wdc1"] = _init(ks[4], (4, 4, 16, 16));          p["bdc1"] = _init(ks[13], (16,))
    p["wdc2"] = _init(ks[5], (10, 2, 16, 8));          p["bdc2"] = _init(ks[14], (8,))
    p["wdc3"] = _init(ks[6], (12, 4, 8, 3));           p["bdc3"] = _init(ks[15], (3,))
    p["whv"] = _init(ks[7], (LATENT_DIM + ACTION_DIM, 20)); p["bhv"] = _init(ks[16], (20,))
    p["wo"] = _init(ks[8], (20, 1));                   p["bo"] = _init(ks[17], (1,))
    return p


# ----------------------------------------------------------------------------
# Init-time weight transforms: fold im2col / stride / column-upsampling into
# per-kernel-row block-Toeplitz matrices, and row gather/duplication into 0/1
# selection matrices, so the kernel only does contiguous slices + matmuls.
# ----------------------------------------------------------------------------
def _row_toeplitz(w, in_w, out_w, stride=1, up=1):
    # w: (kh, kw, cin, cout) -> (kh, in_w*cin, out_w*cout); matrix i applies
    # kernel row i of the conv to one (already row-selected) image row,
    # reading columns of an image stored as [x*cin + c].
    kh, kw, cin, cout = w.shape
    m = np.zeros((kh, in_w * cin, out_w * cout), np.float32)
    for i in range(kh):
        for x in range(out_w):
            for j in range(kw):
                xin = (x * stride + j) // up        # column up-sampling folded in
                m[i, xin * cin:(xin + 1) * cin, x * cout:(x + 1) * cout] += w[i, j]
    return m


def _row_select(pairs, n_rows, n_cols):
    s = np.zeros((n_rows, n_cols), np.float32)
    for r, c in pairs:
        s[r, c] = 1.0
    return s


def prepare_kernel_params(raw):
    r = {k: np.asarray(v, np.float32) for k, v in raw.items()}
    kp = {}
    # conv1: 8x8 stride 4, (64,32,3) -> (15,7,8); row i*15+y of ssel picks image row 4y+i
    kp["ssel"] = _row_select([(i * 15 + y, 4 * y + i) for i in range(8) for y in range(15)], 120, 64)
    kp["m1"] = _row_toeplitz(r["w1"], in_w=32, out_w=7, stride=4)
    kp["b1t"] = np.tile(r["b1"], 7)[None, :]
    # conv2: 4x4 stride 1, (15,7,8) -> (12,4,16)
    kp["m2"] = _row_toeplitz(r["w2"], in_w=7, out_w=4)
    kp["b2t"] = np.tile(r["b2"], 4)[None, :]
    # dense1 / dense2
    kp["wd1"] = r["wd1"]; kp["bd1"] = r["bd1"][None, :]
    kp["wd2"] = r["wd2"]; kp["bd2"] = r["bd2"][None, :]
    # dec_conv1: 4x4 SAME (pad (1,2)x(1,2)), (12,4,16) -> (12,4,16); conv runs on padded 15x7 buffer
    kp["md1"] = _row_toeplitz(r["wdc1"], in_w=7, out_w=4)
    kp["bdc1t"] = np.tile(r["bdc1"], 4)[None, :]
    # UpSampling2D(2,2) + dec_conv2 (10,2): (24,8,16) -> (15,7,8)
    kp["r2"] = _row_select([(rr, rr // 2) for rr in range(24)], 24, 12)
    kp["md2"] = _row_toeplitz(r["wdc2"], in_w=4, out_w=7, up=2)
    kp["bdc2t"] = np.tile(r["bdc2"], 7)[None, :]
    # UpSampling2D(5,5) + dec_conv3 (12,4): (75,35,8) -> (64,32,3)
    kp["r5"] = _row_select([(rr, rr // 5) for rr in range(75)], 75, 15)
    kp["md3"] = _row_toeplitz(r["wdc3"], in_w=7, out_w=32, up=5)
    kp["bdc3t"] = np.tile(r["bdc3"], 32)[None, :]
    # critic head: Dense(20) on concat([encoded, act]) -> split weight; Dense(1) as mul+reduce
    kp["whe"] = r["whv"][:LATENT_DIM]
    kp["wha"] = r["whv"][LATENT_DIM:LATENT_DIM + 1]
    kp["bh"] = r["bhv"][None, :]
    kp["wot"] = r["wo"].T
    kp["bo"] = r["bo"][None, :]
    return {k: jnp.asarray(v, jnp.float32) for k, v in kp.items()}


# ----------------------------------------------------------------------------
# The fused kernel: one grid step == one batch element, everything in VMEM.
# ----------------------------------------------------------------------------
def _cae_kernel(img_ref, act_ref,
                ssel_ref, m1_ref, b1_ref,
                m2_ref, b2_ref,
                wd1_ref, bd1_ref, wd2_ref, bd2_ref,
                md1_ref, bc1_ref,
                r2_ref, md2_ref, bc2_ref,
                r5_ref, md3_ref, bc3_ref,
                whe_ref, wha_ref, bh_ref, wot_ref, bo_ref,
                dec_ref, ov_ref,
                simg, a1, c2, flat, d2s, d1pad, up2, up5):
    f32 = jnp.float32

    # ---- encoder: conv1 (8x8, stride 4, relu) ------------------------------
    img = img_ref[0]                                              # (64, 32*3)
    simg[...] = jnp.dot(ssel_ref[...], img,
                        preferred_element_type=f32)               # (120, 96): row i*15+y = image row 4y+i
    acc = jnp.zeros((15, 56), f32)
    for i in range(8):
        acc = acc + jnp.dot(simg[i * 15:(i + 1) * 15, :], m1_ref[i],
                            preferred_element_type=f32)
    a1[...] = jnp.maximum(acc + b1_ref[...], 0.0)                 # (15, 7*8)

    # ---- conv2 (4x4, stride 1, relu) ---------------------------------------
    acc = jnp.zeros((12, 64), f32)
    for i in range(4):
        acc = acc + jnp.dot(a1[i:i + 12, :], m2_ref[i],
                            preferred_element_type=f32)
    c2[...] = jnp.maximum(acc + b2_ref[...], 0.0)                 # (12, 4*16)

    # ---- flatten + dense1 (sigmoid latent); keep M=8 (one sublane tile) ----
    flat[...] = jnp.zeros_like(flat)
    for h in range(12):
        flat[0:1, h * 64:(h + 1) * 64] = c2[h:h + 1, :]
    enc = jax.nn.sigmoid(jnp.dot(flat[...], wd1_ref[...],
                                 preferred_element_type=f32) + bd1_ref[...])   # (8, 32); row 0 is real

    # ---- dense2 (relu) -> SAME-padded 12x4x16 image for dec_conv1 ----------
    d2s[...] = jnp.maximum(jnp.dot(enc, wd2_ref[...],
                                   preferred_element_type=f32) + bd2_ref[...], 0.0)
    d1pad[...] = jnp.zeros_like(d1pad)                            # pad (1,2) rows x (1,2) col-blocks
    for h in range(12):
        d1pad[1 + h:2 + h, 16:80] = d2s[0:1, h * 64:(h + 1) * 64]

    # ---- dec_conv1 (4x4, SAME, relu) ---------------------------------------
    acc = jnp.zeros((12, 64), f32)
    for i in range(4):
        acc = acc + jnp.dot(d1pad[i:i + 12, :], md1_ref[i],
                            preferred_element_type=f32)
    dd1 = jnp.maximum(acc + bc1_ref[...], 0.0)                    # (12, 4*16)

    # ---- UpSampling2D(2,2) + dec_conv2 (10x2, relu) ------------------------
    up2[...] = jnp.dot(r2_ref[...], dd1, preferred_element_type=f32)   # row-duplicated (24, 64)
    acc = jnp.zeros((15, 56), f32)
    for i in range(10):
        acc = acc + jnp.dot(up2[i:i + 15, :], md2_ref[i],
                            preferred_element_type=f32)
    dd2 = jnp.maximum(acc + bc2_ref[...], 0.0)                    # (15, 7*8)

    # ---- UpSampling2D(5,5) + dec_conv3 (12x4, sigmoid) ---------------------
    up5[...] = jnp.dot(r5_ref[...], dd2, preferred_element_type=f32)   # row-duplicated (75, 56)
    acc = jnp.zeros((64, 96), f32)
    for i in range(12):
        acc = acc + jnp.dot(up5[i:i + 64, :], md3_ref[i],
                            preferred_element_type=f32)
    dec_ref[0] = jax.nn.sigmoid(acc + bc3_ref[...])               # (64, 32*3)

    # ---- critic head on [encoded, action] ----------------------------------
    av = act_ref[0]                                               # (1, 1)
    h = jnp.maximum(jnp.dot(enc, whe_ref[...], preferred_element_type=f32)
                    + av * wha_ref[...] + bh_ref[...], 0.0)       # (8, 20)
    ov = jnp.sum(h * wot_ref[...], axis=-1, keepdims=True) + bo_ref[...]
    ov_ref[0] = ov[0:1, :]


# ----------------------------------------------------------------------------
# Wrapper: one pallas_call over the batch.
# ----------------------------------------------------------------------------
def cae_critic_forward(kp, img, act):
    n = img.shape[0]
    img3 = img.reshape(n, IMG_H, IMG_W * IMG_C).astype(jnp.float32)
    act3 = act.reshape(n, 1, 1).astype(jnp.float32)

    weight_order = ("ssel", "m1", "b1t", "m2", "b2t", "wd1", "bd1", "wd2",
                    "bd2", "md1", "bdc1t", "r2", "md2", "bdc2t", "r5", "md3",
                    "bdc3t", "whe", "wha", "bh", "wot", "bo")
    weights = tuple(kp[k] for k in weight_order)

    def _const_spec(a):
        nd = a.ndim
        return pl.BlockSpec(tuple(a.shape), lambda b, _nd=nd: (0,) * _nd)

    in_specs = [
        pl.BlockSpec((1, IMG_H, IMG_W * IMG_C), lambda b: (b, 0, 0)),
        pl.BlockSpec((1, 1, 1), lambda b: (b, 0, 0)),
    ] + [_const_spec(w) for w in weights]

    out_specs = [
        pl.BlockSpec((1, IMG_H, IMG_W * IMG_C), lambda b: (b, 0, 0)),
        pl.BlockSpec((1, 1, 1), lambda b: (b, 0, 0)),
    ]

    out_shape = [
        jax.ShapeDtypeStruct((n, IMG_H, IMG_W * IMG_C), jnp.float32),
        jax.ShapeDtypeStruct((n, 1, 1), jnp.float32),
    ]

    scratch_shapes = [
        pltpu.VMEM((120, 96), jnp.float32),   # stride-4 selected conv1 rows
        pltpu.VMEM((15, 56), jnp.float32),    # conv1 output  (15, 7*8)
        pltpu.VMEM((12, 64), jnp.float32),    # conv2 output  (12, 4*16)
        pltpu.VMEM((8, 768), jnp.float32),    # flattened conv2 output (row 0 used)
        pltpu.VMEM((8, 768), jnp.float32),    # dense2 output (row 0 used)
        pltpu.VMEM((15, 112), jnp.float32),   # SAME-padded dec_conv1 input
        pltpu.VMEM((24, 64), jnp.float32),    # 2x row-upsampled dec_conv1 output
        pltpu.VMEM((75, 56), jnp.float32),    # 5x row-upsampled dec_conv2 output
    ]

    decoded2d, outval = pl.pallas_call(
        _cae_kernel,
        out_shape=out_shape,
        grid_spec=pltpu.PrefetchScalarGridSpec(
            num_scalar_prefetch=0,
            grid=(n,),
            in_specs=in_specs,
            out_specs=out_specs,
            scratch_shapes=scratch_shapes,
        ),
        compiler_params=pltpu.CompilerParams(
            dimension_semantics=("parallel",)),
    )(img3, act3, *weights)

    return decoded2d.reshape(n, IMG_H, IMG_W, IMG_C), outval.reshape(n, 1)


# ----------------------------------------------------------------------------
# Plain-JAX reference (for a correctness cross-check only).
# ----------------------------------------------------------------------------
def _conv_ref(x, w, b, stride, padding):
    y = jax.lax.conv_general_dilated(
        x, w, window_strides=(stride, stride), padding=padding,
        dimension_numbers=("NHWC", "HWIO", "NHWC"))
    return y + b


def reference_forward(raw, img, act):
    x = jax.nn.relu(_conv_ref(img, raw["w1"], raw["b1"], 4, "VALID"))
    x = jax.nn.relu(_conv_ref(x, raw["w2"], raw["b2"], 1, "VALID"))
    n = x.shape[0]
    enc = jax.nn.sigmoid(x.reshape(n, -1) @ raw["wd1"] + raw["bd1"])
    d = jax.nn.relu(enc @ raw["wd2"] + raw["bd2"]).reshape(n, 12, 4, 16)
    d = jax.nn.relu(_conv_ref(d, raw["wdc1"], raw["bdc1"], 1, ((1, 2), (1, 2))))
    d = jnp.repeat(jnp.repeat(d, 2, axis=1), 2, axis=2)
    d = jax.nn.relu(_conv_ref(d, raw["wdc2"], raw["bdc2"], 1, "VALID"))
    d = jnp.repeat(jnp.repeat(d, 5, axis=1), 5, axis=2)
    decoded = jax.nn.sigmoid(_conv_ref(d, raw["wdc3"], raw["bdc3"], 1, "VALID"))
    ewa = jnp.concatenate([enc, act], axis=-1)
    h = jax.nn.relu(ewa @ raw["whv"] + raw["bhv"])
    return decoded, h @ raw["wo"] + raw["bo"]


def world_module_forward(x):
    # TODO(synk): torch World_Module.forward is a literal stub (`return 0`);
    # reproduced exactly here, with no tensor compute of its own.
    return 0


if __name__ == "__main__":
    key = jax.random.PRNGKey(0)
    pkey, ikey, akey = jax.random.split(key, 3)
    raw = init_raw_params(pkey)
    kparams = prepare_kernel_params(raw)

    # Input shapes implied by the graph: image (N, 64, 32, 3) NHWC, action (N, 1)
    img = jax.random.uniform(ikey, (2, IMG_H, IMG_W, IMG_C), dtype=jnp.float32)
    act = jax.random.uniform(akey, (2, ACTION_DIM), dtype=jnp.float32)

    fwd = jax.jit(cae_critic_forward)
    decoded, output_val = fwd(kparams, img, act)
    jax.block_until_ready((decoded, output_val))

    assert decoded.shape == (2, IMG_H, IMG_W, IMG_C)
    assert output_val.shape == (2, 1)
    assert bool(jnp.all(jnp.isfinite(decoded)))
    assert bool(jnp.all(jnp.isfinite(output_val)))

    # Cross-check the fused Pallas kernel against a plain-JAX/XLA reference.
    ref_dec, ref_ov = jax.jit(reference_forward)(raw, img, act)
    assert bool(jnp.allclose(decoded, ref_dec, rtol=2e-3, atol=2e-3))
    assert bool(jnp.allclose(output_val, ref_ov, rtol=2e-3, atol=2e-3))

    assert world_module_forward(img) == 0  # literal World_Module.forward semantics
    print("KERNEL_OK")
</pallas_src>

<mosaic_0001>
module attributes {stable_mosaic.version = 11 : i64} {
  func.func @_cae_kernel(%arg0: i32, %arg1: memref<1x64x96xf32, #tpu.memory_space<vmem>>, %arg2: memref<1x1x1xf32, #tpu.memory_space<vmem>>, %arg3: memref<120x64xf32, #tpu.memory_space<vmem>>, %arg4: memref<8x96x56xf32, #tpu.memory_space<vmem>>, %arg5: memref<1x56xf32, #tpu.memory_space<vmem>>, %arg6: memref<4x56x64xf32, #tpu.memory_space<vmem>>, %arg7: memref<1x64xf32, #tpu.memory_space<vmem>>, %arg8: memref<768x32xf32, #tpu.memory_space<vmem>>, %arg9: memref<1x32xf32, #tpu.memory_space<vmem>>, %arg10: memref<32x768xf32, #tpu.memory_space<vmem>>, %arg11: memref<1x768xf32, #tpu.memory_space<vmem>>, %arg12: memref<4x112x64xf32, #tpu.memory_space<vmem>>, %arg13: memref<1x64xf32, #tpu.memory_space<vmem>>, %arg14: memref<24x12xf32, #tpu.memory_space<vmem>>, %arg15: memref<10x64x56xf32, #tpu.memory_space<vmem>>, %arg16: memref<1x56xf32, #tpu.memory_space<vmem>>, %arg17: memref<75x15xf32, #tpu.memory_space<vmem>>, %arg18: memref<12x56x96xf32, #tpu.memory_space<vmem>>, %arg19: memref<1x96xf32, #tpu.memory_space<vmem>>, %arg20: memref<32x20xf32, #tpu.memory_space<vmem>>, %arg21: memref<1x20xf32, #tpu.memory_space<vmem>>, %arg22: memref<1x20xf32, #tpu.memory_space<vmem>>, %arg23: memref<1x20xf32, #tpu.memory_space<vmem>>, %arg24: memref<1x1xf32, #tpu.memory_space<vmem>>, %arg25: memref<1x64x96xf32, #tpu.memory_space<vmem>>, %arg26: memref<1x1x1xf32, #tpu.memory_space<vmem>>, %arg27: memref<120x96xf32, #tpu.memory_space<vmem>>, %arg28: memref<15x56xf32, #tpu.memory_space<vmem>>, %arg29: memref<12x64xf32, #tpu.memory_space<vmem>>, %arg30: memref<8x768xf32, #tpu.memory_space<vmem>>, %arg31: memref<8x768xf32, #tpu.memory_space<vmem>>, %arg32: memref<15x112xf32, #tpu.memory_space<vmem>>, %arg33: memref<24x64xf32, #tpu.memory_space<vmem>>, %arg34: memref<75x56xf32, #tpu.memory_space<vmem>>) attributes {dimension_semantics = [#tpu.dimension_semantics<parallel>], iteration_bounds = array<i64: 2>, scalar_prefetch = 0 : i64, scratch_operands = 8 : i64, tpu.core_type = #tpu.core_type<tc>, window_params = [{transform_indices = @transform_0, window_bounds = array<i64: 1, 64, 96>}, {transform_indices = @transform_1, window_bounds = array<i64: 1, 1, 1>}, {pipeline_mode = #tpu.pipeline_mode<synchronous>, transform_indices = @transform_2, window_bounds = array<i64: 120, 64>}, {pipeline_mode = #tpu.pipeline_mode<synchronous>, transform_indices = @transform_3, window_bounds = array<i64: 8, 96, 56>}, {pipeline_mode = #tpu.pipeline_mode<synchronous>, transform_indices = @transform_4, window_bounds = array<i64: 1, 56>}, {pipeline_mode = #tpu.pipeline_mode<synchronous>, transform_indices = @transform_5, window_bounds = array<i64: 4, 56, 64>}, {pipeline_mode = #tpu.pipeline_mode<synchronous>, transform_indices = @transform_6, window_bounds = array<i64: 1, 64>}, {pipeline_mode = #tpu.pipeline_mode<synchronous>, transform_indices = @transform_7, window_bounds = array<i64: 768, 32>}, {pipeline_mode = #tpu.pipeline_mode<synchronous>, transform_indices = @transform_8, window_bounds = array<i64: 1, 32>}, {pipeline_mode = #tpu.pipeline_mode<synchronous>, transform_indices = @transform_9, window_bounds = array<i64: 32, 768>}, {pipeline_mode = #tpu.pipeline_mode<synchronous>, transform_indices = @transform_10, window_bounds = array<i64: 1, 768>}, {pipeline_mode = #tpu.pipeline_mode<synchronous>, transform_indices = @transform_11, window_bounds = array<i64: 4, 112, 64>}, {pipeline_mode = #tpu.pipeline_mode<synchronous>, transform_indices = @transform_12, window_bounds = array<i64: 1, 64>}, {pipeline_mode = #tpu.pipeline_mode<synchronous>, transform_indices = @transform_13, window_bounds = array<i64: 24, 12>}, {pipeline_mode = #tpu.pipeline_mode<synchronous>, transform_indices = @transform_14, window_bounds = array<i64: 10, 64, 56>}, {pipeline_mode = #tpu.pipeline_mode<synchronous>, transform_indices = @transform_15, window_bounds = array<i64: 1, 56>}, {pipeline_mode = #tpu.pipeline_mode<synchronous>, transform_indices = @transform_16, window_bounds = array<i64: 75, 15>}, {pipeline_mode = #tpu.pipeline_mode<synchronous>, transform_indices = @transform_17, window_bounds = array<i64: 12, 56, 96>}, {pipeline_mode = #tpu.pipeline_mode<synchronous>, transform_indices = @transform_18, window_bounds = array<i64: 1, 96>}, {pipeline_mode = #tpu.pipeline_mode<synchronous>, transform_indices = @transform_19, window_bounds = array<i64: 32, 20>}, {pipeline_mode = #tpu.pipeline_mode<synchronous>, transform_indices = @transform_20, window_bounds = array<i64: 1, 20>}, {pipeline_mode = #tpu.pipeline_mode<synchronous>, transform_indices = @transform_21, window_bounds = array<i64: 1, 20>}, {pipeline_mode = #tpu.pipeline_mode<synchronous>, transform_indices = @transform_22, window_bounds = array<i64: 1, 20>}, {pipeline_mode = #tpu.pipeline_mode<synchronous>, transform_indices = @transform_23, window_bounds = array<i64: 1, 1>}, {transform_indices = @transform_24, window_bounds = array<i64: 1, 64, 96>}, {transform_indices = @transform_25, window_bounds = array<i64: 1, 1, 1>}]} {
    %c0 = arith.constant 0 : index
    %c0_0 = arith.constant 0 : index
    %c0_1 = arith.constant 0 : index
    %0 = vector.load %arg1[%c0, %c0_0, %c0_1] : memref<1x64x96xf32, #tpu.memory_space<vmem>>, vector<1x64x96xf32>
    %1 = vector.shape_cast %0 : vector<1x64x96xf32> to vector<64x96xf32>
    %c0_2 = arith.constant 0 : index
    %c0_3 = arith.constant 0 : index
    %2 = vector.load %arg3[%c0_2, %c0_3] : memref<120x64xf32, #tpu.memory_space<vmem>>, vector<120x64xf32>
    %cst = arith.constant dense<0.000000e+00> : vector<120x96xf32>
    %3 = tpu.matmul %2, %1, %cst {dimension_numbers = #tpu.dot_dimension_numbers<[1], [0], [0], [1], [0, 0, 1, 1], [], []>} : vector<120x64xf32>, vector<64x96xf32>, vector<120x96xf32> -> vector<120x96xf32>
    %c0_4 = arith.constant 0 : index
    %c0_5 = arith.constant 0 : index
    %4 = vector.load %arg27[%c0_4, %c0_5] : memref<120x96xf32, #tpu.memory_space<vmem>>, vector<120x96xf32>
    tpu.vector_store %arg27[%c0_4, %c0_5], %3 {strides = array<i32>} : memref<120x96xf32, #tpu.memory_space<vmem>>, vector<120x96xf32>,
    %cst_6 = arith.constant 0.000000e+00 : f32
    %5 = vector.broadcast %cst_6 : f32 to vector<15x56xf32>
    %c0_7 = arith.constant 0 : index
    %c0_8 = arith.constant 0 : index
    %6 = vector.load %arg27[%c0_7, %c0_8] : memref<120x96xf32, #tpu.memory_space<vmem>>, vector<15x96xf32>
    %c0_9 = arith.constant 0 : index
    %c0_10 = arith.constant 0 : index
    %c0_11 = arith.constant 0 : index
    %7 = vector.load %arg4[%c0_9, %c0_10, %c0_11] : memref<8x96x56xf32, #tpu.memory_space<vmem>>, vector<1x96x56xf32>
    %8 = vector.shape_cast %7 : vector<1x96x56xf32> to vector<96x56xf32>
    %cst_12 = arith.constant dense<0.000000e+00> : vector<15x56xf32>
    %9 = tpu.matmul %6, %8, %cst_12 {dimension_numbers = #tpu.dot_dimension_numbers<[1], [0], [0], [1], [0, 0, 1, 1], [], []>} : vector<15x96xf32>, vector<96x56xf32>, vector<15x56xf32> -> vector<15x56xf32>
    %10 = arith.addf %5, %9 : vector<15x56xf32>
    %c15 = arith.constant 15 : index
    %c0_13 = arith.constant 0 : index
    %11 = vector.load %arg27[%c15, %c0_13] : memref<120x96xf32, #tpu.memory_space<vmem>>, vector<15x96xf32>
    %c1 = arith.constant 1 : index
    %c0_14 = arith.constant 0 : index
    %c0_15 = arith.constant 0 : index
    %12 = vector.load %arg4[%c1, %c0_14, %c0_15] : memref<8x96x56xf32, #tpu.memory_space<vmem>>, vector<1x96x56xf32>
    %13 = vector.shape_cast %12 : vector<1x96x56xf32> to vector<96x56xf32>
    %cst_16 = arith.constant dense<0.000000e+00> : vector<15x56xf32>
    %14 = tpu.matmul %11, %13, %cst_16 {dimension_numbers = #tpu.dot_dimension_numbers<[1], [0], [0], [1], [0, 0, 1, 1], [], []>} : vector<15x96xf32>, vector<96x56xf32>, vector<15x56xf32> -> vector<15x56xf32>
    %15 = arith.addf %10, %14 : vector<15x56xf32>
    %c30 = arith.constant 30 : index
    %c0_17 = arith.constant 0 : index
    %16 = vector.load %arg27[%c30, %c0_17] : memref<120x96xf32, #tpu.memory_space<vmem>>, vector<15x96xf32>
    %c2 = arith.constant 2 : index
    %c0_18 = arith.constant 0 : index
    %c0_19 = arith.constant 0 : index
    %17 = vector.load %arg4[%c2, %c0_18, %c0_19] : memref<8x96x56xf32, #tpu.memory_space<vmem>>, vector<1x96x56xf32>
    %18 = vector.shape_cast %17 : vector<1x96x56xf32> to vector<96x56xf32>
    %cst_20 = arith.constant dense<0.000000e+00> : vector<15x56xf32>
    %19 = tpu.matmul %16, %18, %cst_20 {dimension_numbers = #tpu.dot_dimension_numbers<[1], [0], [0], [1], [0, 0, 1, 1], [], []>} : vector<15x96xf32>, vector<96x56xf32>, vector<15x56xf32> -> vector<15x56xf32>
    %20 = arith.addf %15, %19 : vector<15x56xf32>
    %c45 = arith.constant 45 : index
    %c0_21 = arith.constant 0 : index
    %21 = vector.load %arg27[%c45, %c0_21] : memref<120x96xf32, #tpu.memory_space<vmem>>, vector<15x96xf32>
    %c3 = arith.constant 3 : index
    %c0_22 = arith.constant 0 : index
    %c0_23 = arith.constant 0 : index
    %22 = vector.load %arg4[%c3, %c0_22, %c0_23] : memref<8x96x56xf32, #tpu.memory_space<vmem>>, vector<1x96x56xf32>
    %23 = vector.shape_cast %22 : vector<1x96x56xf32> to vector<96x56xf32>
    %cst_24 = arith.constant dense<0.000000e+00> : vector<15x56xf32>
    %24 = tpu.matmul %21, %23, %cst_24 {dimension_numbers = #tpu.dot_dimension_numbers<[1], [0], [0], [1], [0, 0, 1, 1], [], []>} : vector<15x96xf32>, vector<96x56xf32>, vector<15x56xf32> -> vector<15x56xf32>
    %25 = arith.addf %20, %24 : vector<15x56xf32>
    %c60 = arith.constant 60 : index
    %c0_25 = arith.constant 0 : index
    %26 = vector.load %arg27[%c60, %c0_25] : memref<120x96xf32, #tpu.memory_space<vmem>>, vector<15x96xf32>
    %c4 = arith.constant 4 : index
    %c0_26 = arith.constant 0 : index
    %c0_27 = arith.constant 0 : index
    %27 = vector.load %arg4[%c4, %c0_26, %c0_27] : memref<8x96x56xf32, #tpu.memory_space<vmem>>, vector<1x96x56xf32>
    %28 = vector.shape_cast %27 : vector<1x96x56xf32> to vector<96x56xf32>
    %cst_28 = arith.constant dense<0.000000e+00> : vector<15x56xf32>
    %29 = tpu.matmul %26, %28, %cst_28 {dimension_numbers = #tpu.dot_dimension_numbers<[1], [0], [0], [1], [0, 0, 1, 1], [], []>} : vector<15x96xf32>, vector<96x56xf32>, vector<15x56xf32> -> vector<15x56xf32>
    %30 = arith.addf %25, %29 : vector<15x56xf32>
    %c75 = arith.constant 75 : index
    %c0_29 = arith.constant 0 : index
    %31 = vector.load %arg27[%c75, %c0_29] : memref<120x96xf32, #tpu.memory_space<vmem>>, vector<15x96xf32>
    %c5 = arith.constant 5 : index
    %c0_30 = arith.constant 0 : index
    %c0_31 = arith.constant 0 : index
    %32 = vector.load %arg4[%c5, %c0_30, %c0_31] : memref<8x96x56xf32, #tpu.memory_space<vmem>>, vector<1x96x56xf32>
    %33 = vector.shape_cast %32 : vector<1x96x56xf32> to vector<96x56xf32>
    %cst_32 = arith.constant dense<0.000000e+00> : vector<15x56xf32>
    %34 = tpu.matmul %31, %33, %cst_32 {dimension_numbers = #tpu.dot_dimension_numbers<[1], [0], [0], [1], [0, 0, 1, 1], [], []>} : vector<15x96xf32>, vector<96x56xf32>, vector<15x56xf32> -> vector<15x56xf32>
    %35 = arith.addf %30, %34 : vector<15x56xf32>
    %c90 = arith.constant 90 : index
    %c0_33 = arith.constant 0 : index
    %36 = vector.load %arg27[%c90, %c0_33] : memref<120x96xf32, #tpu.memory_space<vmem>>, vector<15x96xf32>
    %c6 = arith.constant 6 : index
    %c0_34 = arith.constant 0 : index
    %c0_35 = arith.constant 0 : index
    %37 = vector.load %arg4[%c6, %c0_34, %c0_35] : memref<8x96x56xf32, #tpu.memory_space<vmem>>, vector<1x96x56xf32>
    %38 = vector.shape_cast %37 : vector<1x96x56xf32> to vector<96x56xf32>
    %cst_36 = arith.constant dense<0.000000e+00> : vector<15x56xf32>
    %39 = tpu.matmul %36, %38, %cst_36 {dimension_numbers = #tpu.dot_dimension_numbers<[1], [0], [0], [1], [0, 0, 1, 1], [], []>} : vector<15x96xf32>, vector<96x56xf32>, vector<15x56xf32> -> vector<15x56xf32>
    %40 = arith.addf %35, %39 : vector<15x56xf32>
    %c105 = arith.constant 105 : index
    %c0_37 = arith.constant 0 : index
    %41 = vector.load %arg27[%c105, %c0_37] : memref<120x96xf32, #tpu.memory_space<vmem>>, vector<15x96xf32>
    %c7 = arith.constant 7 : index
    %c0_38 = arith.constant 0 : index
    %c0_39 = arith.constant 0 : index
    %42 = vector.load %arg4[%c7, %c0_38, %c0_39] : memref<8x96x56xf32, #tpu.memory_space<vmem>>, vector<1x96x56xf32>
    %43 = vector.shape_cast %42 : vector<1x96x56xf32> to vector<96x56xf32>
    %cst_40 = arith.constant dense<0.000000e+00> : vector<15x56xf32>
    %44 = tpu.matmul %41, %43, %cst_40 {dimension_numbers = #tpu.dot_dimension_numbers<[1], [0], [0], [1], [0, 0, 1, 1], [], []>} : vector<15x96xf32>, vector<96x56xf32>, vector<15x56xf32> -> vector<15x56xf32>
    %45 = arith.addf %40, %44 : vector<15x56xf32>
    %c0_41 = arith.constant 0 : index
    %c0_42 = arith.constant 0 : index
    %46 = vector.load %arg5[%c0_41, %c0_42] : memref<1x56xf32, #tpu.memory_space<vmem>>, vector<1x56xf32>
    %47 = vector.broadcast %46 : vector<1x56xf32> to vector<15x56xf32>
    %48 = arith.addf %45, %47 : vector<15x56xf32>
    %cst_43 = arith.constant 0.000000e+00 : f32
    %49 = vector.broadcast %cst_43 : f32 to vector<15x56xf32>
    %50 = arith.maximumf %48, %49 : vector<15x56xf32>
    %c0_44 = arith.constant 0 : index
    %c0_45 = arith.constant 0 : index
    %51 = vector.load %arg28[%c0_44, %c0_45] : memref<15x56xf32, #tpu.memory_space<vmem>>, vector<15x56xf32>
    tpu.vector_store %arg28[%c0_44, %c0_45], %50 {strides = array<i32>} : memref<15x56xf32, #tpu.memory_space<vmem>>, vector<15x56xf32>,
    %cst_46 = arith.constant 0.000000e+00 : f32
    %52 = vector.broadcast %cst_46 : f32 to vector<12x64xf32>
    %c0_47 = arith.constant 0 : index
    %c0_48 = arith.constant 0 : index
    %53 = vector.load %arg28[%c0_47, %c0_48] : memref<15x56xf32, #tpu.memory_space<vmem>>, vector<12x56xf32>
    %c0_49 = arith.constant 0 : index
    %c0_50 = arith.constant 0 : index
    %c0_51 = arith.constant 0 : index
    %54 = vector.load %arg6[%c0_49, %c0_50, %c0_51] : memref<4x56x64xf32, #tpu.memory_space<vmem>>, vector<1x56x64xf32>
    %55 = vector.shape_cast %54 : vector<1x56x64xf32> to vector<56x64xf32>
    %cst_52 = arith.constant dense<0.000000e+00> : vector<12x64xf32>
    %56 = tpu.matmul %53, %55, %cst_52 {dimension_numbers = #tpu.dot_dimension_numbers<[1], [0], [0], [1], [0, 0, 1, 1], [], []>} : vector<12x56xf32>, vector<56x64xf32>, vector<12x64xf32> -> vector<12x64xf32>
    %57 = arith.addf %52, %56 : vector<12x64xf32>
    %c1_53 = arith.constant 1 : index
    %c0_54 = arith.constant 0 : index
    %58 = vector.load %arg28[%c1_53, %c0_54] : memref<15x56xf32, #tpu.memory_space<vmem>>, vector<12x56xf32>
    %c1_55 = arith.constant 1 : index
    %c0_56 = arith.constant 0 : index
    %c0_57 = arith.constant 0 : index
    %59 = vector.load %arg6[%c1_55, %c0_56, %c0_57] : memref<4x56x64xf32, #tpu.memory_space<vmem>>, vector<1x56x64xf32>
    %60 = vector.shape_cast %59 : vector<1x56x64xf32> to vector<56x64xf32>
    %cst_58 = arith.constant dense<0.000000e+00> : vector<12x64xf32>
    %61 = tpu.matmul %58, %60, %cst_58 {dimension_numbers = #tpu.dot_dimension_numbers<[1], [0], [0], [1], [0, 0, 1, 1], [], []>} : vector<12x56xf32>, vector<56x64xf32>, vector<12x64xf32> -> vector<12x64xf32>
    %62 = arith.addf %57, %61 : vector<12x64xf32>
    %c2_59 = arith.constant 2 : index
    %c0_60 = arith.constant 0 : index
    %63 = vector.load %arg28[%c2_59, %c0_60] : memref<15x56xf32, #tpu.memory_space<vmem>>, vector<12x56xf32>
    %c2_61 = arith.constant 2 : index
    %c0_62 = arith.constant 0 : index
    %c0_63 = arith.constant 0 : index
    %64 = vector.load %arg6[%c2_61, %c0_62, %c0_63] : memref<4x56x64xf32, #tpu.memory_space<vmem>>, vector<1x56x64xf32>
    %65 = vector.shape_cast %64 : vector<1x56x64xf32> to vector<56x64xf32>
    %cst_64 = arith.constant dense<0.000000e+00> : vector<12x64xf32>
    %66 = tpu.matmul %63, %65, %cst_64 {dimension_numbers = #tpu.dot_dimension_numbers<[1], [0], [0], [1], [0, 0, 1, 1], [], []>} : vector<12x56xf32>, vector<56x64xf32>, vector<12x64xf32> -> vector<12x64xf32>
    %67 = arith.addf %62, %66 : vector<12x64xf32>
    %c3_65 = arith.constant 3 : index
    %c0_66 = arith.constant 0 : index
    %68 = vector.load %arg28[%c3_65, %c0_66] : memref<15x56xf32, #tpu.memory_space<vmem>>, vector<12x56xf32>
    %c3_67 = arith.constant 3 : index
    %c0_68 = arith.constant 0 : index
    %c0_69 = arith.constant 0 : index
    %69 = vector.load %arg6[%c3_67, %c0_68, %c0_69] : memref<4x56x64xf32, #tpu.memory_space<vmem>>, vector<1x56x64xf32>
    %70 = vector.shape_cast %69 : vector<1x56x64xf32> to vector<56x64xf32>
    %cst_70 = arith.constant dense<0.000000e+00> : vector<12x64xf32>
    %71 = tpu.matmul %68, %70, %cst_70 {dimension_numbers = #tpu.dot_dimension_numbers<[1], [0], [0], [1], [0, 0, 1, 1], [], []>} : vector<12x56xf32>, vector<56x64xf32>, vector<12x64xf32> -> vector<12x64xf32>
    %72 = arith.addf %67, %71 : vector<12x64xf32>
    %c0_71 = arith.constant 0 : index
    %c0_72 = arith.constant 0 : index
    %73 = vector.load %arg7[%c0_71, %c0_72] : memref<1x64xf32, #tpu.memory_space<vmem>>, vector<1x64xf32>
    %74 = vector.broadcast %73 : vector<1x64xf32> to vector<12x64xf32>
    %75 = arith.addf %72, %74 : vector<12x64xf32>
    %cst_73 = arith.constant 0.000000e+00 : f32
    %76 = vector.broadcast %cst_73 : f32 to vector<12x64xf32>
    %77 = arith.maximumf %75, %76 : vector<12x64xf32>
    %c0_74 = arith.constant 0 : index
    %c0_75 = arith.constant 0 : index
    %78 = vector.load %arg29[%c0_74, %c0_75] : memref<12x64xf32, #tpu.memory_space<vmem>>, vector<12x64xf32>
    tpu.vector_store %arg29[%c0_74, %c0_75], %77 {strides = array<i32>} : memref<12x64xf32, #tpu.memory_space<vmem>>, vector<12x64xf32>,
    %cst_76 = arith.constant 0.000000e+00 : f32
    %79 = vector.broadcast %cst_76 : f32 to vector<8x768xf32>
    %c0_77 = arith.constant 0 : index
    %c0_78 = arith.constant 0 : index
    %80 = vector.load %arg30[%c0_77, %c0_78] : memref<8x768xf32, #tpu.memory_space<vmem>>, vector<8x768xf32>
    tpu.vector_store %arg30[%c0_77, %c0_78], %79 {strides = array<i32>} : memref<8x768xf32, #tpu.memory_space<vmem>>, vector<8x768xf32>,
    %c0_79 = arith.constant 0 : index
    %c0_80 = arith.constant 0 : index
    %81 = vector.load %arg29[%c0_79, %c0_80] : memref<12x64xf32, #tpu.memory_space<vmem>>, vector<1x64xf32>
    %c0_81 = arith.constant 0 : index
    %c0_82 = arith.constant 0 : index
    %82 = vector.load %arg30[%c0_81, %c0_82] : memref<8x768xf32, #tpu.memory_space<vmem>>, vector<1x64xf32>
    tpu.vector_store %arg30[%c0_81, %c0_82], %81 {strides = array<i32>} : memref<8x768xf32, #tpu.memory_space<vmem>>, vector<1x64xf32>,
    %c1_83 = arith.constant 1 : index
    %c0_84 = arith.constant 0 : index
    %83 = vector.load %arg29[%c1_83, %c0_84] : memref<12x64xf32, #tpu.memory_space<vmem>>, vector<1x64xf32>
    %c0_85 = arith.constant 0 : index
    %c64 = arith.constant 64 : index
    %84 = vector.load %arg30[%c0_85, %c64] : memref<8x768xf32, #tpu.memory_space<vmem>>, vector<1x64xf32>
    tpu.vector_store %arg30[%c0_85, %c64], %83 {strides = array<i32>} : memref<8x768xf32, #tpu.memory_space<vmem>>, vector<1x64xf32>,
    %c2_86 = arith.constant 2 : index
    %c0_87 = arith.constant 0 : index
    %85 = vector.load %arg29[%c2_86, %c0_87] : memref<12x64xf32, #tpu.memory_space<vmem>>, vector<1x64xf32>
    %c0_88 = arith.constant 0 : index
    %c128 = arith.constant 128 : index
    %86 = vector.load %arg30[%c0_88, %c128] : memref<8x768xf32, #tpu.memory_space<vmem>>, vector<1x64xf32>
    tpu.vector_store %arg30[%c0_88, %c128], %85 {strides = array<i32>} : memref<8x768xf32, #tpu.memory_space<vmem>>, vector<1x64xf32>,
    %c3_89 = arith.constant 3 : index
    %c0_90 = arith.constant 0 : index
    %87 = vector.load %arg29[%c3_89, %c0_90] : memref<12x64xf32, #tpu.memory_space<vmem>>, vector<1x64xf32>
    %c0_91 = arith.constant 0 : index
    %c192 = arith.constant 192 : index
    %88 = vector.load %arg30[%c0_91, %c192] : memref<8x768xf32, #tpu.memory_space<vmem>>, vector<1x64xf32>
    tpu.vector_store %arg30[%c0_91, %c192], %87 {strides = array<i32>} : memref<8x768xf32, #tpu.memory_space<vmem>>, vector<1x64xf32>,
    %c4_92 = arith.constant 4 : index
    %c0_93 = arith.constant 0 : index
    %89 = vector.load %arg29[%c4_92, %c0_93] : memref<12x64xf32, #tpu.memory_space<vmem>>, vector<1x64xf32>
    %c0_94 = arith.constant 0 : index
    %c256 = arith.constant 256 : index
    %90 = vector.load %arg30[%c0_94, %c256] : memref<8x768xf32, #tpu.memory_space<vmem>>, vector<1x64xf32>
    tpu.vector_store %arg30[%c0_94, %c256], %89 {strides = array<i32>} : memref<8x768xf32, #tpu.memory_space<vmem>>, vector<1x64xf32>,
    %c5_95 = arith.constant 5 : index
    %c0_96 = arith.constant 0 : index
    %91 = vector.load %arg29[%c5_95, %c0_96] : memref<12x64xf32, #tpu.memory_space<vmem>>, vector<1x64xf32>
    %c0_97 = arith.constant 0 : index
    %c320 = arith.constant 320 : index
    %92 = vector.load %arg30[%c0_97, %c320] : memref<8x768xf32, #tpu.memory_space<vmem>>, vector<1x64xf32>
    tpu.vector_store %arg30[%c0_97, %c320], %91 {strides = array<i32>} : memref<8x768xf32, #tpu.memory_space<vmem>>, vector<1x64xf32>,
    %c6_98 = arith.constant 6 : index
    %c0_99 = arith.constant 0 : index
    %93 = vector.load %arg29[%c6_98, %c0_99] : memref<12x64xf32, #tpu.memory_space<vmem>>, vector<1x64xf32>
    %c0_100 = arith.constant 0 : index
    %c384 = arith.constant 384 : index
    %94 = vector.load %arg30[%c0_100, %c384] : memref<8x768xf32, #tpu.memory_space<vmem>>, vector<1x64xf32>
    tpu.vector_store %arg30[%c0_100, %c384], %93 {strides = array<i32>} : memref<8x768xf32, #tpu.memory_space<vmem>>, vector<1x64xf32>,
    %c7_101 = arith.constant 7 : index
    %c0_102 = arith.constant 0 : index
    %95 = vector.load %arg29[%c7_101, %c0_102] : memref<12x64xf32, #tpu.memory_space<vmem>>, vector<1x64xf32>
    %c0_103 = arith.constant 0 : index
    %c448 = arith.constant 448 : index
    %96 = vector.load %arg30[%c0_103, %c448] : memref<8x768xf32, #tpu.memory_space<vmem>>, vector<1x64xf32>
    tpu.vector_store %arg30[%c0_103, %c448], %95 {strides = array<i32>} : memref<8x768xf32, #tpu.memory_space<vmem>>, vector<1x64xf32>,
    %c8 = arith.constant 8 : index
    %c0_104 = arith.constant 0 : index
    %97 = vector.load %arg29[%c8, %c0_104] : memref<12x64xf32, #tpu.memory_space<vmem>>, vector<1x64xf32>
    %c0_105 = arith.constant 0 : index
    %c512 = arith.constant 512 : index
    %98 = vector.load %arg30[%c0_105, %c512] : memref<8x768xf32, #tpu.memory_space<vmem>>, vector<1x64xf32>
    tpu.vector_store %arg30[%c0_105, %c512], %97 {strides = array<i32>} : memref<8x768xf32, #tpu.memory_space<vmem>>, vector<1x64xf32>,
    %c9 = arith.constant 9 : index
    %c0_106 = arith.constant 0 : index
    %99 = vector.load %arg29[%c9, %c0_106] : memref<12x64xf32, #tpu.memory_space<vmem>>, vector<1x64xf32>
    %c0_107 = arith.constant 0 : index
    %c576 = arith.constant 576 : index
    %100 = vector.load %arg30[%c0_107, %c576] : memref<8x768xf32, #tpu.memory_space<vmem>>, vector<1x64xf32>
    tpu.vector_store %arg30[%c0_107, %c576], %99 {strides = array<i32>} : memref<8x768xf32, #tpu.memory_space<vmem>>, vector<1x64xf32>,
    %c10 = arith.constant 10 : index
    %c0_108 = arith.constant 0 : index
    %101 = vector.load %arg29[%c10, %c0_108] : memref<12x64xf32, #tpu.memory_space<vmem>>, vector<1x64xf32>
    %c0_109 = arith.constant 0 : index
    %c640 = arith.constant 640 : index
    %102 = vector.load %arg30[%c0_109, %c640] : memref<8x768xf32, #tpu.memory_space<vmem>>, vector<1x64xf32>
    tpu.vector_store %arg30[%c0_109, %c640], %101 {strides = array<i32>} : memref<8x768xf32, #tpu.memory_space<vmem>>, vector<1x64xf32>,
    %c11 = arith.constant 11 : index
    %c0_110 = arith.constant 0 : index
    %103 = vector.load %arg29[%c11, %c0_110] : memref<12x64xf32, #tpu.memory_space<vmem>>, vector<1x64xf32>
    %c0_111 = arith.constant 0 : index
    %c704 = arith.constant 704 : index
    %104 = vector.load %arg30[%c0_111, %c704] : memref<8x768xf32, #tpu.memory_space<vmem>>, vector<1x64xf32>
    tpu.vector_store %arg30[%c0_111, %c704], %103 {strides = array<i32>} : memref<8x768xf32, #tpu.memory_space<vmem>>, vector<1x64xf32>,
    %c0_112 = arith.constant 0 : index
    %c0_113 = arith.constant 0 : index
    %105 = vector.load %arg30[%c0_112, %c0_113] : memref<8x768xf32, #tpu.memory_space<vmem>>, vector<8x768xf32>
    %c0_114 = arith.constant 0 : index
    %c0_115 = arith.constant 0 : index
    %106 = vector.load %arg8[%c0_114, %c0_115] : memref<768x32xf32, #tpu.memory_space<vmem>>, vector<768x32xf32>
    %cst_116 = arith.constant dense<0.000000e+00> : vector<8x32xf32>
    %107 = tpu.matmul %105, %106, %cst_116 {dimension_numbers = #tpu.dot_dimension_numbers<[1], [0], [0], [1], [0, 0, 1, 1], [], []>} : vector<8x768xf32>, vector<768x32xf32>, vector<8x32xf32> -> vector<8x32xf32>
    %c0_117 = arith.constant 0 : index
    %c0_118 = arith.constant 0 : index
    %108 = vector.load %arg9[%c0_117, %c0_118] : memref<1x32xf32, #tpu.memory_space<vmem>>, vector<1x32xf32>
    %109 = vector.broadcast %108 : vector<1x32xf32> to vector<8x32xf32>
    %110 = arith.addf %107, %109 : vector<8x32xf32>
    %111 = arith.negf %110 : vector<8x32xf32>
    %112 = math.exp %111 : vector<8x32xf32>
    %cst_119 = arith.constant 1.000000e+00 : f32
    %113 = vector.broadcast %cst_119 : f32 to vector<8x32xf32>
    %114 = arith.addf %113, %112 : vector<8x32xf32>
    %115 = arith.divf %113, %114 : vector<8x32xf32>
    %c0_120 = arith.constant 0 : index
    %c0_121 = arith.constant 0 : index
    %116 = vector.load %arg10[%c0_120, %c0_121] : memref<32x768xf32, #tpu.memory_space<vmem>>, vector<32x768xf32>
    %cst_122 = arith.constant dense<0.000000e+00> : vector<8x768xf32>
    %117 = tpu.matmul %115, %116, %cst_122 {dimension_numbers = #tpu.dot_dimension_numbers<[1], [0], [0], [1], [0, 0, 1, 1], [], []>} : vector<8x32xf32>, vector<32x768xf32>, vector<8x768xf32> -> vector<8x768xf32>
    %c0_123 = arith.constant 0 : index
    %c0_124 = arith.constant 0 : index
    %118 = vector.load %arg11[%c0_123, %c0_124] : memref<1x768xf32, #tpu.memory_space<vmem>>, vector<1x768xf32>
    %119 = vector.broadcast %118 : vector<1x768xf32> to vector<8x768xf32>
    %120 = arith.addf %117, %119 : vector<8x768xf32>
    %cst_125 = arith.constant 0.000000e+00 : f32
    %121 = vector.broadcast %cst_125 : f32 to vector<8x768xf32>
    %122 = arith.maximumf %120, %121 : vector<8x768xf32>
    %c0_126 = arith.constant 0 : index
    %c0_127 = arith.constant 0 : index
    %123 = vector.load %arg31[%c0_126, %c0_127] : memref<8x768xf32, #tpu.memory_space<vmem>>, vector<8x768xf32>
    tpu.vector_store %arg31[%c0_126, %c0_127], %122 {strides = array<i32>} : memref<8x768xf32, #tpu.memory_space<vmem>>, vector<8x768xf32>,
    %cst_128 = arith.constant 0.000000e+00 : f32
    %124 = vector.broadcast %cst_128 : f32 to vector<15x112xf32>
    %c0_129 = arith.constant 0 : index
    %c0_130 = arith.constant 0 : index
    %125 = vector.load %arg32[%c0_129, %c0_130] : memref<15x112xf32, #tpu.memory_space<vmem>>, vector<15x112xf32>
    tpu.vector_store %arg32[%c0_129, %c0_130], %124 {strides = array<i32>} : memref<15x112xf32, #tpu.memory_space<vmem>>, vector<15x112xf32>,
    %c0_131 = arith.constant 0 : index
    %c0_132 = arith.constant 0 : index
    %126 = vector.load %arg31[%c0_131, %c0_132] : memref<8x768xf32, #tpu.memory_space<vmem>>, vector<1x64xf32>
    %c1_133 = arith.constant 1 : index
    %c16 = arith.constant 16 : index
    %127 = vector.load %arg32[%c1_133, %c16] : memref<15x112xf32, #tpu.memory_space<vmem>>, vector<1x64xf32>
    tpu.vector_store %arg32[%c1_133, %c16], %126 {strides = array<i32>} : memref<15x112xf32, #tpu.memory_space<vmem>>, vector<1x64xf32>,
    %c0_134 = arith.constant 0 : index
    %c64_135 = arith.constant 64 : index
    %128 = vector.load %arg31[%c0_134, %c64_135] : memref<8x768xf32, #tpu.memory_space<vmem>>, vector<1x64xf32>
    %c2_136 = arith.constant 2 : index
    %c16_137 = arith.constant 16 : index
    %129 = vector.load %arg32[%c2_136, %c16_137] : memref<15x112xf32, #tpu.memory_space<vmem>>, vector<1x64xf32>
    tpu.vector_store %arg32[%c2_136, %c16_137], %128 {strides = array<i32>} : memref<15x112xf32, #tpu.memory_space<vmem>>, vector<1x64xf32>,
    %c0_138 = arith.constant 0 : index
    %c128_139 = arith.constant 128 : index
    %130 = vector.load %arg31[%c0_138, %c128_139] : memref<8x768xf32, #tpu.memory_space<vmem>>, vector<1x64xf32>
    %c3_140 = arith.constant 3 : index
    %c16_141 = arith.constant 16 : index
    %131 = vector.load %arg32[%c3_140, %c16_141] : memref<15x112xf32, #tpu.memory_space<vmem>>, vector<1x64xf32>
    tpu.vector_store %arg32[%c3_140, %c16_141], %130 {strides = array<i32>} : memref<15x112xf32, #tpu.memory_space<vmem>>, vector<1x64xf32>,
    %c0_142 = arith.constant 0 : index
    %c192_143 = arith.constant 192 : index
    %132 = vector.load %arg31[%c0_142, %c192_143] : memref<8x768xf32, #tpu.memory_space<vmem>>, vector<1x64xf32>
    %c4_144 = arith.constant 4 : index
    %c16_145 = arith.constant 16 : index
    %133 = vector.load %arg32[%c4_144, %c16_145] : memref<15x112xf32, #tpu.memory_space<vmem>>, vector<1x64xf32>
    tpu.vector_store %arg32[%c4_144, %c16_145], %132 {strides = array<i32>} : memref<15x112xf32, #tpu.memory_space<vmem>>, vector<1x64xf32>,
    %c0_146 = arith.constant 0 : index
    %c256_147 = arith.constant 256 : index
    %134 = vector.load %arg31[%c0_146, %c256_147] : memref<8x768xf32, #tpu.memory_space<vmem>>, vector<1x64xf32>
    %c5_148 = arith.constant 5 : index
    %c16_149 = arith.constant 16 : index
    %135 = vector.load %arg32[%c5_148, %c16_149] : memref<15x112xf32, #tpu.memory_space<vmem>>, vector<1x64xf32>
    tpu.vector_store %arg32[%c5_148, %c16_149], %134 {strides = array<i32>} : memref<15x112xf32, #tpu.memory_space<vmem>>, vector<1x64xf32>,
    %c0_150 = arith.constant 0 : index
    %c320_151 = arith.constant 320 : index
    %136 = vector.load %arg31[%c0_150, %c320_151] : memref<8x768xf32, #tpu.memory_space<vmem>>, vector<1x64xf32>
    %c6_152 = arith.constant 6 : index
    %c16_153 = arith.constant 16 : index
    %137 = vector.load %arg32[%c6_152, %c16_153] : memref<15x112xf32, #tpu.memory_space<vmem>>, vector<1x64xf32>
    tpu.vector_store %arg32[%c6_152, %c16_153], %136 {strides = array<i32>} : memref<15x112xf32, #tpu.memory_space<vmem>>, vector<1x64xf32>,
    %c0_154 = arith.constant 0 : index
    %c384_155 = arith.constant 384 : index
    %138 = vector.load %arg31[%c0_154, %c384_155] : memref<8x768xf32, #tpu.memory_space<vmem>>, vector<1x64xf32>
    %c7_156 = arith.constant 7 : index
    %c16_157 = arith.constant 16 : index
    %139 = vector.load %arg32[%c7_156, %c16_157] : memref<15x112xf32, #tpu.memory_space<vmem>>, vector<1x64xf32>
    tpu.vector_store %arg32[%c7_156, %c16_157], %138 {strides = array<i32>} : memref<15x112xf32, #tpu.memory_space<vmem>>, vector<1x64xf32>,
    %c0_158 = arith.constant 0 : index
    %c448_159 = arith.constant 448 : index
    %140 = vector.load %arg31[%c0_158, %c448_159] : memref<8x768xf32, #tpu.memory_space<vmem>>, vector<1x64xf32>
    %c8_160 = arith.constant 8 : index
    %c16_161 = arith.constant 16 : index
    %141 = vector.load %arg32[%c8_160, %c16_161] : memref<15x112xf32, #tpu.memory_space<vmem>>, vector<1x64xf32>
    tpu.vector_store %arg32[%c8_160, %c16_161], %140 {strides = array<i32>} : memref<15x112xf32, #tpu.memory_space<vmem>>, vector<1x64xf32>,
    %c0_162 = arith.constant 0 : index
    %c512_163 = arith.constant 512 : index
    %142 = vector.load %arg31[%c0_162, %c512_163] : memref<8x768xf32, #tpu.memory_space<vmem>>, vector<1x64xf32>
    %c9_164 = arith.constant 9 : index
    %c16_165 = arith.constant 16 : index
    %143 = vector.load %arg32[%c9_164, %c16_165] : memref<15x112xf32, #tpu.memory_space<vmem>>, vector<1x64xf32>
    tpu.vector_store %arg32[%c9_164, %c16_165], %142 {strides = array<i32>} : memref<15x112xf32, #tpu.memory_space<vmem>>, vector<1x64xf32>,
    %c0_166 = arith.constant 0 : index
    %c576_167 = arith.constant 576 : index
    %144 = vector.load %arg31[%c0_166, %c576_167] : memref<8x768xf32, #tpu.memory_space<vmem>>, vector<1x64xf32>
    %c10_168 = arith.constant 10 : index
    %c16_169 = arith.constant 16 : index
    %145 = vector.load %arg32[%c10_168, %c16_169] : memref<15x112xf32, #tpu.memory_space<vmem>>, vector<1x64xf32>
    tpu.vector_store %arg32[%c10_168, %c16_169], %144 {strides = array<i32>} : memref<15x112xf32, #tpu.memory_space<vmem>>, vector<1x64xf32>,
    %c0_170 = arith.constant 0 : index
    %c640_171 = arith.constant 640 : index
    %146 = vector.load %arg31[%c0_170, %c640_171] : memref<8x768xf32, #tpu.memory_space<vmem>>, vector<1x64xf32>
    %c11_172 = arith.constant 11 : index
    %c16_173 = arith.constant 16 : index
    %147 = vector.load %arg32[%c11_172, %c16_173] : memref<15x112xf32, #tpu.memory_space<vmem>>, vector<1x64xf32>
    tpu.vector_store %arg32[%c11_172, %c16_173], %146 {strides = array<i32>} : memref<15x112xf32, #tpu.memory_space<vmem>>, vector<1x64xf32>,
    %c0_174 = arith.constant 0 : index
    %c704_175 = arith.constant 704 : index
    %148 = vector.load %arg31[%c0_174, %c704_175] : memref<8x768xf32, #tpu.memory_space<vmem>>, vector<1x64xf32>
    %c12 = arith.constant 12 : index
    %c16_176 = arith.constant 16 : index
    %149 = vector.load %arg32[%c12, %c16_176] : memref<15x112xf32, #tpu.memory_space<vmem>>, vector<1x64xf32>
    tpu.vector_store %arg32[%c12, %c16_176], %148 {strides = array<i32>} : memref<15x112xf32, #tpu.memory_space<vmem>>, vector<1x64xf32>,
    %cst_177 = arith.constant 0.000000e+00 : f32
    %150 = vector.broadcast %cst_177 : f32 to vector<12x64xf32>
    %c0_178 = arith.constant 0 : index
    %c0_179 = arith.constant 0 : index
    %151 = vector.load %arg32[%c0_178, %c0_179] : memref<15x112xf32, #tpu.memory_space<vmem>>, vector<12x112xf32>
    %c0_180 = arith.constant 0 : index
    %c0_181 = arith.constant 0 : index
    %c0_182 = arith.constant 0 : index
    %152 = vector.load %arg12[%c0_180, %c0_181, %c0_182] : memref<4x112x64xf32, #tpu.memory_space<vmem>>, vector<1x112x64xf32>
    %153 = vector.shape_cast %152 : vector<1x112x64xf32> to vector<112x64xf32>
    %cst_183 = arith.constant dense<0.000000e+00> : vector<12x64xf32>
    %154 = tpu.matmul %151, %153, %cst_183 {dimension_numbers = #tpu.dot_dimension_numbers<[1], [0], [0], [1], [0, 0, 1, 1], [], []>} : vector<12x112xf32>, vector<112x64xf32>, vector<12x64xf32> -> vector<12x64xf32>
    %155 = arith.addf %150, %154 : vector<12x64xf32>
    %c1_184 = arith.constant 1 : index
    %c0_185 = arith.constant 0 : index
    %156 = vector.load %arg32[%c1_184, %c0_185] : memref<15x112xf32, #tpu.memory_space<vmem>>, vector<12x112xf32>
    %c1_186 = arith.constant 1 : index
    %c0_187 = arith.constant 0 : index
    %c0_188 = arith.constant 0 : index
    %157 = vector.load %arg12[%c1_186, %c0_187, %c0_188] : memref<4x112x64xf32, #tpu.memory_space<vmem>>, vector<1x112x64xf32>
    %158 = vector.shape_cast %157 : vector<1x112x64xf32> to vector<112x64xf32>
    %cst_189 = arith.constant dense<0.000000e+00> : vector<12x64xf32>
    %159 = tpu.matmul %156, %158, %cst_189 {dimension_numbers = #tpu.dot_dimension_numbers<[1], [0], [0], [1], [0, 0, 1, 1], [], []>} : vector<12x112xf32>, vector<112x64xf32>, vector<12x64xf32> -> vector<12x64xf32>
    %160 = arith.addf %155, %159 : vector<12x64xf32>
    %c2_190 = arith.constant 2 : index
    %c0_191 = arith.constant 0 : index
    %161 = vector.load %arg32[%c2_190, %c0_191] : memref<15x112xf32, #tpu.memory_space<vmem>>, vector<12x112xf32>
    %c2_192 = arith.constant 2 : index
    %c0_193 = arith.constant 0 : index
    %c0_194 = arith.constant 0 : index
    %162 = vector.load %arg12[%c2_192, %c0_193, %c0_194] : memref<4x112x64xf32, #tpu.memory_space<vmem>>, vector<1x112x64xf32>
    %163 = vector.shape_cast %162 : vector<1x112x64xf32> to vector<112x64xf32>
    %cst_195 = arith.constant dense<0.000000e+00> : vector<12x64xf32>
    %164 = tpu.matmul %161, %163, %cst_195 {dimension_numbers = #tpu.dot_dimension_numbers<[1], [0], [0], [1], [0, 0, 1, 1], [], []>} : vector<12x112xf32>, vector<112x64xf32>, vector<12x64xf32> -> vector<12x64xf32>
    %165 = arith.addf %160, %164 : vector<12x64xf32>
    %c3_196 = arith.constant 3 : index
    %c0_197 = arith.constant 0 : index
    %166 = vector.load %arg32[%c3_196, %c0_197] : memref<15x112xf32, #tpu.memory_space<vmem>>, vector<12x112xf32>
    %c3_198 = arith.constant 3 : index
    %c0_199 = arith.constant 0 : index
    %c0_200 = arith.constant 0 : index
    %167 = vector.load %arg12[%c3_198, %c0_199, %c0_200] : memref<4x112x64xf32, #tpu.memory_space<vmem>>, vector<1x112x64xf32>
    %168 = vector.shape_cast %167 : vector<1x112x64xf32> to vector<112x64xf32>
    %cst_201 = arith.constant dense<0.000000e+00> : vector<12x64xf32>
    %169 = tpu.matmul %166, %168, %cst_201 {dimension_numbers = #tpu.dot_dimension_numbers<[1], [0], [0], [1], [0, 0, 1, 1], [], []>} : vector<12x112xf32>, vector<112x64xf32>, vector<12x64xf32> -> vector<12x64xf32>
    %170 = arith.addf %165, %169 : vector<12x64xf32>
    %c0_202 = arith.constant 0 : index
    %c0_203 = arith.constant 0 : index
    %171 = vector.load %arg13[%c0_202, %c0_203] : memref<1x64xf32, #tpu.memory_space<vmem>>, vector<1x64xf32>
    %172 = vector.broadcast %171 : vector<1x64xf32> to vector<12x64xf32>
    %173 = arith.addf %170, %172 : vector<12x64xf32>
    %cst_204 = arith.constant 0.000000e+00 : f32
    %174 = vector.broadcast %cst_204 : f32 to vector<12x64xf32>
    %175 = arith.maximumf %173, %174 : vector<12x64xf32>
    %c0_205 = arith.constant 0 : index
    %c0_206 = arith.constant 0 : index
    %176 = vector.load %arg14[%c0_205, %c0_206] : memref<24x12xf32, #tpu.memory_space<vmem>>, vector<24x12xf32>
    %cst_207 = arith.constant dense<0.000000e+00> : vector<24x64xf32>
    %177 = tpu.matmul %176, %175, %cst_207 {dimension_numbers = #tpu.dot_dimension_numbers<[1], [0], [0], [1], [0, 0, 1, 1], [], []>} : vector<24x12xf32>, vector<12x64xf32>, vector<24x64xf32> -> vector<24x64xf32>
    %c0_208 = arith.constant 0 : index
    %c0_209 = arith.constant 0 : index
    %178 = vector.load %arg33[%c0_208, %c0_209] : memref<24x64xf32, #tpu.memory_space<vmem>>, vector<24x64xf32>
    tpu.vector_store %arg33[%c0_208, %c0_209], %177 {strides = array<i32>} : memref<24x64xf32, #tpu.memory_space<vmem>>, vector<24x64xf32>,
    %cst_210 = arith.constant 0.000000e+00 : f32
    %179 = vector.broadcast %cst_210 : f32 to vector<15x56xf32>
    %c0_211 = arith.constant 0 : index
    %c0_212 = arith.constant 0 : index
    %180 = vector.load %arg33[%c0_211, %c0_212] : memref<24x64xf32, #tpu.memory_space<vmem>>, vector<15x64xf32>
    %c0_213 = arith.constant 0 : index
    %c0_214 = arith.constant 0 : index
    %c0_215 = arith.constant 0 : index
    %181 = vector.load %arg15[%c0_213, %c0_214, %c0_215] : memref<10x64x56xf32, #tpu.memory_space<vmem>>, vector<1x64x56xf32>
    %182 = vector.shape_cast %181 : vector<1x64x56xf32> to vector<64x56xf32>
    %cst_216 = arith.constant dense<0.000000e+00> : vector<15x56xf32>
    %183 = tpu.matmul %180, %182, %cst_216 {dimension_numbers = #tpu.dot_dimension_numbers<[1], [0], [0], [1], [0, 0, 1, 1], [], []>} : vector<15x64xf32>, vector<64x56xf32>, vector<15x56xf32> -> vector<15x56xf32>
    %184 = arith.addf %179, %183 : vector<15x56xf32>
    %c1_217 = arith.constant 1 : index
    %c0_218 = arith.constant 0 : index
    %185 = vector.load %arg33[%c1_217, %c0_218] : memref<24x64xf32, #tpu.memory_space<vmem>>, vector<15x64xf32>
    %c1_219 = arith.constant 1 : index
    %c0_220 = arith.constant 0 : index
    %c0_221 = arith.constant 0 : index
    %186 = vector.load %arg15[%c1_219, %c0_220, %c0_221] : memref<10x64x56xf32, #tpu.memory_space<vmem>>, vector<1x64x56xf32>
    %187 = vector.shape_cast %186 : vector<1x64x56xf32> to vector<64x56xf32>
    %cst_222 = arith.constant dense<0.000000e+00> : vector<15x56xf32>
    %188 = tpu.matmul %185, %187, %cst_222 {dimension_numbers = #tpu.dot_dimension_numbers<[1], [0], [0], [1], [0, 0, 1, 1], [], []>} : vector<15x64xf32>, vector<64x56xf32>, vector<15x56xf32> -> vector<15x56xf32>
    %189 = arith.addf %184, %188 : vector<15x56xf32>
    %c2_223 = arith.constant 2 : index
    %c0_224 = arith.constant 0 : index
    %190 = vector.load %arg33[%c2_223, %c0_224] : memref<24x64xf32, #tpu.memory_space<vmem>>, vector<15x64xf32>
    %c2_225 = arith.constant 2 : index
    %c0_226 = arith.constant 0 : index
    %c0_227 = arith.constant 0 : index
    %191 = vector.load %arg15[%c2_225, %c0_226, %c0_227] : memref<10x64x56xf32, #tpu.memory_space<vmem>>, vector<1x64x56xf32>
    %192 = vector.shape_cast %191 : vector<1x64x56xf32> to vector<64x56xf32>
    %cst_228 = arith.constant dense<0.000000e+00> : vector<15x56xf32>
    %193 = tpu.matmul %190, %192, %cst_228 {dimension_numbers = #tpu.dot_dimension_numbers<[1], [0], [0], [1], [0, 0, 1, 1], [], []>} : vector<15x64xf32>, vector<64x56xf32>, vector<15x56xf32> -> vector<15x56xf32>
    %194 = arith.addf %189, %193 : vector<15x56xf32>
    %c3_229 = arith.constant 3 : index
    %c0_230 = arith.constant 0 : index
    %195 = vector.load %arg33[%c3_229, %c0_230] : memref<24x64xf32, #tpu.memory_space<vmem>>, vector<15x64xf32>
    %c3_231 = arith.constant 3 : index
    %c0_232 = arith.constant 0 : index
    %c0_233 = arith.constant 0 : index
    %196 = vector.load %arg15[%c3_231, %c0_232, %c0_233] : memref<10x64x56xf32, #tpu.memory_space<vmem>>, vector<1x64x56xf32>
    %197 = vector.shape_cast %196 : vector<1x64x56xf32> to vector<64x56xf32>
    %cst_234 = arith.constant dense<0.000000e+00> : vector<15x56xf32>
    %198 = tpu.matmul %195, %197, %cst_234 {dimension_numbers = #tpu.dot_dimension_numbers<[1], [0], [0], [1], [0, 0, 1, 1], [], []>} : vector<15x64xf32>, vector<64x56xf32>, vector<15x56xf32> -> vector<15x56xf32>
    %199 = arith.addf %194, %198 : vector<15x56xf32>
    %c4_235 = arith.constant 4 : index
    %c0_236 = arith.constant 0 : index
    %200 = vector.load %arg33[%c4_235, %c0_236] : memref<24x64xf32, #tpu.memory_space<vmem>>, vector<15x64xf32>
    %c4_237 = arith.constant 4 : index
    %c0_238 = arith.constant 0 : index
    %c0_239 = arith.constant 0 : index
    %201 = vector.load %arg15[%c4_237, %c0_238, %c0_239] : memref<10x64x56xf32, #tpu.memory_space<vmem>>, vector<1x64x56xf32>
    %202 = vector.shape_cast %201 : vector<1x64x56xf32> to vector<64x56xf32>
    %cst_240 = arith.constant dense<0.000000e+00> : vector<15x56xf32>
    %203 = tpu.matmul %200, %202, %cst_240 {dimension_numbers = #tpu.dot_dimension_numbers<[1], [0], [0], [1], [0, 0, 1, 1], [], []>} : vector<15x64xf32>, vector<64x56xf32>, vector<15x56xf32> -> vector<15x56xf32>
    %204 = arith.addf %199, %203 : vector<15x56xf32>
    %c5_241 = arith.constant 5 : index
    %c0_242 = arith.constant 0 : index
    %205 = vector.load %arg33[%c5_241, %c0_242] : memref<24x64xf32, #tpu.memory_space<vmem>>, vector<15x64xf32>
    %c5_243 = arith.constant 5 : index
    %c0_244 = arith.constant 0 : index
    %c0_245 = arith.constant 0 : index
    %206 = vector.load %arg15[%c5_243, %c0_244, %c0_245] : memref<10x64x56xf32, #tpu.memory_space<vmem>>, vector<1x64x56xf32>
    %207 = vector.shape_cast %206 : vector<1x64x56xf32> to vector<64x56xf32>
    %cst_246 = arith.constant dense<0.000000e+00> : vector<15x56xf32>
    %208 = tpu.matmul %205, %207, %cst_246 {dimension_numbers = #tpu.dot_dimension_numbers<[1], [0], [0], [1], [0, 0, 1, 1], [], []>} : vector<15x64xf32>, vector<64x56xf32>, vector<15x56xf32> -> vector<15x56xf32>
    %209 = arith.addf %204, %208 : vector<15x56xf32>
    %c6_247 = arith.constant 6 : index
    %c0_248 = arith.constant 0 : index
    %210 = vector.load %arg33[%c6_247, %c0_248] : memref<24x64xf32, #tpu.memory_space<vmem>>, vector<15x64xf32>
    %c6_249 = arith.constant 6 : index
    %c0_250 = arith.constant 0 : index
    %c0_251 = arith.constant 0 : index
    %211 = vector.load %arg15[%c6_249, %c0_250, %c0_251] : memref<10x64x56xf32, #tpu.memory_space<vmem>>, vector<1x64x56xf32>
    %212 = vector.shape_cast %211 : vector<1x64x56xf32> to vector<64x56xf32>
    %cst_252 = arith.constant dense<0.000000e+00> : vector<15x56xf32>
    %213 = tpu.matmul %210, %212, %cst_252 {dimension_numbers = #tpu.dot_dimension_numbers<[1], [0], [0], [1], [0, 0, 1, 1], [], []>} : vector<15x64xf32>, vector<64x56xf32>, vector<15x56xf32> -> vector<15x56xf32>
    %214 = arith.addf %209, %213 : vector<15x56xf32>
    %c7_253 = arith.constant 7 : index
    %c0_254 = arith.constant 0 : index
    %215 = vector.load %arg33[%c7_253, %c0_254] : memref<24x64xf32, #tpu.memory_space<vmem>>, vector<15x64xf32>
    %c7_255 = arith.constant 7 : index
    %c0_256 = arith.constant 0 : index
    %c0_257 = arith.constant 0 : index
    %216 = vector.load %arg15[%c7_255, %c0_256, %c0_257] : memref<10x64x56xf32, #tpu.memory_space<vmem>>, vector<1x64x56xf32>
    %217 = vector.shape_cast %216 : vector<1x64x56xf32> to vector<64x56xf32>
    %cst_258 = arith.constant dense<0.000000e+00> : vector<15x56xf32>
    %218 = tpu.matmul %215, %217, %cst_258 {dimension_numbers = #tpu.dot_dimension_numbers<[1], [0], [0], [1], [0, 0, 1, 1], [], []>} : vector<15x64xf32>, vector<64x56xf32>, vector<15x56xf32> -> vector<15x56xf32>
    %219 = arith.addf %214, %218 : vector<15x56xf32>
    %c8_259 = arith.constant 8 : index
    %c0_260 = arith.constant 0 : index
    %220 = vector.load %arg33[%c8_259, %c0_260] : memref<24x64xf32, #tpu.memory_space<vmem>>, vector<15x64xf32>
    %c8_261 = arith.constant 8 : index
    %c0_262 = arith.constant 0 : index
    %c0_263 = arith.constant 0 : index
    %221 = vector.load %arg15[%c8_261, %c0_262, %c0_263] : memref<10x64x56xf32, #tpu.memory_space<vmem>>, vector<1x64x56xf32>
    %222 = vector.shape_cast %221 : vector<1x64x56xf32> to vector<64x56xf32>
    %cst_264 = arith.constant dense<0.000000e+00> : vector<15x56xf32>
    %223 = tpu.matmul %220, %222, %cst_264 {dimension_numbers = #tpu.dot_dimension_numbers<[1], [0], [0], [1], [0, 0, 1, 1], [], []>} : vector<15x64xf32>, vector<64x56xf32>, vector<15x56xf32> -> vector<15x56xf32>
    %224 = arith.addf %219, %223 : vector<15x56xf32>
    %c9_265 = arith.constant 9 : index
    %c0_266 = arith.constant 0 : index
    %225 = vector.load %arg33[%c9_265, %c0_266] : memref<24x64xf32, #tpu.memory_space<vmem>>, vector<15x64xf32>
    %c9_267 = arith.constant 9 : index
    %c0_268 = arith.constant 0 : index
    %c0_269 = arith.constant 0 : index
    %226 = vector.load %arg15[%c9_267, %c0_268, %c0_269] : memref<10x64x56xf32, #tpu.memory_space<vmem>>, vector<1x64x56xf32>
    %227 = vector.shape_cast %226 : vector<1x64x56xf32> to vector<64x56xf32>
    %cst_270 = arith.constant dense<0.000000e+00> : vector<15x56xf32>
    %228 = tpu.matmul %225, %227, %cst_270 {dimension_numbers = #tpu.dot_dimension_numbers<[1], [0], [0], [1], [0, 0, 1, 1], [], []>} : vector<15x64xf32>, vector<64x56xf32>, vector<15x56xf32> -> vector<15x56xf32>
    %229 = arith.addf %224, %228 : vector<15x56xf32>
    %c0_271 = arith.constant 0 : index
    %c0_272 = arith.constant 0 : index
    %230 = vector.load %arg16[%c0_271, %c0_272] : memref<1x56xf32, #tpu.memory_space<vmem>>, vector<1x56xf32>
    %231 = vector.broadcast %230 : vector<1x56xf32> to vector<15x56xf32>
    %232 = arith.addf %229, %231 : vector<15x56xf32>
    %cst_273 = arith.constant 0.000000e+00 : f32
    %233 = vector.broadcast %cst_273 : f32 to vector<15x56xf32>
    %234 = arith.maximumf %232, %233 : vector<15x56xf32>
    %c0_274 = arith.constant 0 : index
    %c0_275 = arith.constant 0 : index
    %235 = vector.load %arg17[%c0_274, %c0_275] : memref<75x15xf32, #tpu.memory_space<vmem>>, vector<75x15xf32>
    %cst_276 = arith.constant dense<0.000000e+00> : vector<75x56xf32>
    %236 = tpu.matmul %235, %234, %cst_276 {dimension_numbers = #tpu.dot_dimension_numbers<[1], [0], [0], [1], [0, 0, 1, 1], [], []>} : vector<75x15xf32>, vector<15x56xf32>, vector<75x56xf32> -> vector<75x56xf32>
    %c0_277 = arith.constant 0 : index
    %c0_278 = arith.constant 0 : index
    %237 = vector.load %arg34[%c0_277, %c0_278] : memref<75x56xf32, #tpu.memory_space<vmem>>, vector<75x56xf32>
    tpu.vector_store %arg34[%c0_277, %c0_278], %236 {strides = array<i32>} : memref<75x56xf32, #tpu.memory_space<vmem>>, vector<75x56xf32>,
    %cst_279 = arith.constant 0.000000e+00 : f32
    %238 = vector.broadcast %cst_279 : f32 to vector<64x96xf32>
    %c0_280 = arith.constant 0 : index
    %c0_281 = arith.constant 0 : index
    %239 = vector.load %arg34[%c0_280, %c0_281] : memref<75x56xf32, #tpu.memory_space<vmem>>, vector<64x56xf32>
    %c0_282 = arith.constant 0 : index
    %c0_283 = arith.constant 0 : index
    %c0_284 = arith.constant 0 : index
    %240 = vector.load %arg18[%c0_282, %c0_283, %c0_284] : memref<12x56x96xf32, #tpu.memory_space<vmem>>, vector<1x56x96xf32>
    %241 = vector.shape_cast %240 : vector<1x56x96xf32> to vector<56x96xf32>
    %cst_285 = arith.constant dense<0.000000e+00> : vector<64x96xf32>
    %242 = tpu.matmul %239, %241, %cst_285 {dimension_numbers = #tpu.dot_dimension_numbers<[1], [0], [0], [1], [0, 0, 1, 1], [], []>} : vector<64x56xf32>, vector<56x96xf32>, vector<64x96xf32> -> vector<64x96xf32>
    %243 = arith.addf %238, %242 : vector<64x96xf32>
    %c1_286 = arith.constant 1 : index
    %c0_287 = arith.constant 0 : index
    %244 = vector.load %arg34[%c1_286, %c0_287] : memref<75x56xf32, #tpu.memory_space<vmem>>, vector<64x56xf32>
    %c1_288 = arith.constant 1 : index
    %c0_289 = arith.constant 0 : index
    %c0_290 = arith.constant 0 : index
    %245 = vector.load %arg18[%c1_288, %c0_289, %c0_290] : memref<12x56x96xf32, #tpu.memory_space<vmem>>, vector<1x56x96xf32>
    %246 = vector.shape_cast %245 : vector<1x56x96xf32> to vector<56x96xf32>
    %cst_291 = arith.constant dense<0.000000e+00> : vector<64x96xf32>
    %247 = tpu.matmul %244, %246, %cst_291 {dimension_numbers = #tpu.dot_dimension_numbers<[1], [0], [0], [1], [0, 0, 1, 1], [], []>} : vector<64x56xf32>, vector<56x96xf32>, vector<64x96xf32> -> vector<64x96xf32>
    %248 = arith.addf %243, %247 : vector<64x96xf32>
    %c2_292 = arith.constant 2 : index
    %c0_293 = arith.constant 0 : index
    %249 = vector.load %arg34[%c2_292, %c0_293] : memref<75x56xf32, #tpu.memory_space<vmem>>, vector<64x56xf32>
    %c2_294 = arith.constant 2 : index
    %c0_295 = arith.constant 0 : index
    %c0_296 = arith.constant 0 : index
    %250 = vector.load %arg18[%c2_294, %c0_295, %c0_296] : memref<12x56x96xf32, #tpu.memory_space<vmem>>, vector<1x56x96xf32>
    %251 = vector.shape_cast %250 : vector<1x56x96xf32> to vector<56x96xf32>
    %cst_297 = arith.constant dense<0.000000e+00> : vector<64x96xf32>
    %252 = tpu.matmul %249, %251, %cst_297 {dimension_numbers = #tpu.dot_dimension_numbers<[1], [0], [0], [1], [0, 0, 1, 1], [], []>} : vector<64x56xf32>, vector<56x96xf32>, vector<64x96xf32> -> vector<64x96xf32>
    %253 = arith.addf %248, %252 : vector<64x96xf32>
    %c3_298 = arith.constant 3 : index
    %c0_299 = arith.constant 0 : index
    %254 = vector.load %arg34[%c3_298, %c0_299] : memref<75x56xf32, #tpu.memory_space<vmem>>, vector<64x56xf32>
    %c3_300 = arith.constant 3 : index
    %c0_301 = arith.constant 0 : index
    %c0_302 = arith.constant 0 : index
    %255 = vector.load %arg18[%c3_300, %c0_301, %c0_302] : memref<12x56x96xf32, #tpu.memory_space<vmem>>, vector<1x56x96xf32>
    %256 = vector.shape_cast %255 : vector<1x56x96xf32> to vector<56x96xf32>
    %cst_303 = arith.constant dense<0.000000e+00> : vector<64x96xf32>
    %257 = tpu.matmul %254, %256, %cst_303 {dimension_numbers = #tpu.dot_dimension_numbers<[1], [0], [0], [1], [0, 0, 1, 1], [], []>} : vector<64x56xf32>, vector<56x96xf32>, vector<64x96xf32> -> vector<64x96xf32>
    %258 = arith.addf %253, %257 : vector<64x96xf32>
    %c4_304 = arith.constant 4 : index
    %c0_305 = arith.constant 0 : index
    %259 = vector.load %arg34[%c4_304, %c0_305] : memref<75x56xf32, #tpu.memory_space<vmem>>, vector<64x56xf32>
    %c4_306 = arith.constant 4 : index
    %c0_307 = arith.constant 0 : index
    %c0_308 = arith.constant 0 : index
    %260 = vector.load %arg18[%c4_306, %c0_307, %c0_308] : memref<12x56x96xf32, #tpu.memory_space<vmem>>, vector<1x56x96xf32>
    %261 = vector.shape_cast %260 : vector<1x56x96xf32> to vector<56x96xf32>
    %cst_309 = arith.constant dense<0.000000e+00> : vector<64x96xf32>
    %262 = tpu.matmul %259, %261, %cst_309 {dimension_numbers = #tpu.dot_dimension_numbers<[1], [0], [0], [1], [0, 0, 1, 1], [], []>} : vector<64x56xf32>, vector<56x96xf32>, vector<64x96xf32> -> vector<64x96xf32>
    %263 = arith.addf %258, %262 : vector<64x96xf32>
    %c5_310 = arith.constant 5 : index
    %c0_311 = arith.constant 0 : index
    %264 = vector.load %arg34[%c5_310, %c0_311] : memref<75x56xf32, #tpu.memory_space<vmem>>, vector<64x56xf32>
    %c5_312 = arith.constant 5 : index
    %c0_313 = arith.constant 0 : index
    %c0_314 = arith.constant 0 : index
    %265 = vector.load %arg18[%c5_312, %c0_313, %c0_314] : memref<12x56x96xf32, #tpu.memory_space<vmem>>, vector<1x56x96xf32>
    %266 = vector.shape_cast %265 : vector<1x56x96xf32> to vector<56x96xf32>
    %cst_315 = arith.constant dense<0.000000e+00> : vector<64x96xf32>
    %267 = tpu.matmul %264, %266, %cst_315 {dimension_numbers = #tpu.dot_dimension_numbers<[1], [0], [0], [1], [0, 0, 1, 1], [], []>} : vector<64x56xf32>, vector<56x96xf32>, vector<64x96xf32> -> vector<64x96xf32>
    %268 = arith.addf %263, %267 : vector<64x96xf32>
    %c6_316 = arith.constant 6 : index
    %c0_317 = arith.constant 0 : index
    %269 = vector.load %arg34[%c6_316, %c0_317] : memref<75x56xf32, #tpu.memory_space<vmem>>, vector<64x56xf32>
    %c6_318 = arith.constant 6 : index
    %c0_319 = arith.constant 0 : index
    %c0_320 = arith.constant 0 : index
    %270 = vector.load %arg18[%c6_318, %c0_319, %c0_320] : memref<12x56x96xf32, #tpu.memory_space<vmem>>, vector<1x56x96xf32>
    %271 = vector.shape_cast %270 : vector<1x56x96xf32> to vector<56x96xf32>
    %cst_321 = arith.constant dense<0.000000e+00> : vector<64x96xf32>
    %272 = tpu.matmul %269, %271, %cst_321 {dimension_numbers = #tpu.dot_dimension_numbers<[1], [0], [0], [1], [0, 0, 1, 1], [], []>} : vector<64x56xf32>, vector<56x96xf32>, vector<64x96xf32> -> vector<64x96xf32>
    %273 = arith.addf %268, %272 : vector<64x96xf32>
    %c7_322 = arith.constant 7 : index
    %c0_323 = arith.constant 0 : index
    %274 = vector.load %arg34[%c7_322, %c0_323] : memref<75x56xf32, #tpu.memory_space<vmem>>, vector<64x56xf32>
    %c7_324 = arith.constant 7 : index
    %c0_325 = arith.constant 0 : index
    %c0_326 = arith.constant 0 : index
    %275 = vector.load %arg18[%c7_324, %c0_325, %c0_326] : memref<12x56x96xf32, #tpu.memory_space<vmem>>, vector<1x56x96xf32>
    %276 = vector.shape_cast %275 : vector<1x56x96xf32> to vector<56x96xf32>
    %cst_327 = arith.constant dense<0.000000e+00> : vector<64x96xf32>
    %277 = tpu.matmul %274, %276, %cst_327 {dimension_numbers = #tpu.dot_dimension_numbers<[1], [0], [0], [1], [0, 0, 1, 1], [], []>} : vector<64x56xf32>, vector<56x96xf32>, vector<64x96xf32> -> vector<64x96xf32>
    %278 = arith.addf %273, %277 : vector<64x96xf32>
    %c8_328 = arith.constant 8 : index
    %c0_329 = arith.constant 0 : index
    %279 = vector.load %arg34[%c8_328, %c0_329] : memref<75x56xf32, #tpu.memory_space<vmem>>, vector<64x56xf32>
    %c8_330 = arith.constant 8 : index
    %c0_331 = arith.constant 0 : index
    %c0_332 = arith.constant 0 : index
    %280 = vector.load %arg18[%c8_330, %c0_331, %c0_332] : memref<12x56x96xf32, #tpu.memory_space<vmem>>, vector<1x56x96xf32>
    %281 = vector.shape_cast %280 : vector<1x56x96xf32> to vector<56x96xf32>
    %cst_333 = arith.constant dense<0.000000e+00> : vector<64x96xf32>
    %282 = tpu.matmul %279, %281, %cst_333 {dimension_numbers = #tpu.dot_dimension_numbers<[1], [0], [0], [1], [0, 0, 1, 1], [], []>} : vector<64x56xf32>, vector<56x96xf32>, vector<64x96xf32> -> vector<64x96xf32>
    %283 = arith.addf %278, %282 : vector<64x96xf32>
    %c9_334 = arith.constant 9 : index
    %c0_335 = arith.constant 0 : index
    %284 = vector.load %arg34[%c9_334, %c0_335] : memref<75x56xf32, #tpu.memory_space<vmem>>, vector<64x56xf32>
    %c9_336 = arith.constant 9 : index
    %c0_337 = arith.constant 0 : index
    %c0_338 = arith.constant 0 : index
    %285 = vector.load %arg18[%c9_336, %c0_337, %c0_338] : memref<12x56x96xf32, #tpu.memory_space<vmem>>, vector<1x56x96xf32>
    %286 = vector.shape_cast %285 : vector<1x56x96xf32> to vector<56x96xf32>
    %cst_339 = arith.constant dense<0.000000e+00> : vector<64x96xf32>
    %287 = tpu.matmul %284, %286, %cst_339 {dimension_numbers = #tpu.dot_dimension_numbers<[1], [0], [0], [1], [0, 0, 1, 1], [], []>} : vector<64x56xf32>, vector<56x96xf32>, vector<64x96xf32> -> vector<64x96xf32>
    %288 = arith.addf %283, %287 : vector<64x96xf32>
    %c10_340 = arith.constant 10 : index
    %c0_341 = arith.constant 0 : index
    %289 = vector.load %arg34[%c10_340, %c0_341] : memref<75x56xf32, #tpu.memory_space<vmem>>, vector<64x56xf32>
    %c10_342 = arith.constant 10 : index
    %c0_343 = arith.constant 0 : index
    %c0_344 = arith.constant 0 : index
    %290 = vector.load %arg18[%c10_342, %c0_343, %c0_344] : memref<12x56x96xf32, #tpu.memory_space<vmem>>, vector<1x56x96xf32>
    %291 = vector.shape_cast %290 : vector<1x56x96xf32> to vector<56x96xf32>
    %cst_345 = arith.constant dense<0.000000e+00> : vector<64x96xf32>
    %292 = tpu.matmul %289, %291, %cst_345 {dimension_numbers = #tpu.dot_dimension_numbers<[1], [0], [0], [1], [0, 0, 1, 1], [], []>} : vector<64x56xf32>, vector<56x96xf32>, vector<64x96xf32> -> vector<64x96xf32>
    %293 = arith.addf %288, %292 : vector<64x96xf32>
    %c11_346 = arith.constant 11 : index
    %c0_347 = arith.constant 0 : index
    %294 = vector.load %arg34[%c11_346, %c0_347] : memref<75x56xf32, #tpu.memory_space<vmem>>, vector<64x56xf32>
    %c11_348 = arith.constant 11 : index
    %c0_349 = arith.constant 0 : index
    %c0_350 = arith.constant 0 : index
    %295 = vector.load %arg18[%c11_348, %c0_349, %c0_350] : memref<12x56x96xf32, #tpu.memory_space<vmem>>, vector<1x56x96xf32>
    %296 = vector.shape_cast %295 : vector<1x56x96xf32> to vector<56x96xf32>
    %cst_351 = arith.constant dense<0.000000e+00> : vector<64x96xf32>
    %297 = tpu.matmul %294, %296, %cst_351 {dimension_numbers = #tpu.dot_dimension_numbers<[1], [0], [0], [1], [0, 0, 1, 1], [], []>} : vector<64x56xf32>, vector<56x96xf32>, vector<64x96xf32> -> vector<64x96xf32>
    %298 = arith.addf %293, %297 : vector<64x96xf32>
    %c0_352 = arith.constant 0 : index
    %c0_353 = arith.constant 0 : index
    %299 = vector.load %arg19[%c0_352, %c0_353] : memref<1x96xf32, #tpu.memory_space<vmem>>, vector<1x96xf32>
    %300 = vector.broadcast %299 : vector<1x96xf32> to vector<64x96xf32>
    %301 = arith.addf %298, %300 : vector<64x96xf32>
    %302 = arith.negf %301 : vector<64x96xf32>
    %303 = math.exp %302 : vector<64x96xf32>
    %cst_354 = arith.constant 1.000000e+00 : f32
    %304 = vector.broadcast %cst_354 : f32 to vector<64x96xf32>
    %305 = arith.addf %304, %303 : vector<64x96xf32>
    %306 = arith.divf %304, %305 : vector<64x96xf32>
    %c0_355 = arith.constant 0 : index
    %c0_356 = arith.constant 0 : index
    %c0_357 = arith.constant 0 : index
    %307 = vector.load %arg25[%c0_355, %c0_356, %c0_357] : memref<1x64x96xf32, #tpu.memory_space<vmem>>, vector<1x64x96xf32>
    %308 = vector.shape_cast %307 : vector<1x64x96xf32> to vector<64x96xf32>
    %309 = vector.shape_cast %306 : vector<64x96xf32> to vector<1x64x96xf32>
    tpu.vector_store %arg25[%c0_355, %c0_356, %c0_357], %309 {strides = array<i32>} : memref<1x64x96xf32, #tpu.memory_space<vmem>>, vector<1x64x96xf32>,
    %c0_358 = arith.constant 0 : index
    %c0_359 = arith.constant 0 : index
    %c0_360 = arith.constant 0 : index
    %310 = vector.load %arg2[%c0_358, %c0_359, %c0_360] : memref<1x1x1xf32, #tpu.memory_space<vmem>>, vector<1x1x1xf32>
    %311 = vector.shape_cast %310 : vector<1x1x1xf32> to vector<1x1xf32>
    %c0_361 = arith.constant 0 : index
    %c0_362 = arith.constant 0 : index
    %312 = vector.load %arg20[%c0_361, %c0_362] : memref<32x20xf32, #tpu.memory_space<vmem>>, vector<32x20xf32>
    %cst_363 = arith.constant dense<0.000000e+00> : vector<8x20xf32>
    %313 = tpu.matmul %115, %312, %cst_363 {dimension_numbers = #tpu.dot_dimension_numbers<[1], [0], [0], [1], [0, 0, 1, 1], [], []>} : vector<8x32xf32>, vector<32x20xf32>, vector<8x20xf32> -> vector<8x20xf32>
    %c0_364 = arith.constant 0 : index
    %c0_365 = arith.constant 0 : index
    %314 = vector.load %arg21[%c0_364, %c0_365] : memref<1x20xf32, #tpu.memory_space<vmem>>, vector<1x20xf32>
    %315 = vector.broadcast %311 : vector<1x1xf32> to vector<1x20xf32>
    %316 = arith.mulf %315, %314 : vector<1x20xf32>
    %317 = vector.broadcast %316 : vector<1x20xf32> to vector<8x20xf32>
    %318 = arith.addf %313, %317 : vector<8x20xf32>
    %c0_366 = arith.constant 0 : index
    %c0_367 = arith.constant 0 : index
    %319 = vector.load %arg22[%c0_366, %c0_367] : memref<1x20xf32, #tpu.memory_space<vmem>>, vector<1x20xf32>
    %320 = vector.broadcast %319 : vector<1x20xf32> to vector<8x20xf32>
    %321 = arith.addf %318, %320 : vector<8x20xf32>
    %cst_368 = arith.constant 0.000000e+00 : f32
    %322 = vector.broadcast %cst_368 : f32 to vector<8x20xf32>
    %323 = arith.maximumf %321, %322 : vector<8x20xf32>
    %c0_369 = arith.constant 0 : index
    %c0_370 = arith.constant 0 : index
    %324 = vector.load %arg23[%c0_369, %c0_370] : memref<1x20xf32, #tpu.memory_space<vmem>>, vector<1x20xf32>
    %325 = vector.broadcast %324 : vector<1x20xf32> to vector<8x20xf32>
    %326 = arith.mulf %323, %325 : vector<8x20xf32>
    %cst_371 = arith.constant dense<0.000000e+00> : vector<8xf32>
    %327 = vector.multi_reduction <add>, %326, %cst_371 [1] : vector<8x20xf32> to vector<8xf32>
    %328 = vector.shape_cast %327 : vector<8xf32> to vector<8x1xf32>
    %c0_372 = arith.constant 0 : index
    %c0_373 = arith.constant 0 : index
    %329 = vector.load %arg24[%c0_372, %c0_373] : memref<1x1xf32, #tpu.memory_space<vmem>>, vector<1x1xf32>
    %330 = vector.broadcast %329 : vector<1x1xf32> to vector<8x1xf32>
    %331 = arith.addf %328, %330 : vector<8x1xf32>
    %332 = vector.extract_strided_slice %331 {offsets = [0, 0], sizes = [1, 1], strides = [1, 1]} : vector<8x1xf32> to vector<1x1xf32>
    %c0_374 = arith.constant 0 : index
    %c0_375 = arith.constant 0 : index
    %c0_376 = arith.constant 0 : index
    %333 = vector.load %arg26[%c0_374, %c0_375, %c0_376] : memref<1x1x1xf32, #tpu.memory_space<vmem>>, vector<1x1x1xf32>
    %334 = vector.shape_cast %333 : vector<1x1x1xf32> to vector<1x1xf32>
    %335 = vector.shape_cast %332 : vector<1x1xf32> to vector<1x1x1xf32>
    tpu.vector_store %arg26[%c0_374, %c0_375, %c0_376], %335 {strides = array<i32>} : memref<1x1x1xf32, #tpu.memory_space<vmem>>, vector<1x1x1xf32>,
    return
  }
  func.func @transform_0(%arg0: i32) -> (i32, i32, i32) {
    %c0_i32 = arith.constant 0 : i32
    %c0_i32_0 = arith.constant 0 : i32
    %c0_i32_1 = arith.constant 0 : i32
    return %arg0, %c0_i32, %c0_i32_0 : i32, i32, i32
  }
  func.func @transform_1(%arg0: i32) -> (i32, i32, i32) {
    %c0_i32 = arith.constant 0 : i32
    %c0_i32_0 = arith.constant 0 : i32
    %c0_i32_1 = arith.constant 0 : i32
    return %arg0, %c0_i32, %c0_i32_0 : i32, i32, i32
  }
  func.func @transform_2(%arg0: i32) -> (i32, i32) {
    %c0_i32 = arith.constant 0 : i32
    %c0_i32_0 = arith.constant 0 : i32
    %c0_i32_1 = arith.constant 0 : i32
    return %c0_i32, %c0_i32_0 : i32, i32
  }
  func.func @transform_3(%arg0: i32) -> (i32, i32, i32) {
    %c0_i32 = arith.constant 0 : i32
    %c0_i32_0 = arith.constant 0 : i32
    %c0_i32_1 = arith.constant 0 : i32
    %c0_i32_2 = arith.constant 0 : i32
    return %c0_i32, %c0_i32_0, %c0_i32_1 : i32, i32, i32
  }
  func.func @transform_4(%arg0: i32) -> (i32, i32) {
    %c0_i32 = arith.constant 0 : i32
    %c0_i32_0 = arith.constant 0 : i32
    %c0_i32_1 = arith.constant 0 : i32
    return %c0_i32, %c0_i32_0 : i32, i32
  }
  func.func @transform_5(%arg0: i32) -> (i32, i32, i32) {
    %c0_i32 = arith.constant 0 : i32
    %c0_i32_0 = arith.constant 0 : i32
    %c0_i32_1 = arith.constant 0 : i32
    %c0_i32_2 = arith.constant 0 : i32
    return %c0_i32, %c0_i32_0, %c0_i32_1 : i32, i32, i32
  }
  func.func @transform_6(%arg0: i32) -> (i32, i32) {
    %c0_i32 = arith.constant 0 : i32
    %c0_i32_0 = arith.constant 0 : i32
    %c0_i32_1 = arith.constant 0 : i32
    return %c0_i32, %c0_i32_0 : i32, i32
  }
  func.func @transform_7(%arg0: i32) -> (i32, i32) {
    %c0_i32 = arith.constant 0 : i32
    %c0_i32_0 = arith.constant 0 : i32
    %c0_i32_1 = arith.constant 0 : i32
    return %c0_i32, %c0_i32_0 : i32, i32
  }
  func.func @transform_8(%arg0: i32) -> (i32, i32) {
    %c0_i32 = arith.constant 0 : i32
    %c0_i32_0 = arith.constant 0 : i32
    %c0_i32_1 = arith.constant 0 : i32
    return %c0_i32, %c0_i32_0 : i32, i32
  }
  func.func @transform_9(%arg0: i32) -> (i32, i32) {
    %c0_i32 = arith.constant 0 : i32
    %c0_i32_0 = arith.constant 0 : i32
    %c0_i32_1 = arith.constant 0 : i32
    return %c0_i32, %c0_i32_0 : i32, i32
  }
  func.func @transform_10(%arg0: i32) -> (i32, i32) {
    %c0_i32 = arith.constant 0 : i32
    %c0_i32_0 = arith.constant 0 : i32
    %c0_i32_1 = arith.constant 0 : i32
    return %c0_i32, %c0_i32_0 : i32, i32
  }
  func.func @transform_11(%arg0: i32) -> (i32, i32, i32) {
    %c0_i32 = arith.constant 0 : i32
    %c0_i32_0 = arith.constant 0 : i32
    %c0_i32_1 = arith.constant 0 : i32
    %c0_i32_2 = arith.constant 0 : i32
    return %c0_i32, %c0_i32_0, %c0_i32_1 : i32, i32, i32
  }
  func.func @transform_12(%arg0: i32) -> (i32, i32) {
    %c0_i32 = arith.constant 0 : i32
    %c0_i32_0 = arith.constant 0 : i32
    %c0_i32_1 = arith.constant 0 : i32
    return %c0_i32, %c0_i32_0 : i32, i32
  }
  func.func @transform_13(%arg0: i32) -> (i32, i32) {
    %c0_i32 = arith.constant 0 : i32
    %c0_i32_0 = arith.constant 0 : i32
    %c0_i32_1 = arith.constant 0 : i32
    return %c0_i32, %c0_i32_0 : i32, i32
  }
  func.func @transform_14(%arg0: i32) -> (i32, i32, i32) {
    %c0_i32 = arith.constant 0 : i32
    %c0_i32_0 = arith.constant 0 : i32
    %c0_i32_1 = arith.constant 0 : i32
    %c0_i32_2 = arith.constant 0 : i32
    return %c0_i32, %c0_i32_0, %c0_i32_1 : i32, i32, i32
  }
  func.func @transform_15(%arg0: i32) -> (i32, i32) {
    %c0_i32 = arith.constant 0 : i32
    %c0_i32_0 = arith.constant 0 : i32
    %c0_i32_1 = arith.constant 0 : i32
    return %c0_i32, %c0_i32_0 : i32, i32
  }
  func.func @transform_16(%arg0: i32) -> (i32, i32) {
    %c0_i32 = arith.constant 0 : i32
    %c0_i32_0 = arith.constant 0 : i32
    %c0_i32_1 = arith.constant 0 : i32
    return %c0_i32, %c0_i32_0 : i32, i32
  }
  func.func @transform_17(%arg0: i32) -> (i32, i32, i32) {
    %c0_i32 = arith.constant 0 : i32
    %c0_i32_0 = arith.constant 0 : i32
    %c0_i32_1 = arith.constant 0 : i32
    %c0_i32_2 = arith.constant 0 : i32
    return %c0_i32, %c0_i32_0, %c0_i32_1 : i32, i32, i32
  }
  func.func @transform_18(%arg0: i32) -> (i32, i32) {
    %c0_i32 = arith.constant 0 : i32
    %c0_i32_0 = arith.constant 0 : i32
    %c0_i32_1 = arith.constant 0 : i32
    return %c0_i32, %c0_i32_0 : i32, i32
  }
  func.func @transform_19(%arg0: i32) -> (i32, i32) {
    %c0_i32 = arith.constant 0 : i32
    %c0_i32_0 = arith.constant 0 : i32
    %c0_i32_1 = arith.constant 0 : i32
    return %c0_i32, %c0_i32_0 : i32, i32
  }
  func.func @transform_20(%arg0: i32) -> (i32, i32) {
    %c0_i32 = arith.constant 0 : i32
    %c0_i32_0 = arith.constant 0 : i32
    %c0_i32_1 = arith.constant 0 : i32
    return %c0_i32, %c0_i32_0 : i32, i32
  }
  func.func @transform_21(%arg0: i32) -> (i32, i32) {
    %c0_i32 = arith.constant 0 : i32
    %c0_i32_0 = arith.constant 0 : i32
    %c0_i32_1 = arith.constant 0 : i32
    return %c0_i32, %c0_i32_0 : i32, i32
  }
  func.func @transform_22(%arg0: i32) -> (i32, i32) {
    %c0_i32 = arith.constant 0 : i32
    %c0_i32_0 = arith.constant 0 : i32
    %c0_i32_1 = arith.constant 0 : i32
    return %c0_i32, %c0_i32_0 : i32, i32
  }
  func.func @transform_23(%arg0: i32) -> (i32, i32) {
    %c0_i32 = arith.constant 0 : i32
    %c0_i32_0 = arith.constant 0 : i32
    %c0_i32_1 = arith.constant 0 : i32
    return %c0_i32, %c0_i32_0 : i32, i32
  }
  func.func @transform_24(%arg0: i32) -> (i32, i32, i32) {
    %c0_i32 = arith.constant 0 : i32
    %c0_i32_0 = arith.constant 0 : i32
    %c0_i32_1 = arith.constant 0 : i32
    return %arg0, %c0_i32, %c0_i32_0 : i32, i32, i32
  }
  func.func @transform_25(%arg0: i32) -> (i32, i32, i32) {
    %c0_i32 = arith.constant 0 : i32
    %c0_i32_0 = arith.constant 0 : i32
    %c0_i32_1 = arith.constant 0 : i32
    return %arg0, %c0_i32, %c0_i32_0 : i32, i32, i32
  }
}

</mosaic_0001>

<bundles_post_ra>
// kernel: cae_critic_forward.1
= control target key start
LH: loop header
LB: loop body
LE: loop exit
PB: predicated region body
PF: predicated region fallthrough
CT: control target
= control target key end

     0   :  { %s11945_s0 = inlined_call_operand.vmem [shape: f32[2,64,96], index: 0, kind: input, shape index: {}]   ;;  %s11946_s1 = inlined_call_operand.vmem [shape: f32[2,1,1], index: 1, kind: input, shape index: {}]   ;;  %s11947_s2 = inlined_call_operand.vmem [shape: f32[120,64], index: 2, kind: input, shape index: {}]   ;;  %s11948_s3 = inlined_call_operand.vmem [shape: f32[8,96,56], index: 3, kind: input, shape index: {}]   ;;  %s11949_s4 = inlined_call_operand.vmem [shape: f32[1,56], index: 4, kind: input, shape index: {}]   ;;  %s11950_s5 = inlined_call_operand.vmem [shape: f32[4,56,64], index: 5, kind: input, shape index: {}]   ;;  %s11951_s6 = inlined_call_operand.vmem [shape: f32[1,64], index: 6, kind: input, shape index: {}]   ;;  %s11952_s7 = inlined_call_operand.vmem [shape: f32[768,32], index: 7, kind: input, shape index: {}]   ;;  %s11953_s8 = inlined_call_operand.vmem [shape: f32[1,32], index: 8, kind: input, shape index: {}]   ;;  %s11954_s9 = inlined_call_operand.vmem [shape: f32[32,768], index: 9, kind: input, shape index: {}]   ;;  %s11955_s10 = inlined_call_operand.vmem [shape: f32[1,768], index: 10, kind: input, shape index: {}]   ;;  %s11956_s11 = inlined_call_operand.vmem [shape: f32[4,112,64], index: 11, kind: input, shape index: {}]   ;;  %s11957_s12 = inlined_call_operand.vmem [shape: f32[1,64], index: 12, kind: input, shape index: {}]   ;;  %s11958_s13 = inlined_call_operand.vmem [shape: f32[24,12], index: 13, kind: input, shape index: {}]   ;;  %s11959_s14 = inlined_call_operand.vmem [shape: f32[10,64,56], index: 14, kind: input, shape index: {}]   ;;  %s11960_s15 = inlined_call_operand.vmem [shape: f32[1,56], index: 15, kind: input, shape index: {}]   ;;  %s11961_s16 = inlined_call_operand.vmem [shape: f32[75,15], index: 16, kind: input, shape index: {}]   ;;  %s11962_s17 = inlined_call_operand.vmem [shape: f32[12,56,96], index: 17, kind: input, shape index: {}]   ;;  %s11963_s18 = inlined_call_operand.vmem [shape: f32[1,96], index: 18, kind: input, shape index: {}]   ;;  %s11964_s19 = inlined_call_operand.vmem [shape: f32[32,20], index: 19, kind: input, shape index: {}]   ;;  %s11965_s20 = inlined_call_operand.vmem [shape: f32[1,20], index: 20, kind: input, shape index: {}]   ;;  %s11966_s21 = inlined_call_operand.vmem [shape: f32[1,20], index: 21, kind: input, shape index: {}]   ;;  %s11967_s22 = inlined_call_operand.vmem [shape: f32[1,20], index: 22, kind: input, shape index: {}]   ;;  %s11968_s23 = inlined_call_operand.<no memory space> [shape: f32[1,1], index: 23, kind: input, shape index: {}]   ;;  %s11969_s24 = inlined_call_operand.vmem [shape: f32[2,64,96], index: 24, kind: output, shape index: {0}]   ;;  %s11970_s25 = inlined_call_operand.vmem [shape: f32[2,1,1], index: 25, kind: output, shape index: {1}]  }
   0x1   :  { %11979 = sst [smem:[#allocation11_spill]] %s11945_s0  ;;  %v31_v0 = vstv %s11968_s23 }
   0x2   :  { %11980 = sst [smem:[#allocation12_spill]] %s11946_s1  ;;  %32 = vst [vmem:[#allocation10] sm:$0x1] %v31_v0 }
   0x3   :  { %11981 = sst [smem:[#allocation13_spill]] %s11947_s2 }
   0x4   :  { %11982 = sst [smem:[#allocation14_spill]] %s11948_s3 }
   0x5   :  { %11983 = sst [smem:[#allocation15_spill]] %s11949_s4 }
   0x6   :  { %11984 = sst [smem:[#allocation16_spill]] %s11950_s5 }
   0x7   :  { %11985 = sst [smem:[#allocation17_spill]] %s11951_s6  ;;  %s9963_s6 = smov 0  }
   0x8   :  { %11986 = sst [smem:[#allocation18_spill]] %s11952_s7 }
   0x9   :  { %11987 = sst [smem:[#allocation19_spill]] %s11953_s8 }
   0xa   :  { %11988 = sst [smem:[#allocation20_spill]] %s11954_s9 }
   0xb LB: > { %s6658_s30 = sadd.s32 4294967295, %s9820_s6   ;;  %p6662_p0 = scmp.ge.s32.totalorder %s9820_s6, 1  ;;  %s9820_s6 = sphi %s9963_s6, %s38_s6  }
   0xc   : > { %p700_p1 = scmp.lt.s32.totalorder %s9820_s6, 3 }
   0xe   : > { %p701_p2 = pnand %p6662_p0, %p700_p1 }
   0xf   : > { %p774_p3 = scmp.lt.s32.totalorder (!%p701_p2), %s6658_s30, 1  ;;  %v9822_v1 = vmov (!%p701_p2), 0.0|0.0   ;;  %vm9823_vm0 = vmmov (!%p701_p2), 0   ;;  %v9824_v2 = vmov (!%p701_p2), 0.0   ;;  %s11989_s26 = sld [smem:[#allocation11_spill]] (!%p701_p2)  ;;  %vm813_vm1 = vcmask (!%p701_p2), 523264  }
  0x10   : > { %704 = sbr.rel (%p701_p2) target bundleno = 3282 (0xcd2), region = 116  ;;  %8823 = vmatprep.subr.bf16.mxu1 (!%p701_p2), %v9822_v1  ;;  %7825 = vmatprep.mubr.msk.f32.mxu1 (!%p701_p2), %vm9823_vm0, %v9824_v2  ;;  %2190 = vst [vmem:[#allocation5] sm:$0xff] (!%p701_p2), %v9824_v2  ;;  %2191 = vst [vmem:[#allocation5 + $0x8] sm:$0xff] (!%p701_p2), %v9824_v2  ;;  %s11990_s4 = sld [smem:[#allocation14_spill]] (!%p701_p2)  ;;  %vm999_vm2 = vcmask (!%p701_p2), 785408   ;;  %vm1807_vm3 = vcmask (!%p701_p2), 456704  }
  0x11   : > { %2192 = vst [vmem:[#allocation5 + $0x10] sm:$0xff] (!%p701_p2), %v9824_v2  ;;  %2193 = vst [vmem:[#allocation5 + $0x18] sm:$0xff] (!%p701_p2), %v9824_v2  ;;  %s11992_s5 = sld [smem:[#allocation16_spill]] (!%p701_p2)  ;;  %s11993_s2 = sld [smem:[#allocation15_spill]] (!%p701_p2)  ;;  %vm1805_vm4 = vcmask (!%p701_p2), 457728   ;;  %vm2188_vm5 = vcmask (!%p701_p2), 519168  }
  0x12   : > { %2194 = vst [vmem:[#allocation5 + $0x20] sm:$0xff] (!%p701_p2), %v9824_v2  ;;  %2195 = vst [vmem:[#allocation5 + $0x28] sm:$0xff] (!%p701_p2), %v9824_v2  ;;  %s11994_s9 = sld [smem:[#allocation18_spill]] (!%p701_p2)  ;;  %s11995_s0 = sld [smem:[#allocation17_spill]] (!%p701_p2)  ;;  %vm2197_vm6 = vcmask (!%p701_p2), 516096   ;;  %vm2204_vm7 = vcmask (!%p701_p2), 1040896  }
  0x13   : > { %s9825_s7 = smov (!%p701_p2), 64   ;;  %s11996_s27 = sld [smem:[#allocation20_spill]] (!%p701_p2)  ;;  %vm2627_vm8 = vcmask (!%p701_p2), 261120   ;;  %vm2856_vm9 = vcmask (!%p701_p2), 916480   ;;  %vm2858_vm10 = vcmask (!%p701_p2), 915456   ;;  %vm2865_vm11 = vcmask (!%p701_p2), 647296  }
  0x14   : > { %2857 = vst.msk [vmem:[#allocation7] sm:$0xff] (!%p701_p2), %vm2856_vm9, %v9824_v2  ;;  %s9826_s3 = smov (!%p701_p2), 80   ;;  %vm3352_vm12 = vcmask (!%p701_p2), 1043456   ;;  %vm9828_vm13 = vmmov (!%p701_p2), 1   ;;  %vm3342_vm15 = vcmask (!%p701_p2), 97280  }
  0x15   : > { %2859 = vst.msk [vmem:[#allocation7 + $0x8] sm:$0x7f] (!%p701_p2), %vm2858_vm10, %v9824_v2  ;;  %vm9309_vm14 = vmpackc.low (!%p701_p2), %vm3352_vm12, %vm9828_vm13 }
  0x16   : > { %v6682_v14 = vld [vmem:[%s11990_s4 + $0x60] sm:$0xff] (!%p701_p2)  ;;  %v6683_v15 = vld [vmem:[%s11990_s4 + $0x68] sm:$0xff] (!%p701_p2)  ;;  %v6684_v18 = vld [vmem:[%s11990_s4 + $0x70] sm:$0xff] (!%p701_p2) }
  0x17   : > { %s12001_s30 = smov (!%p774_p3, %s6658_s30), 1  ;;  %v8835_v17 = vpack.c.bf16 %v6683_v15, %v6682_v14  ;;  %v6685_v19 = vld [vmem:[%s11990_s4 + $0x78] sm:$0xff]  ;;  %v6686_v22 = vld [vmem:[%s11990_s4 + $0x80] sm:$0xff]  ;;  %v6687_v23 = vld [vmem:[%s11990_s4 + $0x88] sm:$0xff] }
  0x18   : > { %s11976_s23 = sshll.u32 %s12001_s30, 6  ;;  %v8839_v21 = vpack.c.bf16 %v6685_v19, %v6684_v18  ;;  %v8843_v25 = vpack.c.bf16 %v6687_v23, %v6686_v22  ;;  %v6688_v26 = vld [vmem:[%s11990_s4 + $0x90] sm:$0xff]  ;;  %v6689_v27 = vld [vmem:[%s11990_s4 + $0x98] sm:$0xff]  ;;  %v6690_v42 = vld [vmem:[%s11990_s4 + $0xa0] sm:$0xff] }
  0x19   : > { %s778_s1 = scalar_lea.vmem %s11989_s26, %s11976_s23  ;;  %s11991_s26 = sld [smem:[#allocation13_spill]]  ;;  %v8847_v29 = vpack.c.bf16 %v6689_v27, %v6688_v26  ;;  %v6691_v43 = vld [vmem:[%s11990_s4 + $0xa8] sm:$0xff]  ;;  %v6692_v45 = vld [vmem:[%s11990_s4 + $0xb0] sm:$0xff]  ;;  %v6693_v46 = vld [vmem:[%s11990_s4 + $0xb8] sm:$0xff] }
  0x1a   : > { %v790_v3 = vld [vmem:[%s778_s1] sm:$0xff]  ;;  %v791_v4 = vld [vmem:[%s778_s1 + $0x8] sm:$0xff]  ;;  %v792_v5 = vld [vmem:[%s778_s1 + $0x10] sm:$0xff]  ;;  %v8851_v44 = vpack.c.bf16 %v6691_v43, %v6690_v42  ;;  %v8855_v47 = vpack.c.bf16 %v6693_v46, %v6692_v45  ;;  %s9827_s23 = smov 16  }
  0x1b   : > { %v8824_v6 = vpack.c.bf16 %v791_v4, %v790_v3  ;;  %v793_v7 = vld [vmem:[%s778_s1 + $0x18] sm:$0xff]  ;;  %v794_v9 = vld [vmem:[%s778_s1 + $0x20] sm:$0xff]  ;;  %v795_v10 = vld [vmem:[%s778_s1 + $0x28] sm:$0xff] }
  0x1c   : > { %v8827_v8 = vpack.c.bf16 %v793_v7, %v792_v5  ;;  %v8830_v11 = vpack.c.bf16 %v795_v10, %v794_v9  ;;  %v796_v12 = vld [vmem:[%s778_s1 + $0x30] sm:$0xff]  ;;  %v797_v13 = vld [vmem:[%s778_s1 + $0x38] sm:$0xff]  ;;  %v1017_v48 = vld [vmem:[%s11990_s4] sm:$0xff] }
  0x1d   : > { %8825 = vmatpush3.bf16.msra.mxu1 %v8824_v6  ;;  %v8833_v16 = vpack.c.bf16 %v797_v13, %v796_v12  ;;  %v1018_v49 = vld [vmem:[%s11990_s4 + $0x8] sm:$0xff]  ;;  %v1019_v61 = vld [vmem:[%s11990_s4 + $0x10] sm:$0xff]  ;;  %v1020_v62 = vld [vmem:[%s11990_s4 + $0x18] sm:$0xff] }
  0x1e   : > { %8826 = vmatprep.subr.bf16.mxu1 %v9822_v1  ;;  %v8859_v50 = vpack.c.bf16 %v1018_v49, %v1017_v48  ;;  %v8863_v0 = vpack.c.bf16 %v1020_v62, %v1019_v61  ;;  %v1021_v4 = vld [vmem:[%s11990_s4 + $0x20] sm:$0xff]  ;;  %v1022_v5 = vld [vmem:[%s11990_s4 + $0x28] sm:$0xff]  ;;  %v1023_v10 = vld [vmem:[%s11990_s4 + $0x30] sm:$0xff] }
  0x1f   : > { %v798_v20 = vld [vmem:[%s11991_s26] sm:$0xff]  ;;  %v799_v24 = vld [vmem:[%s11991_s26 + $0x8] sm:$0xff]  ;;  %v800_v28 = vld [vmem:[%s11991_s26 + $0x10] sm:$0xff]  ;;  %v8867_v9 = vpack.c.bf16 %v1022_v5, %v1021_v4 }
  0x20   : > { %v801_v30 = vld [vmem:[%s11991_s26 + $0x18] sm:$0xff]  ;;  %v802_v31 = vld [vmem:[%s11991_s26 + $0x20] sm:$0xff]  ;;  %v803_v32 = vld [vmem:[%s11991_s26 + $0x28] sm:$0xff] }
  0x21   : > { %8828 = vmatpush3.bf16.msra.mxu1 %v8827_v8  ;;  %v804_v33 = vld [vmem:[%s11991_s26 + $0x30] sm:$0xff]  ;;  %v805_v34 = vld [vmem:[%s11991_s26 + $0x38] sm:$0xff]  ;;  %v806_v35 = vld [vmem:[%s11991_s26 + $0x40] sm:$0xff] }
  0x22   : > { %8829 = vmatprep.subr.bf16.mxu1 %v9822_v1  ;;  %v807_v36 = vld [vmem:[%s11991_s26 + $0x48] sm:$0xff]  ;;  %v808_v37 = vld [vmem:[%s11991_s26 + $0x50] sm:$0xff]  ;;  %v809_v38 = vld [vmem:[%s11991_s26 + $0x58] sm:$0xff] }
  0x23   : > { %v810_v39 = vld [vmem:[%s11991_s26 + $0x60] sm:$0xff]  ;;  %v811_v40 = vld [vmem:[%s11991_s26 + $0x68] sm:$0xff]  ;;  %v812_v41 = vld [vmem:[%s11991_s26 + $0x70] sm:$0xff] }
  0x24   : > { %v1025_v15 = vld [vmem:[%s11990_s4 + $0x40] sm:$0xff]  ;;  %v6699_v26 = vld [vmem:[%s11990_s4 + $0xc8] sm:$0xff]  ;;  %v6704_v42 = vld [vmem:[%s11990_s4 + $0xf0] sm:$0xff] }
  0x25   : > { %8831 = vmatpush3.bf16.msra.mxu1 %v8830_v11  ;;  %v1024_v11 = vld [vmem:[%s11990_s4 + $0x38] sm:$0xff]  ;;  %v6707_v48 = vld [vmem:[%s11990_s4 + $0x108] sm:$0xff] }
  0x26   : > { %8832 = vmatprep.subr.bf16.mxu1 %v9822_v1  ;;  %v8871_v14 = vpack.c.bf16 %v1024_v11, %v1023_v10  ;;  %v6705_v43 = vld [vmem:[%s11990_s4 + $0xf8] sm:$0xff]  ;;  %v6717_v4 = vld [vmem:[%s11990_s4 + $0x148] sm:$0xff] }
  0x27   : > { %v8895_v46 = vpack.c.bf16 %v6705_v43, %v6704_v42  ;;  %v6715_v61 = vld [vmem:[%s11990_s4 + $0x138] sm:$0xff]  ;;  %v6721_v10 = vld [vmem:[%s11990_s4 + $0x168] sm:$0xff]  ;;  %v6744_v43 = vld [vmem:[%s11990_s4 + $0x200] sm:$0xff] }
  0x29   : > { %8834 = vmatpush3.bf16.msra.mxu1 %v8833_v16  ;;  %v1026_v16 = vld [vmem:[%s11990_s4 + $0x48] sm:$0xff] }
  0x2a   : > { %8836 = vmatprep.subr.bf16.mxu1 %v8835_v17  ;;  %v8875_v19 = vpack.c.bf16 %v1026_v16, %v1025_v15  ;;  %v6726_v15 = vld [vmem:[%s11990_s4 + $0x180] sm:$0xff]  ;;  %v6727_v16 = vld [vmem:[%s11990_s4 + $0x188] sm:$0xff] }
  0x2c   : > { %7826 = vmatmul.mubr.msk.f32.vlgmr.msra.gmra.mrb[0].mxu1 %vm813_vm1, %v798_v20  ;;  %v1027_v20 = vld [vmem:[%s11990_s4 + $0x50] sm:$0xff] }
  0x2d   : > { %7828 = vmatprep.mubr.msk.f32.mxu1 %vm9823_vm0, %v9824_v2  ;;  %8838 = vmatpush3.bf16.msra.mxu1 %v8835_v17 }
  0x2e   : > { %8840 = vmatprep.subr.bf16.mxu1 %v8839_v21 }
  0x30   : > { %7829 = vmatmul.mubr.msk.f32.gmra.mrb[2].mxu1 %vm813_vm1, %v799_v24 }
  0x31   : > { %7831 = vmatprep.mubr.msk.f32.mxu1 %vm9823_vm0, %v9824_v2  ;;  %8842 = vmatpush3.bf16.msra.mxu1 %v8839_v21  ;;  %v1028_v21 = vld [vmem:[%s11990_s4 + $0x58] sm:$0xff] }
  0x32   : > { %8844 = vmatprep.subr.bf16.mxu1 %v8843_v25  ;;  %v8879_v24 = vpack.c.bf16 %v1028_v21, %v1027_v20 }
  0x34   : > { %7832 = vmatmul.mubr.msk.f32.gmra.mrb[4].mxu1 %vm813_vm1, %v800_v28 }
  0x35   : > { %7834 = vmatprep.mubr.msk.f32.mxu1 %vm9823_vm0, %v9824_v2  ;;  %8846 = vmatpush3.bf16.msra.mxu1 %v8843_v25  ;;  %v6698_v25 = vld [vmem:[%s11990_s4 + $0xc0] sm:$0xff] }
  0x36   : > { %8848 = vmatprep.subr.bf16.mxu1 %v8847_v29 }
  0x38   : > { %7835 = vmatmul.mubr.msk.f32.gmra.mrb[6].mxu1 %vm813_vm1, %v801_v30  ;;  %v6700_v30 = vld [vmem:[%s11990_s4 + $0xd0] sm:$0xff] }
  0x39   : > { %7837 = vmatprep.mubr.msk.f32.mxu1 %vm9823_vm0, %v9824_v2  ;;  %8850 = vmatpush3.bf16.msra.mxu1 %v8847_v29  ;;  %v8883_v29 = vpack.c.bf16 %v6699_v26, %v6698_v25  ;;  %v6732_v26 = vld [vmem:[%s11990_s4 + $0x1b0] sm:$0xff] }
  0x3a   : > { %8852 = vmatprep.subr.bf16.mxu1 %v8851_v44 }
  0x3c   : > { %7838 = vmatmul.mubr.msk.f32.gmra.mrb[8].mxu1 %vm813_vm1, %v802_v31  ;;  %v6701_v31 = vld [vmem:[%s11990_s4 + $0xd8] sm:$0xff] }
  0x3d   : > { %7840 = vmatprep.mubr.msk.f32.mxu1 %vm9823_vm0, %v9824_v2  ;;  %8854 = vmatpush3.bf16.msra.mxu1 %v8851_v44 }
  0x3e   : > { %8856 = vmatprep.subr.bf16.mxu1 %v8855_v47 }
  0x40   : > { %7841 = vmatmul.mubr.msk.f32.gmra.mrb[10].mxu1 %vm813_vm1, %v803_v32 }
  0x41   : > { %7843 = vmatprep.mubr.msk.f32.mxu1 %vm9823_vm0, %v9824_v2  ;;  %8858 = vmatpush3.bf16.msra.mxu1 %v8855_v47  ;;  %v6706_v47 = vld [vmem:[%s11990_s4 + $0x100] sm:$0xff] }
  0x42   : > { %8860 = vmatprep.subr.bf16.mxu1 %v8859_v50 }
  0x44   : > { %7844 = vmatmul.mubr.msk.f32.gmra.mrb[12].mxu1 %vm813_vm1, %v804_v33 }
  0x45   : > { %7846 = vmatprep.mubr.msk.f32.mxu1 %vm9823_vm0, %v9824_v2 }
  0x48   : > { %7847 = vmatmul.mubr.msk.f32.gmra.mrb[14].mxu1 %vm813_vm1, %v805_v34  ;;  %v8887_v34 = vpack.c.bf16 %v6701_v31, %v6700_v30  ;;  %v6735_v30 = vld [vmem:[%s11990_s4 + $0x1c8] sm:$0xff] }
  0x49   : > { %7849 = vmatprep.mubr.msk.f32.mxu1 %vm9823_vm0, %v9824_v2 }
  0x4c   : > { %7850 = vmatmul.mubr.msk.f32.gmra.mrb[16].mxu1 %vm813_vm1, %v806_v35 }
  0x4d   : > { %7852 = vmatprep.mubr.msk.f32.mxu1 %vm9823_vm0, %v9824_v2 }
  0x50   : > { %7853 = vmatmul.mubr.msk.f32.gmra.mrb[18].mxu1 %vm813_vm1, %v807_v36  ;;  %v6702_v36 = vld [vmem:[%s11990_s4 + $0xe0] sm:$0xff] }
  0x51   : > { %7855 = vmatprep.mubr.msk.f32.mxu1 %vm9823_vm0, %v9824_v2 }
  0x54   : > { %7856 = vmatmul.mubr.msk.f32.gmra.mrb[20].mxu1 %vm813_vm1, %v808_v37  ;;  %v6703_v37 = vld [vmem:[%s11990_s4 + $0xe8] sm:$0xff] }
  0x55   : > { %7858 = vmatprep.mubr.msk.f32.mxu1 %vm9823_vm0, %v9824_v2 }
  0x58   : > { %7859 = vmatmul.mubr.msk.f32.gmra.mrb[22].mxu1 %vm813_vm1, %v809_v38 }
  0x59   : > { %7861 = vmatprep.mubr.msk.f32.mxu1 %vm9823_vm0, %v9824_v2 }
  0x5c   : > { %7862 = vmatmul.mubr.msk.f32.gmra.mrb[24].mxu1 %vm813_vm1, %v810_v39 }
  0x5d   : > { %7864 = vmatprep.mubr.msk.f32.mxu1 %vm9823_vm0, %v9824_v2 }
  0x60   : > { %7865 = vmatmul.mubr.msk.f32.gmra.mrb[26].mxu1 %vm813_vm1, %v811_v40 }
  0x61   : > { %7867 = vmatprep.mubr.msk.f32.mxu1 %vm9823_vm0, %v9824_v2 }
  0x64   : > { %7868 = vmatmul.mubr.msk.f32.gmra.mrb[28].mxu1 %vm813_vm1, %v812_v41  ;;  %v8891_v41 = vpack.c.bf16 %v6703_v37, %v6702_v36  ;;  %v6741_v36 = vld [vmem:[%s11990_s4 + $0x1e8] sm:$0xff] }
  0xff   : > { %v925_v51 = vpop.f32.mrb[0].mxu1 }
 0x100   : > { %1000 = vst.msk [vmem:[#allocation2] sm:$0xff] %vm999_vm2, %v925_v51  ;;  %v7827_v52 = vpop.f32.mrb[1].mxu1  ;;  %v8899_v51 = vpack.c.bf16 %v6707_v48, %v6706_v47  ;;  %v6747_v47 = vld [vmem:[%s11990_s4 + $0x218] sm:$0xff] }
 0x101   : > { %v6708_v52 = vld [vmem:[%s11990_s4 + $0x110] sm:$0xff] }
 0x103   : > { %v930_v53 = vpop.f32.mrb[2].mxu1 }
 0x104   : > { %1001 = vst.msk [vmem:[#allocation2 + $0x8] sm:$0xff] %vm999_vm2, %v930_v53  ;;  %v7830_v54 = vpop.f32.mrb[3].mxu1  ;;  %v6709_v53 = vld [vmem:[%s11990_s4 + $0x118] sm:$0xff] }
 0x107   : > { %v935_v55 = vpop.f32.mrb[4].mxu1  ;;  %v1015_v7 = vld [vmem:[#allocation2] sm:$0xff] }
 0x108   : > { %1002 = vst.msk [vmem:[#allocation2 + $0x10] sm:$0xff] %vm999_vm2, %v935_v55  ;;  %v7833_v56 = vpop.f32.mrb[5].mxu1 }
 0x109   : > { %v8903_v56 = vpack.c.bf16 %v6709_v53, %v6708_v52  ;;  %v6750_v52 = vld [vmem:[%s11990_s4 + $0x230] sm:$0xff]  ;;  %v6751_v53 = vld [vmem:[%s11990_s4 + $0x238] sm:$0xff] }
 0x10b   : > { %v940_v57 = vpop.f32.mrb[6].mxu1  ;;  %v1016_v35 = vld [vmem:[#allocation2 + $0x8] sm:$0x7f] }
 0x10c   : > { %1003 = vst.msk [vmem:[#allocation2 + $0x18] sm:$0xff] %vm999_vm2, %v940_v57  ;;  %v7836_v58 = vpop.f32.mrb[7].mxu1  ;;  %v6712_v57 = vld [vmem:[%s11990_s4 + $0x120] sm:$0xff] }
 0x10d   : > { %v6713_v58 = vld [vmem:[%s11990_s4 + $0x128] sm:$0xff] }
 0x10f   : > { %v945_v59 = vpop.f32.mrb[8].mxu1  ;;  %v1029_v60 = vld [vmem:[#allocation2 + $0xf] sm:$0xff] }
 0x110   : > { %1004 = vst.msk [vmem:[#allocation2 + $0x20] sm:$0xff] %vm999_vm2, %v945_v59  ;;  %7894 = vmatprep.mubr.msk.f32.mxu1 %vm999_vm2, %v1029_v60  ;;  %v7839_v63 = vpop.f32.mrb[9].mxu1  ;;  %v8907_v59 = vpack.c.bf16 %v6713_v58, %v6712_v57  ;;  %v6714_v60 = vld [vmem:[%s11990_s4 + $0x130] sm:$0xff] }
 0x111   : > { %v8911_v63 = vpack.c.bf16 %v6715_v61, %v6714_v60  ;;  %v6756_v58 = vld [vmem:[%s11990_s4 + $0x250] sm:$0xff] }
 0x113   : > { %v1030_v3 = vld [vmem:[#allocation2 + $0x17] sm:$0x7f]  ;;  %v950_v6 = vpop.f32.mrb[10].mxu1 }
 0x114   : > { %7895 = vmatmul.mubr.msk.f32.vlgmr.msra.gmra.mrb[30].mxu1 %vm999_vm2, %v1030_v3  ;;  %1005 = vst.msk [vmem:[#allocation2 + $0x28] sm:$0xff] %vm999_vm2, %v950_v6  ;;  %v7842_v8 = vpop.f32.mrb[11].mxu1  ;;  %v6716_v3 = vld [vmem:[%s11990_s4 + $0x140] sm:$0xff]  ;;  %v6718_v6 = vld [vmem:[%s11990_s4 + $0x150] sm:$0xff] }
 0x115   : > { %8862 = vmatpush3.bf16.msra.mxu1 %v8859_v50  ;;  %7921 = vmatprep.mubr.msk.f32.mxu1 %vm999_vm2, %v1015_v7  ;;  %v8915_v5 = vpack.c.bf16 %v6717_v4, %v6716_v3  ;;  %v6719_v7 = vld [vmem:[%s11990_s4 + $0x158] sm:$0xff]  ;;  %v6760_v4 = vld [vmem:[%s11990_s4 + $0x270] sm:$0xff] }
 0x116   : > { %8864 = vmatprep.subr.bf16.mxu1 %v8863_v0  ;;  %v8919_v8 = vpack.c.bf16 %v6719_v7, %v6718_v6  ;;  %v6762_v7 = vld [vmem:[%s11990_s4 + $0x280] sm:$0xff] }
 0x117   : > { %v955_v12 = vpop.f32.mrb[12].mxu1  ;;  %v1206_v39 = vld [vmem:[#allocation2 + $0x1e] sm:$0xff] }
 0x118   : > { %1006 = vst.msk [vmem:[#allocation2 + $0x30] sm:$0xff] %vm999_vm2, %v955_v12  ;;  %v7845_v13 = vpop.f32.mrb[13].mxu1  ;;  %v6722_v12 = vld [vmem:[%s11990_s4 + $0x170] sm:$0xff] }
 0x119   : > { %8866 = vmatpush3.bf16.msra.mxu1 %v8863_v0  ;;  %v6723_v13 = vld [vmem:[%s11990_s4 + $0x178] sm:$0xff] }
 0x11a   : > { %8868 = vmatprep.subr.bf16.mxu1 %v8867_v9 }
 0x11b   : > { %v960_v17 = vpop.f32.mrb[14].mxu1  ;;  %v1207_v0 = vld [vmem:[#allocation2 + $0x26] sm:$0x7f] }
 0x11c   : > { %1007 = vst.msk [vmem:[#allocation2 + $0x38] sm:$0xff] %vm999_vm2, %v960_v17  ;;  %v7848_v18 = vpop.f32.mrb[15].mxu1  ;;  %v8931_v17 = vpack.c.bf16 %v6727_v16, %v6726_v15  ;;  %v6770_v16 = vld [vmem:[%s11990_s4 + $0x2b0] sm:$0xff] }
 0x11d   : > { %8870 = vmatpush3.bf16.msra.mxu1 %v8867_v9  ;;  %v6720_v9 = vld [vmem:[%s11990_s4 + $0x160] sm:$0xff]  ;;  %v6728_v18 = vld [vmem:[%s11990_s4 + $0x190] sm:$0xff] }
 0x11e   : > { %8872 = vmatprep.subr.bf16.mxu1 %v8871_v14  ;;  %v8923_v11 = vpack.c.bf16 %v6721_v10, %v6720_v9  ;;  %v6764_v10 = vld [vmem:[%s11990_s4 + $0x290] sm:$0xff] }
 0x11f   : > { %v965_v22 = vpop.f32.mrb[16].mxu1  ;;  %v1304_v62 = vld [vmem:[#allocation2 + $0x2d] sm:$0xff] }
 0x120   : > { %1008 = vst.msk [vmem:[#allocation2 + $0x40] sm:$0xff] %vm999_vm2, %v965_v22  ;;  %v7851_v23 = vpop.f32.mrb[17].mxu1 }
 0x121   : > { %8874 = vmatpush3.bf16.msra.mxu1 %v8871_v14  ;;  %v8927_v14 = vpack.c.bf16 %v6723_v13, %v6722_v12  ;;  %v6730_v23 = vld [vmem:[%s11990_s4 + $0x1a0] sm:$0xff] }
 0x122   : > { %8876 = vmatprep.subr.bf16.mxu1 %v8875_v19  ;;  %v6768_v13 = vld [vmem:[%s11990_s4 + $0x2a0] sm:$0xff] }
 0x123   : > { %v970_v27 = vpop.f32.mrb[18].mxu1  ;;  %v1305_v22 = vld [vmem:[#allocation2 + $0x35] sm:$0x7f] }
 0x124   : > { %1009 = vst.msk [vmem:[#allocation2 + $0x48] sm:$0xff] %vm999_vm2, %v970_v27  ;;  %v7854_v28 = vpop.f32.mrb[19].mxu1  ;;  %v6733_v27 = vld [vmem:[%s11990_s4 + $0x1b8] sm:$0xff] }
 0x125   : > { %8878 = vmatpush3.bf16.msra.mxu1 %v8875_v19  ;;  %v6729_v19 = vld [vmem:[%s11990_s4 + $0x198] sm:$0xff]  ;;  %v8943_v28 = vpack.c.bf16 %v6733_v27, %v6732_v26  ;;  %v6776_v27 = vld [vmem:[%s11990_s4 + $0x2e0] sm:$0xff] }
 0x126   : > { %8880 = vmatprep.subr.bf16.mxu1 %v8879_v24  ;;  %v8935_v21 = vpack.c.bf16 %v6729_v19, %v6728_v18 }
 0x127   : > { %v975_v32 = vpop.f32.mrb[20].mxu1  ;;  %v1402_v20 = vld [vmem:[#allocation2 + $0x3c] sm:$0xff] }
 0x128   : > { %1010 = vst.msk [vmem:[#allocation2 + $0x50] sm:$0xff] %vm999_vm2, %v975_v32  ;;  %v7857_v33 = vpop.f32.mrb[21].mxu1  ;;  %v6736_v32 = vld [vmem:[%s11990_s4 + $0x1d0] sm:$0xff] }
 0x129   : > { %8882 = vmatpush3.bf16.msra.mxu1 %v8879_v24  ;;  %v6731_v24 = vld [vmem:[%s11990_s4 + $0x1a8] sm:$0xff]  ;;  %v6737_v33 = vld [vmem:[%s11990_s4 + $0x1d8] sm:$0xff] }
 0x12a   : > { %8884 = vmatprep.subr.bf16.mxu1 %v8883_v29  ;;  %v8939_v25 = vpack.c.bf16 %v6731_v24, %v6730_v23  ;;  %v6774_v24 = vld [vmem:[%s11990_s4 + $0x2d0] sm:$0xff] }
 0x12b   : > { %v980_v38 = vpop.f32.mrb[22].mxu1  ;;  %v1403_v42 = vld [vmem:[#allocation2 + $0x44] sm:$0x7f] }
 0x12c   : > { %7922 = vmatmul.mubr.msk.f32.vlgmr.msra.gmra.mrb[30].mxu1 %vm999_vm2, %v1016_v35  ;;  %1011 = vst.msk [vmem:[#allocation2 + $0x58] sm:$0xff] %vm999_vm2, %v980_v38  ;;  %v7860_v40 = vpop.f32.mrb[23].mxu1  ;;  %v6740_v35 = vld [vmem:[%s11990_s4 + $0x1e0] sm:$0xff]  ;;  %v6742_v38 = vld [vmem:[%s11990_s4 + $0x1f0] sm:$0xff] }
 0x12d   : > { %8886 = vmatpush3.bf16.msra.mxu1 %v8883_v29  ;;  %7948 = vmatprep.mubr.msk.f32.mxu1 %vm999_vm2, %v1206_v39  ;;  %v6734_v29 = vld [vmem:[%s11990_s4 + $0x1c0] sm:$0xff]  ;;  %v8955_v37 = vpack.c.bf16 %v6741_v36, %v6740_v35  ;;  %v6743_v39 = vld [vmem:[%s11990_s4 + $0x1f8] sm:$0xff]  ;;  %v1812_v35 = vld [vmem:[%s11992_s5 + $0x8] sm:$0xff] }
 0x12e   : > { %8888 = vmatprep.subr.bf16.mxu1 %v8887_v34  ;;  %v8947_v31 = vpack.c.bf16 %v6735_v30, %v6734_v29  ;;  %v6778_v30 = vld [vmem:[%s11990_s4 + $0x2f0] sm:$0xff] }
 0x12f   : > { %v985_v44 = vpop.f32.mrb[24].mxu1  ;;  %v1500_v40 = vld [vmem:[#allocation2 + $0x4b] sm:$0xff] }
 0x130   : > { %1012 = vst.msk [vmem:[#allocation2 + $0x60] sm:$0xff] %vm999_vm2, %v985_v44  ;;  %v7863_v45 = vpop.f32.mrb[25].mxu1  ;;  %v6745_v44 = vld [vmem:[%s11990_s4 + $0x208] sm:$0xff] }
 0x131   : > { %8890 = vmatpush3.bf16.msra.mxu1 %v8887_v34  ;;  %v8951_v34 = vpack.c.bf16 %v6737_v33, %v6736_v32  ;;  %v8963_v45 = vpack.c.bf16 %v6745_v44, %v6744_v43  ;;  %v6785_v43 = vld [vmem:[%s11992_s5 + $0x48] sm:$0xff]  ;;  %v6786_v44 = vld [vmem:[%s11992_s5 + $0x50] sm:$0xff] }
 0x132   : > { %8892 = vmatprep.subr.bf16.mxu1 %v8891_v41 }
 0x133   : > { %v990_v49 = vpop.f32.mrb[26].mxu1 }
 0x134   : > { %1013 = vst.msk [vmem:[#allocation2 + $0x68] sm:$0xff] %vm999_vm2, %v990_v49  ;;  %v7866_v50 = vpop.f32.mrb[27].mxu1  ;;  %v6748_v49 = vld [vmem:[%s11990_s4 + $0x220] sm:$0xff] }
 0x135   : > { %8894 = vmatpush3.bf16.msra.mxu1 %v8891_v41  ;;  %v8959_v41 = vpack.c.bf16 %v6743_v39, %v6742_v38  ;;  %v6749_v50 = vld [vmem:[%s11990_s4 + $0x228] sm:$0xff]  ;;  %v6784_v38 = vld [vmem:[%s11992_s5 + $0x40] sm:$0xff] }
 0x136   : > { %8896 = vmatprep.subr.bf16.mxu1 %v8895_v46 }
 0x137   : > { %v995_v54 = vpop.f32.mrb[28].mxu1  ;;  %v1598_v60 = vld [vmem:[#allocation2 + $0x5a] sm:$0xff] }
 0x138   : > { %1014 = vst.msk [vmem:[#allocation2 + $0x70] sm:$0xff] %vm999_vm2, %v995_v54  ;;  %v7869_v55 = vpop.f32.mrb[29].mxu1  ;;  %v8975_v54 = vpack.c.bf16 %v6751_v53, %v6750_v52  ;;  %v1817_v52 = vld [vmem:[%s11992_s5 + $0x30] sm:$0xff]  ;;  %v6789_v53 = vld [vmem:[%s11992_s5 + $0x68] sm:$0xff] }
 0x139   : > { %8898 = vmatpush3.bf16.msra.mxu1 %v8895_v46  ;;  %v6746_v46 = vld [vmem:[%s11990_s4 + $0x210] sm:$0xff]  ;;  %v6754_v55 = vld [vmem:[%s11990_s4 + $0x240] sm:$0xff] }
 0x13a   : > { %8900 = vmatprep.subr.bf16.mxu1 %v8899_v51  ;;  %v8967_v48 = vpack.c.bf16 %v6747_v47, %v6746_v46  ;;  %v1815_v46 = vld [vmem:[%s11992_s5 + $0x20] sm:$0xff]  ;;  %v1816_v47 = vld [vmem:[%s11992_s5 + $0x28] sm:$0xff] }
 0x13d   : > { %8902 = vmatpush3.bf16.msra.mxu1 %v8899_v51  ;;  %v8971_v51 = vpack.c.bf16 %v6749_v50, %v6748_v49  ;;  %v6787_v49 = vld [vmem:[%s11992_s5 + $0x58] sm:$0xff]  ;;  %v6788_v50 = vld [vmem:[%s11992_s5 + $0x60] sm:$0xff] }
 0x13e   : > { %8904 = vmatprep.subr.bf16.mxu1 %v8903_v56 }
 0x13f   : > { %v1696_v18 = vld [vmem:[#allocation2 + $0x69] sm:$0xff]  ;;  %v1697_v33 = vld [vmem:[#allocation2 + $0x71] sm:$0x7f] }
 0x141   : > { %8906 = vmatpush3.bf16.msra.mxu1 %v8903_v56  ;;  %v6755_v56 = vld [vmem:[%s11990_s4 + $0x248] sm:$0xff] }
 0x142   : > { %8908 = vmatprep.subr.bf16.mxu1 %v8907_v59  ;;  %v8979_v57 = vpack.c.bf16 %v6755_v56, %v6754_v55  ;;  %v6795_v55 = vld [vmem:[%s11992_s5 + $0x78] sm:$0xff] }
 0x144   : > { %7949 = vmatmul.mubr.msk.f32.vlgmr.msra.gmra.mrb[30].mxu1 %vm999_vm2, %v1207_v0  ;;  %v6759_v0 = vld [vmem:[%s11990_s4 + $0x268] sm:$0xff] }
 0x145   : > { %8910 = vmatpush3.bf16.msra.mxu1 %v8907_v59  ;;  %7975 = vmatprep.mubr.msk.f32.mxu1 %vm999_vm2, %v1304_v62  ;;  %v6757_v59 = vld [vmem:[%s11990_s4 + $0x258] sm:$0xff] }
 0x146   : > { %8912 = vmatprep.subr.bf16.mxu1 %v8911_v63  ;;  %v8983_v61 = vpack.c.bf16 %v6757_v59, %v6756_v58  ;;  %v1501_v62 = vld [vmem:[#allocation2 + $0x53] sm:$0x7f] }
 0x149   : > { %8914 = vmatpush3.bf16.msra.mxu1 %v8911_v63  ;;  %v6758_v63 = vld [vmem:[%s11990_s4 + $0x260] sm:$0xff] }
 0x14a   : > { %8916 = vmatprep.subr.bf16.mxu1 %v8915_v5  ;;  %v8987_v3 = vpack.c.bf16 %v6759_v0, %v6758_v63  ;;  %v6796_v0 = vld [vmem:[%s11992_s5 + $0x80] sm:$0xff] }
 0x14d   : > { %8918 = vmatpush3.bf16.msra.mxu1 %v8915_v5  ;;  %v6761_v5 = vld [vmem:[%s11990_s4 + $0x278] sm:$0xff] }
 0x14e   : > { %8920 = vmatprep.subr.bf16.mxu1 %v8919_v8  ;;  %v8991_v6 = vpack.c.bf16 %v6761_v5, %v6760_v4 }
 0x151   : > { %8922 = vmatpush3.bf16.msra.mxu1 %v8919_v8  ;;  %v6763_v8 = vld [vmem:[%s11990_s4 + $0x288] sm:$0xff] }
 0x152   : > { %8924 = vmatprep.subr.bf16.mxu1 %v8923_v11  ;;  %v8995_v9 = vpack.c.bf16 %v6763_v8, %v6762_v7  ;;  %v6798_v7 = vld [vmem:[%s11992_s5 + $0x90] sm:$0xff] }
 0x155   : > { %8926 = vmatpush3.bf16.msra.mxu1 %v8923_v11  ;;  %v6765_v11 = vld [vmem:[%s11990_s4 + $0x298] sm:$0xff] }
 0x156   : > { %8928 = vmatprep.subr.bf16.mxu1 %v8927_v14  ;;  %v8999_v12 = vpack.c.bf16 %v6765_v11, %v6764_v10  ;;  %v6799_v10 = vld [vmem:[%s11992_s5 + $0x98] sm:$0xff] }
 0x159   : > { %8930 = vmatpush3.bf16.msra.mxu1 %v8927_v14  ;;  %v6769_v14 = vld [vmem:[%s11990_s4 + $0x2a8] sm:$0xff] }
 0x15a   : > { %8932 = vmatprep.subr.bf16.mxu1 %v8931_v17  ;;  %v9003_v15 = vpack.c.bf16 %v6769_v14, %v6768_v13  ;;  %v6800_v13 = vld [vmem:[%s11992_s5 + $0xa0] sm:$0xff]  ;;  %v6803_v14 = vld [vmem:[%s11992_s5 + $0xa8] sm:$0xff] }
 0x15c   : > { %7976 = vmatmul.mubr.msk.f32.vlgmr.msra.gmra.mrb[30].mxu1 %vm999_vm2, %v1305_v22  ;;  %v6773_v22 = vld [vmem:[%s11990_s4 + $0x2c8] sm:$0xff] }
 0x15d   : > { %8934 = vmatpush3.bf16.msra.mxu1 %v8931_v17  ;;  %8002 = vmatprep.mubr.msk.f32.mxu1 %vm999_vm2, %v1402_v20  ;;  %v6771_v17 = vld [vmem:[%s11990_s4 + $0x2b8] sm:$0xff]  ;;  %v1599_v20 = vld [vmem:[#allocation2 + $0x62] sm:$0x7f] }
 0x15e   : > { %8936 = vmatprep.subr.bf16.mxu1 %v8935_v21  ;;  %v9007_v19 = vpack.c.bf16 %v6771_v17, %v6770_v16  ;;  %v6805_v16 = vld [vmem:[%s11992_s5 + $0xb8] sm:$0xff]  ;;  %v6806_v17 = vld [vmem:[%s11992_s5 + $0xc0] sm:$0xff] }
 0x161   : > { %8938 = vmatpush3.bf16.msra.mxu1 %v8935_v21  ;;  %v6772_v21 = vld [vmem:[%s11990_s4 + $0x2c0] sm:$0xff] }
 0x162   : > { %8940 = vmatprep.subr.bf16.mxu1 %v8939_v25  ;;  %v9011_v23 = vpack.c.bf16 %v6773_v22, %v6772_v21  ;;  %v6807_v21 = vld [vmem:[%s11992_s5 + $0xc8] sm:$0xff]  ;;  %v6808_v22 = vld [vmem:[%s11992_s5 + $0xd0] sm:$0xff] }
 0x165   : > { %8942 = vmatpush3.bf16.msra.mxu1 %v8939_v25  ;;  %v6775_v25 = vld [vmem:[%s11990_s4 + $0x2d8] sm:$0xff] }
 0x166   : > { %8944 = vmatprep.subr.bf16.mxu1 %v8943_v28  ;;  %v9015_v26 = vpack.c.bf16 %v6775_v25, %v6774_v24  ;;  %v9071_v24 = vpack.c.bf16 %v6808_v22, %v6807_v21  ;;  %v6809_v25 = vld [vmem:[%s11992_s5 + $0xd8] sm:$0xff]  ;;  %v2266_v21 = vld [vmem:[%s11994_s9 + $0x70] sm:$0xff] }
 0x167   : > { %v2267_v22 = vld [vmem:[%s11994_s9 + $0x78] sm:$0xff] }
 0x169   : > { %8946 = vmatpush3.bf16.msra.mxu1 %v8943_v28  ;;  %v6777_v28 = vld [vmem:[%s11990_s4 + $0x2e8] sm:$0xff] }
 0x16a   : > { %8948 = vmatprep.subr.bf16.mxu1 %v8947_v31  ;;  %v9019_v29 = vpack.c.bf16 %v6777_v28, %v6776_v27  ;;  %v2268_v27 = vld [vmem:[%s11994_s9 + $0x80] sm:$0xff]  ;;  %v2269_v28 = vld [vmem:[%s11994_s9 + $0x88] sm:$0xff] }
 0x16d   : > { %8950 = vmatpush3.bf16.msra.mxu1 %v8947_v31  ;;  %v6779_v31 = vld [vmem:[%s11990_s4 + $0x2f8] sm:$0xff]  ;;  %s11997_s4 = sld [smem:[#allocation19_spill]] }
 0x16e   : > { %8952 = vmatprep.subr.bf16.mxu1 %v8951_v34  ;;  %v9023_v32 = vpack.c.bf16 %v6779_v31, %v6778_v30  ;;  %v9075_v30 = vpack.c.bf16 %v2269_v28, %v2268_v27  ;;  %v2253_v31 = vld [vmem:[%s11994_s9 + $0x8] sm:$0xff] }
 0x171   : > { %8954 = vmatpush3.bf16.msra.mxu1 %v8951_v34  ;;  %v1811_v34 = vld [vmem:[%s11992_s5] sm:$0xff] }
 0x172   : > { %8956 = vmatprep.subr.bf16.mxu1 %v8955_v37  ;;  %v9039_v36 = vpack.c.bf16 %v1812_v35, %v1811_v34 }
 0x174   : > { %8003 = vmatmul.mubr.msk.f32.vlgmr.msra.gmra.mrb[30].mxu1 %vm999_vm2, %v1403_v42  ;;  %9040 = vmatprep.subr.bf16.mxu0 %v9039_v36 }
 0x175   : > { %8958 = vmatpush3.bf16.msra.mxu1 %v8955_v37  ;;  %8029 = vmatprep.mubr.msk.f32.mxu1 %vm999_vm2, %v1500_v40  ;;  %v6783_v37 = vld [vmem:[%s11992_s5 + $0x38] sm:$0xff]  ;;  %v1813_v40 = vld [vmem:[%s11992_s5 + $0x10] sm:$0xff] }
 0x176   : > { %8960 = vmatprep.subr.bf16.mxu1 %v8959_v41  ;;  %v9027_v39 = vpack.c.bf16 %v6784_v38, %v6783_v37  ;;  %9042 = vmatpush3.bf16.msra.mxu0 %v9039_v36  ;;  %v2254_v36 = vld [vmem:[%s11994_s9 + $0x10] sm:$0xff]  ;;  %v2255_v37 = vld [vmem:[%s11994_s9 + $0x18] sm:$0xff]  ;;  %v2272_v38 = vld [vmem:[%s11994_s9 + $0xa0] sm:$0xff] }
 0x179   : > { %8962 = vmatpush3.bf16.msra.mxu1 %v8959_v41  ;;  %v1814_v41 = vld [vmem:[%s11992_s5 + $0x18] sm:$0xff] }
 0x17a   : > { %8964 = vmatprep.subr.bf16.mxu1 %v8963_v45  ;;  %v9043_v42 = vpack.c.bf16 %v1814_v41, %v1813_v40  ;;  %v9081_v40 = vpack.c.bf16 %v2255_v37, %v2254_v36 }
 0x17c   : > { %9044 = vmatprep.subr.bf16.mxu0 %v9043_v42 }
 0x17d   : > { %8966 = vmatpush3.bf16.msra.mxu1 %v8963_v45  ;;  %v9031_v45 = vpack.c.bf16 %v6786_v44, %v6785_v43  ;;  %9046 = vmatpush3.bf16.msra.mxu0 %v9043_v42  ;;  %v2256_v42 = vld [vmem:[%s11994_s9 + $0x20] sm:$0xff]  ;;  %v2257_v43 = vld [vmem:[%s11994_s9 + $0x28] sm:$0xff]  ;;  %v2274_v44 = vld [vmem:[%s11994_s9 + $0xb0] sm:$0xff] }
 0x17e   : > { %8968 = vmatprep.subr.bf16.mxu1 %v8967_v48 }
 0x181   : > { %8970 = vmatpush3.bf16.msra.mxu1 %v8967_v48  ;;  %v9047_v48 = vpack.c.bf16 %v1816_v47, %v1815_v46  ;;  %v9085_v46 = vpack.c.bf16 %v2257_v43, %v2256_v42  ;;  %v2284_v43 = vld [vmem:[%s11994_s9 + $0x100] sm:$0xff] }
 0x182   : > { %8972 = vmatprep.subr.bf16.mxu1 %v8971_v51 }
 0x183   : > { %9048 = vmatprep.subr.bf16.mxu0 %v9047_v48 }
 0x184   : > { %9050 = vmatpush3.bf16.msra.mxu0 %v9047_v48  ;;  %v2258_v48 = vld [vmem:[%s11994_s9 + $0x30] sm:$0xff] }
 0x185   : > { %8974 = vmatpush3.bf16.msra.mxu1 %v8971_v51  ;;  %v9035_v51 = vpack.c.bf16 %v6788_v50, %v6787_v49  ;;  %8115 = vmatprep.subr.mxu0 %v1817_v52  ;;  %v2259_v49 = vld [vmem:[%s11994_s9 + $0x38] sm:$0xff]  ;;  %v2276_v50 = vld [vmem:[%s11994_s9 + $0xc0] sm:$0xff] }
 0x186   : > { %8976 = vmatprep.subr.bf16.mxu1 %v8975_v54 }
 0x188   : > { %8116 = vmatpush3.msra.mxu0 %v1817_v52  ;;  %v9089_v52 = vpack.c.bf16 %v2259_v49, %v2258_v48  ;;  %v2302_v48 = vld [vmem:[%s11994_s9 + $0x190] sm:$0xff]  ;;  %v2303_v49 = vld [vmem:[%s11994_s9 + $0x198] sm:$0xff] }
 0x189   : > { %8978 = vmatpush3.bf16.msra.mxu1 %v8975_v54  ;;  %v6794_v54 = vld [vmem:[%s11992_s5 + $0x70] sm:$0xff] }
 0x18a   : > { %8980 = vmatprep.subr.bf16.mxu1 %v8979_v57  ;;  %v9051_v56 = vpack.c.bf16 %v6795_v55, %v6794_v54  ;;  %v2260_v54 = vld [vmem:[%s11994_s9 + $0x40] sm:$0xff]  ;;  %v2261_v55 = vld [vmem:[%s11994_s9 + $0x48] sm:$0xff] }
 0x18c   : > { %8030 = vmatmul.mubr.msk.f32.vlgmr.msra.gmra.mrb[30].mxu1 %vm999_vm2, %v1501_v62  ;;  %9052 = vmatprep.subr.bf16.mxu0 %v9051_v56 }
 0x18d   : > { %8982 = vmatpush3.bf16.msra.mxu1 %v8979_v57  ;;  %8056 = vmatprep.mubr.msk.f32.mxu1 %vm999_vm2, %v1598_v60  ;;  %v6782_v57 = vld [vmem:[%s11993_s2] ss:$0 sm:$0xff] }
 0x18e   : > { %8984 = vmatprep.subr.bf16.mxu1 %v8983_v61 }
 0x191   : > { %8986 = vmatpush3.bf16.msra.mxu1 %v8983_v61 }
 0x192   : > { %8988 = vmatprep.subr.bf16.mxu1 %v8987_v3 }
 0x195   : > { %8990 = vmatpush3.bf16.msra.mxu1 %v8987_v3  ;;  %v6797_v3 = vld [vmem:[%s11992_s5 + $0x88] sm:$0xff] }
 0x196   : > { %8992 = vmatprep.subr.bf16.mxu1 %v8991_v6 }
 0x199   : > { %8994 = vmatpush3.bf16.msra.mxu1 %v8991_v6  ;;  %v9055_v6 = vpack.c.bf16 %v6797_v3, %v6796_v0 }
 0x19a   : > { %8996 = vmatprep.subr.bf16.mxu1 %v8995_v9 }
 0x19d   : > { %8998 = vmatpush3.bf16.msra.mxu1 %v8995_v9 }
 0x19e   : > { %9000 = vmatprep.subr.bf16.mxu1 %v8999_v12 }
 0x1a1   : > { %9002 = vmatpush3.bf16.msra.mxu1 %v8999_v12  ;;  %v9059_v12 = vpack.c.bf16 %v6799_v10, %v6798_v7  ;;  %v2281_v10 = vld [vmem:[%s11994_s9 + $0xe8] sm:$0xff] }
 0x1a2   : > { %9004 = vmatprep.subr.bf16.mxu1 %v9003_v15 }
 0x1a4   : > { %8057 = vmatmul.mubr.msk.f32.vlgmr.msra.gmra.mrb[30].mxu1 %vm999_vm2, %v1599_v20 }
 0x1a5   : > { %9006 = vmatpush3.bf16.msra.mxu1 %v9003_v15  ;;  %8083 = vmatprep.mubr.msk.f32.mxu1 %vm999_vm2, %v1696_v18  ;;  %v6804_v15 = vld [vmem:[%s11992_s5 + $0xb0] sm:$0xff] }
 0x1a6   : > { %9008 = vmatprep.subr.bf16.mxu1 %v9007_v19  ;;  %v9063_v18 = vpack.c.bf16 %v6804_v15, %v6803_v14  ;;  %v2264_v15 = vld [vmem:[%s11994_s9 + $0x60] sm:$0xff] }
 0x1a9   : > { %9010 = vmatpush3.bf16.msra.mxu1 %v9007_v19  ;;  %v9067_v19 = vpack.c.bf16 %v6806_v17, %v6805_v16  ;;  %v2265_v16 = vld [vmem:[%s11994_s9 + $0x68] sm:$0xff] }
 0x1aa   : > { %9012 = vmatprep.subr.bf16.mxu1 %v9011_v23  ;;  %v9101_v17 = vpack.c.bf16 %v2265_v16, %v2264_v15  ;;  %v2294_v16 = vld [vmem:[%s11994_s9 + $0x150] sm:$0xff] }
 0x1ad   : > { %9014 = vmatpush3.bf16.msra.mxu1 %v9011_v23 }
 0x1ae   : > { %9016 = vmatprep.subr.bf16.mxu1 %v9015_v26 }
 0x1b1   : > { %9018 = vmatpush3.bf16.msra.mxu1 %v9015_v26 }
 0x1b2   : > { %9020 = vmatprep.subr.bf16.mxu1 %v9019_v29 }
 0x1b5   : > { %9022 = vmatpush3.bf16.msra.mxu1 %v9019_v29  ;;  %v2252_v29 = vld [vmem:[%s11994_s9] sm:$0xff] }
 0x1b6   : > { %9024 = vmatprep.subr.bf16.mxu1 %v9023_v32  ;;  %v9077_v34 = vpack.c.bf16 %v2253_v31, %v2252_v29 }
 0x1b9   : > { %9026 = vmatpush3.bf16.msra.mxu1 %v9023_v32  ;;  %v2270_v32 = vld [vmem:[%s11994_s9 + $0x90] sm:$0xff] }
 0x1ba   : > { %9028 = vmatprep.subr.bf16.mxu1 %v9027_v39 }
 0x1bc   : > { %8084 = vmatmul.mubr.msk.f32.vlgmr.msra.gmra.mrb[30].mxu1 %vm999_vm2, %v1697_v33  ;;  %v2271_v33 = vld [vmem:[%s11994_s9 + $0x98] sm:$0xff] }
 0x1bd   : > { %9030 = vmatpush3.bf16.msra.mxu1 %v9027_v39  ;;  %v9079_v35 = vpack.c.bf16 %v2271_v33, %v2270_v32  ;;  %v2273_v39 = vld [vmem:[%s11994_s9 + $0xa8] sm:$0xff] }
 0x1be   : > { %9032 = vmatprep.subr.bf16.mxu1 %v9031_v45  ;;  %v9083_v41 = vpack.c.bf16 %v2273_v39, %v2272_v38 }
 0x1c1   : > { %9034 = vmatpush3.bf16.msra.mxu1 %v9031_v45  ;;  %v2275_v45 = vld [vmem:[%s11994_s9 + $0xb8] sm:$0xff] }
 0x1c2   : > { %9036 = vmatprep.subr.bf16.mxu1 %v9035_v51  ;;  %v9087_v47 = vpack.c.bf16 %v2275_v45, %v2274_v44  ;;  %v2285_v44 = vld [vmem:[%s11994_s9 + $0x108] sm:$0xff] }
 0x1c5   : > { %9038 = vmatpush3.bf16.msra.mxu1 %v9035_v51  ;;  %v2277_v51 = vld [vmem:[%s11994_s9 + $0xc8] sm:$0xff] }
 0x1c6   : > { %8098 = vmatprep.subr.mxu1 %v6789_v53 }
 0x1c9   : > { %8099 = vmatpush3.msra.mxu1 %v6789_v53  ;;  %v9091_v53 = vpack.c.bf16 %v2277_v51, %v2276_v50  ;;  %v9109_v50 = vpack.c.bf16 %v2285_v44, %v2284_v43  ;;  %v9111_v51 = vpack.c.bf16 %v2303_v49, %v2302_v48  ;;  %v2336_v43 = vld [vmem:[%s11994_s9 + $0x2a0] sm:$0xff]  ;;  %v2337_v44 = vld [vmem:[%s11994_s9 + $0x2a8] sm:$0xff] }
 0x1ca   : > { %v2320_v48 = vld [vmem:[%s11994_s9 + $0x220] sm:$0xff]  ;;  %v2321_v49 = vld [vmem:[%s11994_s9 + $0x228] sm:$0xff] }
 0x28f   : > { %v8085_v58 = vpop.f32.mrb[30].mxu1 }
 0x290   : > { %v1802_v59 = vadd.f32 %v8085_v58, %v6782_v57  ;;  %v1783_v60 = vpop.f32.mrb[31].mxu1  ;;  %v9093_v58 = vpack.c.bf16 %v2261_v55, %v2260_v54  ;;  %v2304_v55 = vld [vmem:[%s11994_s9 + $0x1a0] sm:$0xff] }
 0x291   : > { %v1801_v61 = vadd.f32 %v6782_v57, %v1783_v60  ;;  %v2279_v57 = vld [vmem:[%s11994_s9 + $0xd8] sm:$0xff] }
 0x292   : > { %v1804_v62 = vmax.f32 %v1802_v59, 0.0 }
 0x293   : > { %v1803_v63 = vmax.f32 %v1801_v61, 0.0 }
 0x294   : > { %1808 = vst.msk [vmem:[#allocation3 + $0x8] sm:$0x7f] %vm1807_vm3, %v1804_v62  ;;  %vm4395_vm3 = vcmask 121856  }
 0x295   : > { %1806 = vst.msk [vmem:[#allocation3] sm:$0xff] %vm1805_vm4, %v1803_v63  ;;  %v6812_v63 = vld [vmem:[%s11995_s0] ss:$0 sm:$0xff] }
 0x29b   : > { %v1819_v8 = vld [vmem:[#allocation3 + $0x9] sm:$0xf] }
 0x29c   : > { %v1818_v4 = vld [vmem:[#allocation3 + $0x1] sm:$0xff]  ;;  %v1991_v20 = vld [vmem:[#allocation3 + $0xa] sm:$0xf] }
 0x29d   : > { %v1809_v5 = vld [vmem:[#allocation3] sm:$0xff]  ;;  %8100 = vmatprep.mubr.msk.f32.mxu1 %vm1805_vm4, %v1818_v4  ;;  %v1810_v9 = vld [vmem:[#allocation3 + $0x8] sm:$0xf]  ;;  %v2262_v4 = vld [vmem:[%s11994_s9 + $0x50] sm:$0xff] }
 0x29e   : > { %8117 = vmatprep.mubr.msk.f32.mxu0 %vm1805_vm4, %v1809_v5  ;;  %8101 = vmatmul.mubr.msk.f32.vlgmr.msra.gmra.mrb[32].mxu1 %vm1805_vm4, %v1819_v8  ;;  %v1990_v11 = vld [vmem:[#allocation3 + $0x2] sm:$0xff]  ;;  %v2084_v26 = vld [vmem:[#allocation3 + $0xb] sm:$0xf] }
 0x29f   : > { %8118 = vmatmul.mubr.msk.f32.vlgmr.msra.gmra.mrb[0].mxu0 %vm1805_vm4, %v1810_v9  ;;  %2695 = vmatprep.mubr.f32.mxu1 %v9824_v2  ;;  %v2083_v23 = vld [vmem:[#allocation3 + $0x3] sm:$0xff] }
 0x2a0   : > { %9054 = vmatpush3.bf16.msra.mxu0 %v9051_v56  ;;  %8134 = vmatprep.mubr.msk.f32.mxu0 %vm1805_vm4, %v1990_v11  ;;  %v2278_v56 = vld [vmem:[%s11994_s9 + $0xd0] sm:$0xff]  ;;  %v2263_v5 = vld [vmem:[%s11994_s9 + $0x58] sm:$0xff]  ;;  %v2280_v9 = vld [vmem:[%s11994_s9 + $0xe0] sm:$0xff] }
 0x2a1   : > { %9056 = vmatprep.subr.bf16.mxu0 %v9055_v6  ;;  %v9095_v59 = vpack.c.bf16 %v2279_v57, %v2278_v56  ;;  %v9097_v7 = vpack.c.bf16 %v2263_v5, %v2262_v4  ;;  %v2305_v56 = vld [vmem:[%s11994_s9 + $0x1a8] sm:$0xff]  ;;  %v2290_v4 = vld [vmem:[%s11994_s9 + $0x130] sm:$0xff]  ;;  %v2291_v5 = vld [vmem:[%s11994_s9 + $0x138] sm:$0xff] }
 0x2a4   : > { %9058 = vmatpush3.bf16.msra.mxu0 %v9055_v6 }
 0x2a5   : > { %9060 = vmatprep.subr.bf16.mxu0 %v9059_v12 }
 0x2a8   : > { %9062 = vmatpush3.bf16.msra.mxu0 %v9059_v12  ;;  %v9099_v12 = vpack.c.bf16 %v2281_v10, %v2280_v9  ;;  %v2292_v10 = vld [vmem:[%s11994_s9 + $0x140] sm:$0xff] }
 0x2a9   : > { %8132 = vmatprep.subr.mxu0 %v6800_v13 }
 0x2ac   : > { %8133 = vmatpush3.msra.mxu0 %v6800_v13 }
 0x2ad   : > { %8135 = vmatmul.mubr.msk.f32.vlgmr.msra.gmra.mrb[0].mxu0 %vm1805_vm4, %v1991_v20  ;;  %9064 = vmatprep.subr.bf16.mxu0 %v9063_v18 }
 0x2ae   : > { %9066 = vmatpush3.bf16.msra.mxu0 %v9063_v18  ;;  %8151 = vmatprep.mubr.msk.f32.mxu0 %vm1805_vm4, %v2083_v23  ;;  %v2282_v18 = vld [vmem:[%s11994_s9 + $0xf0] sm:$0xff]  ;;  %v2300_v23 = vld [vmem:[%s11994_s9 + $0x180] sm:$0xff] }
 0x2af   : > { %9068 = vmatprep.subr.bf16.mxu0 %v9067_v19 }
 0x2b2   : > { %9070 = vmatpush3.bf16.msra.mxu0 %v9067_v19  ;;  %v2283_v19 = vld [vmem:[%s11994_s9 + $0xf8] sm:$0xff] }
 0x2b3   : > { %9072 = vmatprep.subr.bf16.mxu0 %v9071_v24  ;;  %v9103_v20 = vpack.c.bf16 %v2283_v19, %v2282_v18  ;;  %v2312_v18 = vld [vmem:[%s11994_s9 + $0x1e0] sm:$0xff]  ;;  %v2313_v19 = vld [vmem:[%s11994_s9 + $0x1e8] sm:$0xff] }
 0x2b6   : > { %9074 = vmatpush3.bf16.msra.mxu0 %v9071_v24  ;;  %v9105_v24 = vpack.c.bf16 %v2267_v22, %v2266_v21  ;;  %v9131_v21 = vpack.c.bf16 %v2313_v19, %v2312_v18  ;;  %v2296_v22 = vld [vmem:[%s11994_s9 + $0x160] sm:$0xff] }
 0x2b7   : > { %8149 = vmatprep.subr.mxu0 %v6809_v25 }
 0x2ba   : > { %8150 = vmatpush3.msra.mxu0 %v6809_v25  ;;  %v2301_v25 = vld [vmem:[%s11994_s9 + $0x188] sm:$0xff] }
 0x2bb   : > { %8152 = vmatmul.mubr.msk.f32.vlgmr.msra.gmra.mrb[0].mxu0 %vm1805_vm4, %v2084_v26  ;;  %9076 = vmatprep.subr.bf16.mxu0 %v9075_v30  ;;  %v9107_v26 = vpack.c.bf16 %v2301_v25, %v2300_v23  ;;  %v2297_v23 = vld [vmem:[%s11994_s9 + $0x168] sm:$0xff]  ;;  %v2315_v25 = vld [vmem:[%s11994_s9 + $0x1f8] sm:$0xff] }
 0x2bc   : > { %9078 = vmatpush3.bf16.msra.mxu0 %v9077_v34 }
 0x2bd   : > { %9080 = vmatprep.subr.bf16.mxu0 %v9079_v35 }
 0x2c0   : > { %9082 = vmatpush3.bf16.msra.mxu0 %v9081_v40 }
 0x2c1   : > { %9084 = vmatprep.subr.bf16.mxu0 %v9083_v41 }
 0x2c4   : > { %9086 = vmatpush3.bf16.msra.mxu0 %v9085_v46 }
 0x2c5   : > { %9088 = vmatprep.subr.bf16.mxu0 %v9087_v47 }
 0x2c8   : > { %9090 = vmatpush3.bf16.msra.mxu0 %v9089_v52  ;;  %v2286_v52 = vld [vmem:[%s11994_s9 + $0x110] sm:$0xff] }
 0x2c9   : > { %9092 = vmatprep.subr.bf16.mxu0 %v9091_v53  ;;  %v2287_v53 = vld [vmem:[%s11994_s9 + $0x118] sm:$0xff] }
 0x2cc   : > { %9094 = vmatpush3.bf16.msra.mxu0 %v9093_v58  ;;  %v9113_v58 = vpack.c.bf16 %v2287_v53, %v2286_v52  ;;  %v9149_v52 = vpack.c.bf16 %v2321_v49, %v2320_v48 }
 0x2cd   : > { %9096 = vmatprep.subr.bf16.mxu0 %v9095_v59  ;;  %v9115_v59 = vpack.c.bf16 %v2305_v56, %v2304_v55  ;;  %v2323_v55 = vld [vmem:[%s11994_s9 + $0x238] sm:$0xff]  ;;  %v2340_v56 = vld [vmem:[%s11994_s9 + $0x2c0] sm:$0xff] }
 0x2d0   : > { %9098 = vmatpush3.bf16.msra.mxu0 %v9097_v7  ;;  %v2309_v7 = vld [vmem:[%s11994_s9 + $0x1c8] sm:$0xff] }
 0x2d1   : > { %9100 = vmatprep.subr.bf16.mxu0 %v9099_v12  ;;  %v2310_v12 = vld [vmem:[%s11994_s9 + $0x1d0] sm:$0xff] }
 0x2d4   : > { %9102 = vmatpush3.bf16.msra.mxu0 %v9101_v17  ;;  %v2295_v17 = vld [vmem:[%s11994_s9 + $0x158] sm:$0xff] }
 0x2d5   : > { %9104 = vmatprep.subr.bf16.mxu0 %v9103_v20  ;;  %v9129_v20 = vpack.c.bf16 %v2295_v17, %v2294_v16  ;;  %v2330_v16 = vld [vmem:[%s11994_s9 + $0x270] sm:$0xff]  ;;  %v2331_v17 = vld [vmem:[%s11994_s9 + $0x278] sm:$0xff] }
 0x2d6   : > { %v9169_v18 = vpack.c.bf16 %v2331_v17, %v2330_v16  ;;  %v2595_v17 = vld [vmem:[%s11955_s10] sm:$0x3f] }
 0x2d8   : > { %9106 = vmatpush3.bf16.msra.mxu0 %v9105_v24  ;;  %v2314_v24 = vld [vmem:[%s11994_s9 + $0x1f0] sm:$0xff] }
 0x2d9   : > { %9108 = vmatprep.subr.bf16.mxu0 %v9107_v26  ;;  %v9133_v26 = vpack.c.bf16 %v2297_v23, %v2296_v22  ;;  %v2571_v22 = vld [vmem:[%s11996_s27] sm:$0xff] }
 0x371   : > { %v8102_v60 = vpop.f32.mrb[32].mxu1 }
 0x372   : > { %v1900_v61 = vpop.f32.mrb[33].mxu1 }
 0x38e   : > { %v8153_v62 = vpop.f32.mrb[0].mxu0 }
 0x38f   : > { %v9629_v0 = vadd.f32 %v8153_v62, %v8102_v60  ;;  %v2165_v3 = vpop.f32.mrb[1].mxu0  ;;  %v2288_v60 = vld [vmem:[%s11994_s9 + $0x120] sm:$0xff]  ;;  %v2306_v62 = vld [vmem:[%s11994_s9 + $0x1b0] sm:$0xff] }
 0x390   : > { %v9630_v6 = vadd.f32 %v2165_v3, %v1900_v61  ;;  %v2289_v61 = vld [vmem:[%s11994_s9 + $0x128] sm:$0xff] }
 0x391   : > { %v2184_v8 = vadd.f32 %v9629_v0, %v6812_v63  ;;  %v9117_v0 = vpack.c.bf16 %v2289_v61, %v2288_v60  ;;  %v2324_v60 = vld [vmem:[%s11994_s9 + $0x240] sm:$0xff]  ;;  %v2325_v61 = vld [vmem:[%s11994_s9 + $0x248] sm:$0xff] }
 0x392   : > { %v2183_v11 = vadd.f32 %v9630_v6, %v6812_v63  ;;  %v2307_v63 = vld [vmem:[%s11994_s9 + $0x1b8] sm:$0xff]  ;;  %v2308_v6 = vld [vmem:[%s11994_s9 + $0x1c0] sm:$0xff] }
 0x393   : > { %v2186_v13 = vmax.f32 %v2184_v8, 0.0  ;;  %v9119_v3 = vpack.c.bf16 %v2307_v63, %v2306_v62  ;;  %v9121_v8 = vpack.c.bf16 %v2291_v5, %v2290_v4  ;;  %v9123_v9 = vpack.c.bf16 %v2309_v7, %v2308_v6  ;;  %v2342_v62 = vld [vmem:[%s11994_s9 + $0x2d0] sm:$0xff]  ;;  %v2343_v63 = vld [vmem:[%s11994_s9 + $0x2d8] sm:$0xff]  ;;  %v2344_v6 = vld [vmem:[%s11994_s9 + $0x2e0] sm:$0xff] }
 0x394   : > { %v2185_v14 = vmax.f32 %v2183_v11, 0.0  ;;  %v2293_v11 = vld [vmem:[%s11994_s9 + $0x148] sm:$0xff]  ;;  %v2326_v4 = vld [vmem:[%s11994_s9 + $0x250] sm:$0xff]  ;;  %v2327_v5 = vld [vmem:[%s11994_s9 + $0x258] sm:$0xff] }
 0x395   : > { %2189 = vst.msk [vmem:[#allocation4 + $0x8] sm:$0xf] %vm2188_vm5, %v2186_v13  ;;  %v2311_v13 = vld [vmem:[%s11994_s9 + $0x1d8] sm:$0xff]  ;;  %v2345_v7 = vld [vmem:[%s11994_s9 + $0x2e8] sm:$0xff] }
 0x396   : > { %2187 = vst.msk [vmem:[#allocation4] sm:$0xff] %vm813_vm1, %v2185_v14  ;;  %v9125_v14 = vpack.c.bf16 %v2293_v11, %v2292_v10  ;;  %v9127_v15 = vpack.c.bf16 %v2311_v13, %v2310_v12  ;;  %v2328_v10 = vld [vmem:[%s11994_s9 + $0x260] sm:$0xff]  ;;  %v2329_v11 = vld [vmem:[%s11994_s9 + $0x268] sm:$0xff]  ;;  %v2346_v12 = vld [vmem:[%s11994_s9 + $0x2f0] sm:$0xff] }
 0x397   : > { %v2347_v13 = vld [vmem:[%s11994_s9 + $0x2f8] sm:$0xff] }
 0x39c   : > { %v2230_v27 = vld [vmem:[#allocation4 + $0x8] sm:$0x1]  ;;  %v2238_v34 = vld [vmem:[#allocation4 + $0xa] sm:$0x1]  ;;  %v2232_v37 = vld [vmem:[#allocation4 + $0x9] sm:$0x1] }
 0x39d   : > { %v2224_v28 = vld [vmem:[#allocation4 + $0x7] sm:$0x1]  ;;  %v2208_v29 = vld [vmem:[#allocation4 + $0x3] sm:$0x1]  ;;  %2231 = vst.msk [vmem:[#allocation5 + $0x20] sm:$0x1] %vm2197_vm6, %v2230_v27  ;;  %v9135_v27 = vpack.c.bf16 %v2315_v25, %v2314_v24 }
 0x39e   : > { %2226 = vrot.lane.b32.xlu1 %v2224_v28, %s9825_s7  ;;  %2210 = vrot.lane.b32.xlu0 %v2208_v29, %s9825_s7  ;;  %v2222_v30 = vld [vmem:[#allocation4 + $0x6] sm:$0x1]  ;;  %v2206_v31 = vld [vmem:[#allocation4 + $0x2] sm:$0x1]  ;;  %v2214_v32 = vld [vmem:[#allocation4 + $0x4] sm:$0x1] }
 0x39f   : > { %2223 = vst.msk [vmem:[#allocation5 + $0x18] sm:$0x1] %vm2197_vm6, %v2222_v30  ;;  %2207 = vst.msk [vmem:[#allocation5 + $0x8] sm:$0x1] %vm2197_vm6, %v2206_v31  ;;  %v2196_v33 = vld [vmem:[#allocation4] sm:$0x1] }
 0x3a0   : > { %2215 = vst.msk [vmem:[#allocation5 + $0x10] sm:$0x1] %vm2197_vm6, %v2214_v32  ;;  %2198 = vst.msk [vmem:[#allocation5] sm:$0x1] %vm2197_vm6, %v2196_v33  ;;  %v2216_v35 = vld [vmem:[#allocation4 + $0x5] sm:$0x1] }
 0x3a1   : > { %2239 = vst.msk [vmem:[#allocation5 + $0x28] sm:$0x1] %vm2197_vm6, %v2238_v34  ;;  %v2199_v36 = vld [vmem:[#allocation4 + $0x1] sm:$0x1]  ;;  %v2240_v38 = vld [vmem:[#allocation4 + $0xb] sm:$0x1] }
 0x3a2   : > { %2218 = vrot.lane.b32.xlu1 %v2216_v35, %s9825_s7  ;;  %2201 = vrot.lane.b32.xlu0 %v2199_v36, %s9825_s7  ;;  %v2298_v28 = vld [vmem:[%s11994_s9 + $0x170] sm:$0xff]  ;;  %v2299_v29 = vld [vmem:[%s11994_s9 + $0x178] sm:$0xff]  ;;  %vm6555_vm6 = vcmask 162816  }
 0x3a3   : > { %v2332_v30 = vld [vmem:[%s11994_s9 + $0x280] sm:$0xff]  ;;  %v2333_v31 = vld [vmem:[%s11994_s9 + $0x288] sm:$0xff]  ;;  %v9137_v32 = vpack.c.bf16 %v2299_v29, %v2298_v28  ;;  %v2334_v36 = vld [vmem:[%s11994_s9 + $0x290] sm:$0xff] }
 0x3a4   : > { %v9139_v33 = vpack.c.bf16 %v2333_v31, %v2332_v30  ;;  %v2316_v34 = vld [vmem:[%s11994_s9 + $0x200] sm:$0xff]  ;;  %v2317_v35 = vld [vmem:[%s11994_s9 + $0x208] sm:$0xff]  ;;  %v2577_v24 = vld [vmem:[%s11996_s27 + $0x30] sm:$0xff] }
 0x3a5   : > { %v2584_v25 = vld [vmem:[%s11996_s27 + $0x68] sm:$0xff]  ;;  %v2583_v29 = vld [vmem:[%s11996_s27 + $0x60] sm:$0xff]  ;;  %v2589_v30 = vld [vmem:[%s11996_s27 + $0x90] sm:$0xff] }
 0x3a6   : > { %2234 = vrot.lane.b32.xlu1 %v2232_v37, %s9825_s7  ;;  %2242 = vrot.lane.b32.xlu0 %v2240_v38, %s9825_s7  ;;  %v2335_v37 = vld [vmem:[%s11994_s9 + $0x298] sm:$0xff]  ;;  %v9141_v38 = vpack.c.bf16 %v2317_v35, %v2316_v34 }
 0x3a7   : > { %v2574_v31 = vld [vmem:[%s11996_s27 + $0x18] sm:$0xff] }
 0x410   : > { %v2227_v39 = vpop.permute.xlu1 %2226  ;;  %v2211_v40 = vpop.permute.xlu0 %2210 }
 0x411   : > { %2229 = vst.msk [vmem:[#allocation5 + $0x18] sm:$0x1] %vm2204_vm7, %v2227_v39  ;;  %2213 = vst.msk [vmem:[#allocation5 + $0x8] sm:$0x1] %vm2204_vm7, %v2211_v40  ;;  %v9143_v39 = vpack.c.bf16 %v2335_v37, %v2334_v36  ;;  %v2318_v40 = vld [vmem:[%s11994_s9 + $0x210] sm:$0xff] }
 0x414   : > { %v2219_v41 = vpop.permute.xlu1 %2218  ;;  %v2202_v42 = vpop.permute.xlu0 %2201 }
 0x415   : > { %2221 = vst.msk [vmem:[#allocation5 + $0x10] sm:$0x1] %vm2204_vm7, %v2219_v41  ;;  %2205 = vst.msk [vmem:[#allocation5] sm:$0x1] %vm2204_vm7, %v2202_v42  ;;  %v2319_v41 = vld [vmem:[%s11994_s9 + $0x218] sm:$0xff] }
 0x418   : > { %v2235_v45 = vpop.permute.xlu1 %2234  ;;  %v2243_v46 = vpop.permute.xlu0 %2242  ;;  %v2247_v47 = vld [vmem:[#allocation5 + $0x8] sm:$0xff]  ;;  %v2249_v57 = vld [vmem:[#allocation5 + $0x18] sm:$0xff] }
 0x419   : > { %2237 = vst.msk [vmem:[#allocation5 + $0x20] sm:$0x1] %vm2204_vm7, %v2235_v45  ;;  %2245 = vst.msk [vmem:[#allocation5 + $0x28] sm:$0x1] %vm2204_vm7, %v2243_v46  ;;  %2419 = vmatprep.mubr.f32.mxu0 %v2247_v47  ;;  %v9145_v46 = vpack.c.bf16 %v2319_v41, %v2318_v40  ;;  %v9147_v47 = vpack.c.bf16 %v2337_v44, %v2336_v43  ;;  %vm6567_vm7 = vcmask 0  }
 0x41c   : > { %v2246_v54 = vld [vmem:[#allocation5] sm:$0xff]  ;;  %v2248_v42 = vld [vmem:[#allocation5 + $0x10] sm:$0xff] }
 0x41d   : > { %2420 = vmatmul.mubr.f32.vlgmr.msra.gmra.mrb[2].mxu0 %v2246_v54  ;;  %v2322_v54 = vld [vmem:[%s11994_s9 + $0x230] sm:$0xff] }
 0x41e   : > { %9110 = vmatpush3.bf16.msra.mxu0 %v9109_v50  ;;  %2489 = vmatprep.mubr.f32.mxu0 %v2249_v57  ;;  %v2338_v50 = vld [vmem:[%s11994_s9 + $0x2b0] sm:$0xff]  ;;  %v2341_v57 = vld [vmem:[%s11994_s9 + $0x2c8] sm:$0xff] }
 0x41f   : > { %9112 = vmatprep.subr.bf16.mxu0 %v9111_v51  ;;  %v2339_v51 = vld [vmem:[%s11994_s9 + $0x2b8] sm:$0xff] }
 0x420   : > { %v2251_v45 = vld [vmem:[#allocation5 + $0x28] sm:$0xff]  ;;  %v9151_v53 = vpack.c.bf16 %v2339_v51, %v2338_v50  ;;  %v2250_v19 = vld [vmem:[#allocation5 + $0x20] sm:$0xff]  ;;  %v2573_v51 = vld [vmem:[%s11996_s27 + $0x10] sm:$0xff] }
 0x422   : > { %9114 = vmatpush3.bf16.msra.mxu0 %v9113_v58  ;;  %v9153_v58 = vpack.c.bf16 %v2323_v55, %v2322_v54  ;;  %v2592_v54 = vld [vmem:[%s11996_s27 + $0xa8] sm:$0xff] }
 0x423   : > { %9116 = vmatprep.subr.bf16.mxu0 %v9115_v59  ;;  %v9155_v59 = vpack.c.bf16 %v2341_v57, %v2340_v56  ;;  %v2585_v57 = vld [vmem:[%s11996_s27 + $0x70] sm:$0xff] }
 0x426   : > { %9118 = vmatpush3.bf16.msra.mxu0 %v9117_v0  ;;  %v9157_v0 = vpack.c.bf16 %v2325_v61, %v2324_v60  ;;  %v2576_v60 = vld [vmem:[%s11996_s27 + $0x28] sm:$0xff]  ;;  %v2582_v61 = vld [vmem:[%s11996_s27 + $0x58] sm:$0xff] }
 0x427   : > { %9120 = vmatprep.subr.bf16.mxu0 %v9119_v3  ;;  %v9159_v3 = vpack.c.bf16 %v2343_v63, %v2342_v62  ;;  %v9187_v63 = vpack.c.bf16 %v2582_v61, %v2576_v60 }
 0x42a   : > { %9122 = vmatpush3.bf16.msra.mxu0 %v9121_v8  ;;  %v9161_v8 = vpack.c.bf16 %v2327_v5, %v2326_v4  ;;  %v2588_v4 = vld [vmem:[%s11996_s27 + $0x88] sm:$0xff]  ;;  %v2594_v5 = vld [vmem:[%s11996_s27 + $0xb8] sm:$0xff] }
 0x42b   : > { %9124 = vmatprep.subr.bf16.mxu0 %v9123_v9  ;;  %v9163_v9 = vpack.c.bf16 %v2345_v7, %v2344_v6  ;;  %v9191_v7 = vpack.c.bf16 %v2594_v5, %v2588_v4  ;;  %v6830_v4 = vld [vmem:[%s11956_s11 + $0xd0] sm:$0xff]  ;;  %v6831_v5 = vld [vmem:[%s11956_s11 + $0xd8] sm:$0xff] }
 0x42e   : > { %9126 = vmatpush3.bf16.msra.mxu0 %v9125_v14  ;;  %v9165_v14 = vpack.c.bf16 %v2329_v11, %v2328_v10  ;;  %v6818_v11 = vld [vmem:[%s11956_s11 + $0x70] sm:$0xff] }
 0x42f   : > { %9128 = vmatprep.subr.bf16.mxu0 %v9127_v15  ;;  %v9167_v15 = vpack.c.bf16 %v2347_v13, %v2346_v12  ;;  %v6819_v12 = vld [vmem:[%s11956_s11 + $0x78] sm:$0xff] }
 0x430   : > { %v9195_v13 = vpack.c.bf16 %v6819_v12, %v6818_v11 }
 0x432   : > { %9130 = vmatpush3.bf16.msra.mxu0 %v9129_v20  ;;  %v2572_v20 = vld [vmem:[%s11996_s27 + $0x8] sm:$0xff] }
 0x433   : > { %9132 = vmatprep.subr.bf16.mxu0 %v9131_v21  ;;  %v2578_v21 = vld [vmem:[%s11996_s27 + $0x38] sm:$0xff] }
 0x434   : > { %v9171_v23 = vpack.c.bf16 %v2578_v21, %v2572_v20 }
 0x436   : > { %9134 = vmatpush3.bf16.msra.mxu0 %v9133_v26  ;;  %v2590_v26 = vld [vmem:[%s11996_s27 + $0x98] sm:$0xff]  ;;  %9172 = vmatprep.subr.bf16.mxu1 %v9171_v23  ;;  %v6821_v23 = vld [vmem:[%s11956_s11 + $0x88] sm:$0xff] }
 0x437   : > { %9136 = vmatprep.subr.bf16.mxu0 %v9135_v27  ;;  %v9173_v27 = vpack.c.bf16 %v2577_v24, %v2571_v22  ;;  %v9175_v28 = vpack.c.bf16 %v2590_v26, %v2584_v25  ;;  %v6820_v22 = vld [vmem:[%s11956_s11 + $0x80] sm:$0xff] }
 0x439   : > { %9174 = vmatpush1.bf16.msra.mxu1 %v9173_v27  ;;  %v9199_v27 = vpack.c.bf16 %v6821_v23, %v6820_v22 }
 0x43a   : > { %9138 = vmatpush3.bf16.msra.mxu0 %v9137_v32  ;;  %v2580_v32 = vld [vmem:[%s11996_s27 + $0x48] sm:$0xff]  ;;  %9176 = vmatprep.subr.bf16.mxu1 %v9175_v28 }
 0x43b   : > { %9140 = vmatprep.subr.bf16.mxu0 %v9139_v33  ;;  %v9177_v33 = vpack.c.bf16 %v2589_v30, %v2583_v29  ;;  %v9179_v34 = vpack.c.bf16 %v2580_v32, %v2574_v31  ;;  %v6822_v32 = vld [vmem:[%s11956_s11 + $0x90] sm:$0xff] }
 0x43d   : > { %2490 = vmatmul.mubr.f32.vlgmr.msra.gmra.mrb[4].mxu0 %v2248_v42  ;;  %9178 = vmatpush1.bf16.msra.mxu1 %v9177_v33  ;;  %v6823_v33 = vld [vmem:[%s11956_s11 + $0x98] sm:$0xff] }
 0x43e   : > { %9142 = vmatpush3.bf16.msra.mxu0 %v9141_v38  ;;  %2559 = vmatprep.mubr.f32.mxu0 %v2251_v45  ;;  %v6813_v38 = vld [vmem:[%s11997_s4] ss:$0 sm:$0xff]  ;;  %s11999_s4 = sshll.u32 %s12001_s30, 6 }
 0x43f   : > { %9144 = vmatprep.subr.bf16.mxu0 %v9143_v39  ;;  %9180 = vmatprep.subr.bf16.mxu1 %v9179_v34 }
 0x442   : > { %9146 = vmatpush3.bf16.msra.mxu0 %v9145_v46 }
 0x443   : > { %9148 = vmatprep.subr.bf16.mxu0 %v9147_v47 }
 0x446   : > { %9150 = vmatpush3.bf16.msra.mxu0 %v9149_v52  ;;  %v2579_v52 = vld [vmem:[%s11996_s27 + $0x40] sm:$0xff] }
 0x447   : > { %9152 = vmatprep.subr.bf16.mxu0 %v9151_v53  ;;  %v2586_v53 = vld [vmem:[%s11996_s27 + $0x78] sm:$0xff]  ;;  %v9181_v55 = vpack.c.bf16 %v2579_v52, %v2573_v51 }
 0x448   : > { %v9183_v56 = vpack.c.bf16 %v2592_v54, %v2586_v53 }
 0x44a   : > { %9154 = vmatpush3.bf16.msra.mxu0 %v9153_v58  ;;  %v2591_v58 = vld [vmem:[%s11996_s27 + $0xa0] sm:$0xff] }
 0x44b   : > { %9156 = vmatprep.subr.bf16.mxu0 %v9155_v59  ;;  %v9185_v62 = vpack.c.bf16 %v2591_v58, %v2585_v57  ;;  %v6829_v57 = vld [vmem:[%s11956_s11 + $0xc8] sm:$0xff] }
 0x44e   : > { %9158 = vmatpush3.bf16.msra.mxu0 %v9157_v0  ;;  %v2575_v0 = vld [vmem:[%s11996_s27 + $0x20] sm:$0xff] }
 0x44f   : > { %9160 = vmatprep.subr.bf16.mxu0 %v9159_v3  ;;  %v2581_v3 = vld [vmem:[%s11996_s27 + $0x50] sm:$0xff] }
 0x450   : > { %v9189_v6 = vpack.c.bf16 %v2581_v3, %v2575_v0 }
 0x452   : > { %9162 = vmatpush3.bf16.msra.mxu0 %v9161_v8  ;;  %v2587_v8 = vld [vmem:[%s11996_s27 + $0x80] sm:$0xff] }
 0x453   : > { %9164 = vmatprep.subr.bf16.mxu0 %v9163_v9  ;;  %v2593_v9 = vld [vmem:[%s11996_s27 + $0xb0] sm:$0xff] }
 0x454   : > { %v9193_v10 = vpack.c.bf16 %v2593_v9, %v2587_v8  ;;  %v2936_v8 = vld [vmem:[%s11956_s11 + $0x8] sm:$0xff] }
 0x456   : > { %9166 = vmatpush3.bf16.msra.mxu0 %v9165_v14  ;;  %v2597_v14 = vlaneseq }
 0x457   : > { %9168 = vmatprep.subr.bf16.mxu0 %v9167_v15 }
 0x458   : > { %v2598_v15 = vshrl.u32 %v2597_v14, 7 }
 0x45a   : > { %9170 = vmatpush3.bf16.msra.mxu0 %v9169_v18  ;;  %v10895_v16 = vsub.s32 0, %v2598_v15  ;;  %v2603_v18 = vsub.s32 1, %v2598_v15  ;;  %v2607_v26 = vsub.s32 2, %v2598_v15  ;;  %v2611_v29 = vsub.s32 3, %v2598_v15 }
 0x45b   : > { %9196 = vmatprep.subr.bf16.mxu0 %v9195_v13 }
 0x45c   : > { %v2604_v20 = vrot.slane %v2595_v17, %v2603_v18  ;;  %v2608_v34 = vrot.slane %v2595_v17, %v2607_v26 }
 0x45d   : > { %2560 = vmatmul.mubr.f32.vlgmr.msra.gmra.mrb[6].mxu0 %v2250_v19  ;;  %v2600_v19 = vrot.slane %v2595_v17, %v10895_v16 }
 0x45e   : > { %9198 = vmatpush3.bf16.msra.mxu0 %v9195_v13 }
 0x45f   : > { %9200 = vmatprep.subr.bf16.mxu0 %v9199_v27 }
 0x462   : > { %9202 = vmatpush3.bf16.msra.mxu0 %v9199_v27  ;;  %v2937_v27 = vld [vmem:[%s11956_s11 + $0x10] sm:$0xff] }
 0x4f0   : > { %v7370_v35 = vpop.f32.mrb[2].mxu0 }
 0x4f1   : > { %v7371_v36 = vpop.f32.mrb[3].mxu0 }
 0x4f2   : > { %v7372_v37 = vadd.f32 %v7371_v36, %v7370_v35  ;;  %v9203_v35 = vpack.c.bf16 %v6823_v33, %v6822_v32  ;;  %v2612_v36 = vrot.slane %v2595_v17, %v2611_v29  ;;  %v2940_v32 = vld [vmem:[%s11956_s11 + $0x28] sm:$0xff] }
 0x4f4   : > { %v2422_v41 = vadd.f32 %v7372_v37, %v6813_v38  ;;  %9204 = vmatprep.subr.bf16.mxu0 %v9203_v35  ;;  %v6824_v38 = vld [vmem:[%s11956_s11 + $0xa0] sm:$0xff] }
 0x4f5   : > { %9206 = vmatpush3.bf16.msra.mxu0 %v9203_v35  ;;  %v2941_v35 = vld [vmem:[%s11956_s11 + $0x30] sm:$0xff] }
 0x510   : > { %v7405_v39 = vpop.f32.mrb[4].mxu0 }
 0x511   : > { %v7406_v40 = vpop.f32.mrb[5].mxu0 }
 0x512   : > { %v7407_v42 = vadd.f32 %v7406_v40, %v7405_v39  ;;  %v6825_v39 = vld [vmem:[%s11956_s11 + $0xa8] sm:$0xff] }
 0x514   : > { %v2492_v43 = vadd.f32 %v7407_v42, %v2422_v41  ;;  %v2615_v42 = vsub.s32 4, %v2598_v15 }
 0x516   : > { %v2616_v51 = vrot.slane %v2595_v17, %v2615_v42  ;;  %v2946_v42 = vld [vmem:[%s11956_s11 + $0x58] sm:$0xff] }
 0x530   : > { %v7440_v44 = vpop.f32.mrb[6].mxu0 }
 0x531   : > { %v7441_v45 = vpop.f32.mrb[7].mxu0 }
 0x532   : > { %v7442_v46 = vadd.f32 %v7441_v45, %v7440_v44  ;;  %v2619_v45 = vsub.s32 5, %v2598_v15 }
 0x534   : > { %v2562_v47 = vadd.f32 %v7442_v46, %v2492_v43  ;;  %v9207_v43 = vpack.c.bf16 %v6825_v39, %v6824_v38  ;;  %v2620_v53 = vrot.slane %v2595_v17, %v2619_v45  ;;  %v2943_v38 = vld [vmem:[%s11956_s11 + $0x40] sm:$0xff]  ;;  %v2944_v39 = vld [vmem:[%s11956_s11 + $0x48] sm:$0xff] }
 0x535   : > { %v2948_v45 = vld [vmem:[%s11956_s11 + $0x68] sm:$0xff] }
 0x536   : > { %v6814_v48 = vmul.f32 -1.442695, %v2562_v47  ;;  %9208 = vmatprep.subr.bf16.mxu0 %v9207_v43 }
 0x537   : > { %9210 = vmatpush3.bf16.msra.mxu0 %v9207_v43 }
 0x538   : > { %9778 = vpow2.f32 %v6814_v48 }
 0x542   : > { %v9779_v49 = vpop.eup %9778 }
 0x543   : > { %v2568_v50 = vadd.f32 1.0, %v9779_v49  ;;  %v6826_v49 = vld [vmem:[%s11956_s11 + $0xb0] sm:$0xff] }
 0x545   : > { %9780 = vrcp.f32 %v2568_v50  ;;  %v6827_v50 = vld [vmem:[%s11956_s11 + $0xb8] sm:$0xff] }
 0x546   : > { %v9211_v52 = vpack.c.bf16 %v6827_v50, %v6826_v49  ;;  %v6838_v50 = vld [vmem:[%s11956_s11 + $0xf0] sm:$0xff] }
 0x548   : > { %9212 = vmatprep.subr.bf16.mxu0 %v9211_v52 }
 0x549   : > { %9214 = vmatpush3.bf16.msra.mxu0 %v9211_v52 }
 0x54f   : > { %v10850_v59 = vpop.eup %9780 }
 0x550   : > { %6815 = vmatmul.mubr.msk.f32.vlgmr.msra.gmra.mrb[34].mxu1 %vm2627_vm8, %v10850_v59 }
 0x551   : > { %9182 = vmatpush1.bf16.msra.mxu1 %v9181_v55  ;;  %2766 = vmatprep.mubr.f32.mxu1 %v9824_v2 }
 0x552   : > { %9184 = vmatprep.subr.bf16.mxu1 %v9183_v56  ;;  %v6828_v56 = vld [vmem:[%s11956_s11 + $0xc0] sm:$0xff] }
 0x553   : > { %v9215_v61 = vpack.c.bf16 %v6829_v57, %v6828_v56 }
 0x555   : > { %9186 = vmatpush1.bf16.msra.mxu1 %v9185_v62  ;;  %9216 = vmatprep.subr.bf16.mxu0 %v9215_v61 }
 0x556   : > { %9188 = vmatprep.subr.bf16.mxu1 %v9187_v63  ;;  %9218 = vmatpush3.bf16.msra.mxu0 %v9215_v61 }
 0x558   : > { %6816 = vmatmul.mubr.msk.f32.vlgmr.msra.gmra.mrb[36].mxu1 %vm2627_vm8, %v10850_v59 }
 0x559   : > { %9190 = vmatpush1.bf16.msra.mxu1 %v9189_v6  ;;  %2837 = vmatprep.mubr.f32.mxu1 %v9824_v2  ;;  %v9219_v6 = vpack.c.bf16 %v6831_v5, %v6830_v4  ;;  %v6847_v4 = vld [vmem:[%s11956_s11 + $0x138] sm:$0xff] }
 0x55a   : > { %9192 = vmatprep.subr.bf16.mxu1 %v9191_v7  ;;  %v2935_v7 = vld [vmem:[%s11956_s11] sm:$0xff] }
 0x55b   : > { %v9223_v9 = vpack.c.bf16 %v2936_v8, %v2935_v7  ;;  %9220 = vmatprep.subr.bf16.mxu0 %v9219_v6  ;;  %v6849_v7 = vld [vmem:[%s11956_s11 + $0x148] sm:$0xff] }
 0x55c   : > { %9222 = vmatpush3.bf16.msra.mxu0 %v9219_v6  ;;  %v6848_v6 = vld [vmem:[%s11956_s11 + $0x140] sm:$0xff] }
 0x55d   : > { %9194 = vmatpush1.bf16.msra.mxu1 %v9193_v10  ;;  %9224 = vmatprep.subr.bf16.mxu0 %v9223_v9  ;;  %v9275_v8 = vpack.c.bf16 %v6849_v7, %v6848_v6 }
 0x55e   : > { %9307 = vmatprep.subr.bf16.mxu1 %v9822_v1 }
 0x560   : > { %6817 = vmatmul.mubr.msk.f32.vlgmr.msra.gmra.mrb[38].mxu1 %vm2627_vm8, %v10850_v59 }
 0x561   : > { %8282 = vmatprep.mubr.msk.f32.mxu1 %vm9823_vm0, %v9824_v2 }
 0x623   : > { %v2697_v21 = vpop.f32.mrb[34].mxu1 }
 0x624   : > { %v2698_v24 = vadd.f32 %v2697_v21, %v2600_v19  ;;  %v2699_v25 = vpop.f32.mrb[35].mxu1 }
 0x625   : > { %v2700_v28 = vadd.f32 %v2699_v25, %v2604_v20 }
 0x626   : > { %v2844_v30 = vmax.f32 %v2698_v24, 0.0 }
 0x627   : > { %v2845_v31 = vmax.f32 %v2700_v28, 0.0  ;;  %v2938_v28 = vld [vmem:[%s11956_s11 + $0x18] sm:$0xff] }
 0x628   : > { %2850 = vst [vmem:[#allocation6] sm:$0xff] %v2844_v30  ;;  %v9227_v29 = vpack.c.bf16 %v2938_v28, %v2937_v27  ;;  %v6862_v27 = vld [vmem:[%s11956_s11 + $0x1a0] sm:$0xff]  ;;  %v6863_v28 = vld [vmem:[%s11956_s11 + $0x1a8] sm:$0xff] }
 0x629   : > { %2851 = vst [vmem:[#allocation6 + $0x8] sm:$0xff] %v2845_v31  ;;  %v2939_v31 = vld [vmem:[%s11956_s11 + $0x20] sm:$0xff] }
 0x62b   : > { %v2768_v37 = vpop.f32.mrb[36].mxu1 }
 0x62c   : > { %v2769_v40 = vadd.f32 %v2768_v37, %v2608_v34  ;;  %v2770_v41 = vpop.f32.mrb[37].mxu1  ;;  %v9231_v34 = vpack.c.bf16 %v2940_v32, %v2939_v31  ;;  %v6865_v31 = vld [vmem:[%s11956_s11 + $0x1b8] sm:$0xff] }
 0x62d   : > { %v2771_v44 = vadd.f32 %v2770_v41, %v2612_v36  ;;  %v2942_v36 = vld [vmem:[%s11956_s11 + $0x38] sm:$0xff]  ;;  %v2945_v41 = vld [vmem:[%s11956_s11 + $0x50] sm:$0xff] }
 0x62e   : > { %v2846_v46 = vmax.f32 %v2769_v40, 0.0  ;;  %v9235_v37 = vpack.c.bf16 %v2942_v36, %v2941_v35  ;;  %v9239_v40 = vpack.c.bf16 %v2944_v39, %v2943_v38  ;;  %v9243_v43 = vpack.c.bf16 %v2946_v42, %v2945_v41  ;;  %v6873_v39 = vld [vmem:[%s11959_s14 + $0x40] sm:$0xff] }
 0x62f   : > { %v2847_v47 = vmax.f32 %v2771_v44, 0.0  ;;  %v2867_v48 = vld [vmem:[#allocation6] ss:$0 sm:$0xff]  ;;  %v2947_v44 = vld [vmem:[%s11956_s11 + $0x60] sm:$0xff] }
 0x630   : > { %2852 = vst [vmem:[#allocation6 + $0x10] sm:$0xff] %v2846_v46  ;;  %2869 = vrot.lane.b32.xlu1 %v2867_v48, %s9826_s3  ;;  %2862 = vrot.lane.b32.xlu0 %v2867_v48, %s9827_s23  ;;  %v2879_v55 = vld [vmem:[#allocation6 + $0x8] ss:$0 sm:$0xff]  ;;  %v9247_v46 = vpack.c.bf16 %v2948_v45, %v2947_v44  ;;  %v6837_v48 = vld [vmem:[%s11956_s11 + $0xe8] sm:$0xff]  ;;  %v3339_v45 = vld [vmem:[%s11958_s13] sm:$0xff] }
 0x631   : > { %2853 = vst [vmem:[#allocation6 + $0x18] sm:$0xff] %v2847_v47  ;;  %v6836_v47 = vld [vmem:[%s11956_s11 + $0xe0] sm:$0xff] }
 0x632   : > { %v9251_v49 = vpack.c.bf16 %v6837_v48, %v6836_v47  ;;  %v3341_v47 = vld [vmem:[%s11958_s13 + $0x10] sm:$0xff] }
 0x633   : > { %v2839_v54 = vpop.f32.mrb[38].mxu1  ;;  %v6875_v48 = vld [vmem:[%s11959_s14 + $0x50] sm:$0xff] }
 0x634   : > { %v2840_v58 = vadd.f32 %v2839_v54, %v2616_v51  ;;  %v2841_v60 = vpop.f32.mrb[39].mxu1  ;;  %2881 = vrot.lane.b32.xlu1 %v2879_v55, %s9826_s3  ;;  %2875 = vrot.lane.b32.xlu0 %v2879_v55, %s9827_s23  ;;  %v6839_v51 = vld [vmem:[%s11956_s11 + $0xf8] sm:$0xff]  ;;  %v6840_v54 = vld [vmem:[%s11956_s11 + $0x100] sm:$0xff] }
 0x635   : > { %v2842_v62 = vadd.f32 %v2841_v60, %v2620_v53  ;;  %v9255_v52 = vpack.c.bf16 %v6839_v51, %v6838_v50  ;;  %v6841_v55 = vld [vmem:[%s11956_s11 + $0x108] sm:$0xff]  ;;  %v6843_v60 = vld [vmem:[%s11956_s11 + $0x118] sm:$0xff]  ;;  %v6877_v51 = vld [vmem:[%s11959_s14 + $0x60] sm:$0xff] }
 0x636   : > { %v2848_v63 = vmax.f32 %v2840_v58, 0.0  ;;  %v9259_v57 = vpack.c.bf16 %v6841_v55, %v6840_v54  ;;  %v6842_v58 = vld [vmem:[%s11956_s11 + $0x110] sm:$0xff]  ;;  %v6880_v55 = vld [vmem:[%s11959_s14 + $0x78] sm:$0xff] }
 0x637   : > { %v2849_v0 = vmax.f32 %v2842_v62, 0.0  ;;  %v2891_v3 = vld [vmem:[#allocation6 + $0x10] ss:$0 sm:$0xff]  ;;  %v9263_v61 = vpack.c.bf16 %v6843_v60, %v6842_v58  ;;  %v6844_v62 = vld [vmem:[%s11956_s11 + $0x120] sm:$0xff]  ;;  %v6879_v54 = vld [vmem:[%s11959_s14 + $0x70] sm:$0xff] }
 0x638   : > { %2854 = vst [vmem:[#allocation6 + $0x20] sm:$0xff] %v2848_v63  ;;  %2893 = vrot.lane.b32.xlu1 %v2891_v3, %s9826_s3  ;;  %2887 = vrot.lane.b32.xlu0 %v2891_v3, %s9827_s23  ;;  %v2903_v10 = vld [vmem:[#allocation6 + $0x18] ss:$0 sm:$0xff]  ;;  %v6845_v63 = vld [vmem:[%s11956_s11 + $0x128] sm:$0xff]  ;;  %v6846_v3 = vld [vmem:[%s11956_s11 + $0x130] sm:$0xff] }
 0x639   : > { %2855 = vst [vmem:[#allocation6 + $0x28] sm:$0xff] %v2849_v0  ;;  %v9267_v0 = vpack.c.bf16 %v6845_v63, %v6844_v62  ;;  %v9271_v5 = vpack.c.bf16 %v6847_v4, %v6846_v3  ;;  %v3442_v58 = vld [vmem:[%s11959_s14 + $0x8] sm:$0xff]  ;;  %v3443_v4 = vld [vmem:[%s11959_s14 + $0x10] sm:$0xff] }
 0x63c   : > { %2905 = vrot.lane.b32.xlu1 %v2903_v10, %s9826_s3  ;;  %2899 = vrot.lane.b32.xlu0 %v2903_v10, %s9827_s23  ;;  %v6853_v10 = vld [vmem:[%s11956_s11 + $0x158] sm:$0xff] }
 0x63f   : > { %v2915_v11 = vld [vmem:[#allocation6 + $0x20] ss:$0 sm:$0xff] }
 0x640   : > { %2917 = vrot.lane.b32.xlu1 %v2915_v11, %s9826_s3  ;;  %2911 = vrot.lane.b32.xlu0 %v2915_v11, %s9827_s23  ;;  %v2927_v12 = vld [vmem:[#allocation6 + $0x28] ss:$0 sm:$0xff] }
 0x644   : > { %2929 = vrot.lane.b32.xlu1 %v2927_v12, %s9826_s3  ;;  %2923 = vrot.lane.b32.xlu0 %v2927_v12, %s9827_s23  ;;  %v6854_v12 = vld [vmem:[%s11956_s11 + $0x160] sm:$0xff]  ;;  %s11998_s23 = sld [smem:[#allocation12_spill]] }
 0x64a   : > { %s781_s8 = scalar_lea.vmem %s11998_s23, %s12001_s30 }
 0x6a2   : > { %v2870_v13 = vpop.permute.xlu1 %2869  ;;  %v2863_v14 = vpop.permute.xlu0 %2862 }
 0x6a3   : > { %2872 = vst.msk [vmem:[#allocation7 + $0x2] sm:$0x1] %vm2865_vm11, %v2870_v13  ;;  %2866 = vst.msk [vmem:[#allocation7 + $0x1] sm:$0x1] %vm2865_vm11, %v2863_v14  ;;  %v6855_v13 = vld [vmem:[%s11956_s11 + $0x168] sm:$0xff] }
 0x6a4   : > { %v9283_v14 = vpack.c.bf16 %v6855_v13, %v6854_v12 }
 0x6a6   : > { %v2882_v15 = vpop.permute.xlu1 %2881  ;;  %v2876_v17 = vpop.permute.xlu0 %2875 }
 0x6a7   : > { %2884 = vst.msk [vmem:[#allocation7 + $0x4] sm:$0x1] %vm2865_vm11, %v2882_v15  ;;  %2878 = vst.msk [vmem:[#allocation7 + $0x3] sm:$0x1] %vm2865_vm11, %v2876_v17  ;;  %v6856_v17 = vld [vmem:[%s11956_s11 + $0x170] sm:$0xff] }
 0x6aa   : > { %v2894_v18 = vpop.permute.xlu1 %2893  ;;  %v2888_v19 = vpop.permute.xlu0 %2887 }
 0x6ab   : > { %2896 = vst.msk [vmem:[#allocation7 + $0x6] sm:$0x1] %vm2865_vm11, %v2894_v18  ;;  %2890 = vst.msk [vmem:[#allocation7 + $0x5] sm:$0x1] %vm2865_vm11, %v2888_v19  ;;  %v6857_v18 = vld [vmem:[%s11956_s11 + $0x178] sm:$0xff] }
 0x6ae   : > { %v2906_v20 = vpop.permute.xlu1 %2905  ;;  %v2900_v21 = vpop.permute.xlu0 %2899 }
 0x6af   : > { %2908 = vst.msk [vmem:[#allocation7 + $0x8] sm:$0x1] %vm2865_vm11, %v2906_v20  ;;  %2902 = vst.msk [vmem:[#allocation7 + $0x7] sm:$0x1] %vm2865_vm11, %v2900_v21  ;;  %v9287_v20 = vpack.c.bf16 %v6857_v18, %v6856_v17  ;;  %v6858_v21 = vld [vmem:[%s11956_s11 + $0x180] sm:$0xff] }
 0x6b0   : > { %v6885_v18 = vld [vmem:[%s11959_s14 + $0x80] sm:$0xff] }
 0x6b2   : > { %v2918_v22 = vpop.permute.xlu1 %2917  ;;  %v2912_v23 = vpop.permute.xlu0 %2911 }
 0x6b3   : > { %2920 = vst.msk [vmem:[#allocation7 + $0xa] sm:$0x1] %vm2865_vm11, %v2918_v22  ;;  %2914 = vst.msk [vmem:[#allocation7 + $0x9] sm:$0x1] %vm2865_vm11, %v2912_v23  ;;  %v6859_v22 = vld [vmem:[%s11956_s11 + $0x188] sm:$0xff] }
 0x6b4   : > { %v9291_v23 = vpack.c.bf16 %v6859_v22, %v6858_v21  ;;  %v6887_v21 = vld [vmem:[%s11959_s14 + $0x90] sm:$0xff]  ;;  %v6888_v22 = vld [vmem:[%s11959_s14 + $0x98] sm:$0xff] }
 0x6b6   : > { %v2930_v24 = vpop.permute.xlu1 %2929  ;;  %v2924_v25 = vpop.permute.xlu0 %2923  ;;  %v2949_v26 = vld [vmem:[#allocation7 + $0x1] sm:$0xff] }
 0x6b7   : > { %2932 = vst.msk [vmem:[#allocation7 + $0xc] sm:$0x1] %vm2865_vm11, %v2930_v24  ;;  %2926 = vst.msk [vmem:[#allocation7 + $0xb] sm:$0x1] %vm2865_vm11, %v2924_v25  ;;  %8182 = vmatprep.mubr.msk.f32.mxu0 %vm2856_vm9, %v2949_v26  ;;  %v2933_v33 = vld [vmem:[#allocation7] sm:$0xff]  ;;  %v6860_v24 = vld [vmem:[%s11956_s11 + $0x190] sm:$0xff] }
 0x6b8   : > { %v6861_v25 = vld [vmem:[%s11956_s11 + $0x198] sm:$0xff] }
 0x6b9   : > { %v9295_v26 = vpack.c.bf16 %v6861_v25, %v6860_v24  ;;  %v6889_v25 = vld [vmem:[%s11959_s14 + $0xa0] sm:$0xff] }
 0x6ba   : > { %v3128_v56 = vld [vmem:[#allocation7 + $0x2] sm:$0xff] }
 0x6bb   : > { %v3228_v19 = vld [vmem:[#allocation7 + $0x3] sm:$0xff] }
 0x6be   : > { %v2950_v30 = vld [vmem:[#allocation7 + $0x9] sm:$0xf] }
 0x6bf   : > { %8183 = vmatmul.mubr.msk.f32.vlgmr.msra.gmra.mrb[8].mxu0 %vm2856_vm9, %v2950_v30  ;;  %v2934_v53 = vld [vmem:[#allocation7 + $0x8] sm:$0xf]  ;;  %v6864_v30 = vld [vmem:[%s11956_s11 + $0x1b0] sm:$0xff] }
 0x6c0   : > { %9226 = vmatpush3.bf16.msra.mxu0 %v9223_v9  ;;  %8213 = vmatprep.mubr.msk.f32.mxu0 %vm2856_vm9, %v2933_v33  ;;  %v6852_v9 = vld [vmem:[%s11956_s11 + $0x150] sm:$0xff]  ;;  %v3129_v15 = vld [vmem:[#allocation7 + $0xa] sm:$0xf]  ;;  %v9303_v32 = vpack.c.bf16 %v6865_v31, %v6864_v30  ;;  %v6892_v30 = vld [vmem:[%s11959_s14 + $0xb8] sm:$0xff] }
 0x6c1   : > { %9228 = vmatprep.subr.bf16.mxu0 %v9227_v29  ;;  %v9279_v11 = vpack.c.bf16 %v6853_v10, %v6852_v9  ;;  %v3229_v33 = vld [vmem:[#allocation7 + $0xb] sm:$0xf] }
 0x6c2   : > { %v3445_v10 = vld [vmem:[%s11959_s14 + $0x20] sm:$0xff] }
 0x6c4   : > { %9230 = vmatpush3.bf16.msra.mxu0 %v9227_v29  ;;  %v9299_v29 = vpack.c.bf16 %v6863_v28, %v6862_v27 }
 0x6c5   : > { %9232 = vmatprep.subr.bf16.mxu0 %v9231_v34 }
 0x6c8   : > { %9234 = vmatpush3.bf16.msra.mxu0 %v9231_v34  ;;  %v6868_v34 = vld [vmem:[%s11957_s12] ss:$0 sm:$0xff] }
 0x6c9   : > { %9236 = vmatprep.subr.bf16.mxu0 %v9235_v37 }
 0x6cc   : > { %9238 = vmatpush3.bf16.msra.mxu0 %v9235_v37 }
 0x6cd   : > { %9240 = vmatprep.subr.bf16.mxu0 %v9239_v40 }
 0x6d0   : > { %9242 = vmatpush3.bf16.msra.mxu0 %v9239_v40  ;;  %v6874_v40 = vld [vmem:[%s11959_s14 + $0x48] sm:$0xff] }
 0x6d1   : > { %9244 = vmatprep.subr.bf16.mxu0 %v9243_v43 }
 0x6d4   : > { %9246 = vmatpush3.bf16.msra.mxu0 %v9243_v43  ;;  %v9311_v43 = vpack.c.bf16 %v6874_v40, %v6873_v39  ;;  %v6899_v39 = vld [vmem:[%s11959_s14 + $0xe0] sm:$0xff]  ;;  %v6900_v40 = vld [vmem:[%s11959_s14 + $0xe8] sm:$0xff] }
 0x6d5   : > { %9248 = vmatprep.subr.bf16.mxu0 %v9247_v46 }
 0x6d8   : > { %9250 = vmatpush3.bf16.msra.mxu0 %v9247_v46  ;;  %v3340_v46 = vld [vmem:[%s11958_s13 + $0x8] sm:$0xff] }
 0x6d9   : > { %9252 = vmatprep.subr.bf16.mxu0 %v9251_v49 }
 0x6db   : > { %8214 = vmatmul.mubr.msk.f32.vlgmr.msra.gmra.mrb[8].mxu0 %vm2856_vm9, %v2934_v53 }
 0x6dc   : > { %9254 = vmatpush3.bf16.msra.mxu0 %v9251_v49  ;;  %8244 = vmatprep.mubr.msk.f32.mxu0 %vm2856_vm9, %v3128_v56  ;;  %v6876_v49 = vld [vmem:[%s11959_s14 + $0x58] sm:$0xff]  ;;  %v9323_v56 = vpack.c.bf16 %v6880_v55, %v6879_v54  ;;  %v6910_v54 = vld [vmem:[%s11959_s14 + $0x128] sm:$0xff] }
 0x6dd   : > { %9256 = vmatprep.subr.bf16.mxu0 %v9255_v52  ;;  %v9315_v50 = vpack.c.bf16 %v6876_v49, %v6875_v48  ;;  %v6907_v49 = vld [vmem:[%s11959_s14 + $0x110] sm:$0xff] }
 0x6e0   : > { %9258 = vmatpush3.bf16.msra.mxu0 %v9255_v52  ;;  %v6878_v52 = vld [vmem:[%s11959_s14 + $0x68] sm:$0xff] }
 0x6e1   : > { %9260 = vmatprep.subr.bf16.mxu0 %v9259_v57  ;;  %v9319_v53 = vpack.c.bf16 %v6878_v52, %v6877_v51 }
 0x6e4   : > { %9262 = vmatpush3.bf16.msra.mxu0 %v9259_v57  ;;  %v3441_v57 = vld [vmem:[%s11959_s14] sm:$0xff] }
 0x6e5   : > { %9264 = vmatprep.subr.bf16.mxu0 %v9263_v61  ;;  %v9327_v60 = vpack.c.bf16 %v3442_v58, %v3441_v57  ;;  %v6911_v57 = vld [vmem:[%s11959_s14 + $0x130] sm:$0xff]  ;;  %v6912_v58 = vld [vmem:[%s11959_s14 + $0x138] sm:$0xff] }
 0x6e8   : > { %9266 = vmatpush3.bf16.msra.mxu0 %v9263_v61 }
 0x6e9   : > { %9268 = vmatprep.subr.bf16.mxu0 %v9267_v0 }
 0x6ec   : > { %9270 = vmatpush3.bf16.msra.mxu0 %v9267_v0 }
 0x6ed   : > { %9272 = vmatprep.subr.bf16.mxu0 %v9271_v5 }
 0x6f0   : > { %9274 = vmatpush3.bf16.msra.mxu0 %v9271_v5  ;;  %v3444_v5 = vld [vmem:[%s11959_s14 + $0x18] sm:$0xff] }
 0x6f1   : > { %9276 = vmatprep.subr.bf16.mxu0 %v9275_v8  ;;  %v9331_v9 = vpack.c.bf16 %v3444_v5, %v3443_v4 }
 0x6f4   : > { %9278 = vmatpush3.bf16.msra.mxu0 %v9275_v8 }
 0x6f5   : > { %9280 = vmatprep.subr.bf16.mxu0 %v9279_v11 }
 0x6f7   : > { %8245 = vmatmul.mubr.msk.f32.vlgmr.msra.gmra.mrb[8].mxu0 %vm2856_vm9, %v3129_v15  ;;  %v3448_v15 = vld [vmem:[%s11959_s14 + $0x38] sm:$0xff] }
 0x6f8   : > { %9282 = vmatpush3.bf16.msra.mxu0 %v9279_v11  ;;  %8275 = vmatprep.mubr.msk.f32.mxu0 %vm2856_vm9, %v3228_v19  ;;  %v3446_v11 = vld [vmem:[%s11959_s14 + $0x28] sm:$0xff] }
 0x6f9   : > { %9284 = vmatprep.subr.bf16.mxu0 %v9283_v14  ;;  %v9335_v13 = vpack.c.bf16 %v3446_v11, %v3445_v10  ;;  %v6886_v19 = vld [vmem:[%s11959_s14 + $0x88] sm:$0xff]  ;;  %v6921_v10 = vld [vmem:[%s11959_s14 + $0x170] sm:$0xff]  ;;  %v6922_v11 = vld [vmem:[%s11959_s14 + $0x178] sm:$0xff] }
 0x6fc   : > { %9286 = vmatpush3.bf16.msra.mxu0 %v9283_v14  ;;  %v3447_v14 = vld [vmem:[%s11959_s14 + $0x30] sm:$0xff] }
 0x6fd   : > { %9288 = vmatprep.subr.bf16.mxu0 %v9287_v20  ;;  %v9339_v17 = vpack.c.bf16 %v3448_v15, %v3447_v14  ;;  %v6926_v14 = vld [vmem:[%s11959_s14 + $0x188] sm:$0xff] }
 0x700   : > { %9290 = vmatpush3.bf16.msra.mxu0 %v9287_v20  ;;  %v9343_v20 = vpack.c.bf16 %v6886_v19, %v6885_v18  ;;  %v6928_v18 = vld [vmem:[%s11959_s14 + $0x198] sm:$0xff] }
 0x701   : > { %9292 = vmatprep.subr.bf16.mxu0 %v9291_v23 }
 0x704   : > { %9294 = vmatpush3.bf16.msra.mxu0 %v9291_v23  ;;  %v9347_v23 = vpack.c.bf16 %v6888_v22, %v6887_v21  ;;  %v6929_v21 = vld [vmem:[%s11959_s14 + $0x1a0] sm:$0xff]  ;;  %v6930_v22 = vld [vmem:[%s11959_s14 + $0x1a8] sm:$0xff] }
 0x705   : > { %9296 = vmatprep.subr.bf16.mxu0 %v9295_v26 }
 0x708   : > { %9298 = vmatpush3.bf16.msra.mxu0 %v9295_v26  ;;  %v6890_v26 = vld [vmem:[%s11959_s14 + $0xa8] sm:$0xff] }
 0x709   : > { %9300 = vmatprep.subr.bf16.mxu0 %v9299_v29  ;;  %v9351_v28 = vpack.c.bf16 %v6890_v26, %v6889_v25  ;;  %v6931_v25 = vld [vmem:[%s11959_s14 + $0x1b0] sm:$0xff]  ;;  %v6932_v26 = vld [vmem:[%s11959_s14 + $0x1b8] sm:$0xff] }
 0x70c   : > { %9302 = vmatpush3.bf16.msra.mxu0 %v9299_v29  ;;  %v6891_v29 = vld [vmem:[%s11959_s14 + $0xb0] sm:$0xff] }
 0x70d   : > { %9304 = vmatprep.subr.bf16.mxu0 %v9303_v32  ;;  %v9355_v31 = vpack.c.bf16 %v6892_v30, %v6891_v29  ;;  %v6936_v29 = vld [vmem:[%s11959_s14 + $0x1c8] sm:$0xff] }
 0x710   : > { %9306 = vmatpush3.bf16.msra.mxu0 %v9303_v32  ;;  %v6895_v32 = vld [vmem:[%s11959_s14 + $0xc0] sm:$0xff] }
 0x713   : > { %8276 = vmatmul.mubr.msk.f32.vlgmr.msra.gmra.mrb[8].mxu0 %vm2856_vm9, %v3229_v33  ;;  %v6896_v33 = vld [vmem:[%s11959_s14 + $0xc8] sm:$0xff] }
 0x7e6   : > { %v8277_v35 = vpop.f32.mrb[8].mxu0 }
 0x7e7   : > { %v3336_v36 = vadd.f32 %v8277_v35, %v6868_v34  ;;  %v3317_v37 = vpop.f32.mrb[9].mxu0  ;;  %v6897_v35 = vld [vmem:[%s11959_s14 + $0xd0] sm:$0xff] }
 0x7e8   : > { %v3335_v38 = vadd.f32 %v6868_v34, %v3317_v37  ;;  %v9359_v34 = vpack.c.bf16 %v6896_v33, %v6895_v32  ;;  %v6938_v32 = vld [vmem:[%s11959_s14 + $0x1d8] sm:$0xff] }
 0x7e9   : > { %v3338_v41 = vmax.f32 %v3336_v36, 0.0  ;;  %v6898_v36 = vld [vmem:[%s11959_s14 + $0xd8] sm:$0xff] }
 0x7ea   : > { %v3337_v42 = vmax.f32 %v3335_v38, 0.0  ;;  %v9363_v37 = vpack.c.bf16 %v6898_v36, %v6897_v35  ;;  %v6939_v35 = vld [vmem:[%s11959_s14 + $0x1e0] sm:$0xff]  ;;  %v6940_v36 = vld [vmem:[%s11959_s14 + $0x1e8] sm:$0xff] }
 0x7ec   : > { %v9308_v44 = vpack.c.bf16 %v3338_v41, %v3337_v42  ;;  %v9367_v42 = vpack.c.bf16 %v6900_v40, %v6899_v39  ;;  %v6941_v39 = vld [vmem:[%s11959_s14 + $0x1f0] sm:$0xff]  ;;  %v6942_v40 = vld [vmem:[%s11959_s14 + $0x1f8] sm:$0xff] }
 0x7ee   : > { %9310 = vmatpush3.bf16.msk.msra.mxu1 %vm9309_vm14, %v9308_v44  ;;  %v6902_v44 = vld [vmem:[%s11959_s14 + $0xf8] sm:$0xff] }
 0x7ef   : > { %9312 = vmatprep.subr.bf16.mxu1 %v9311_v43 }
 0x7f1   : > { %8283 = vmatmul.mubr.msk.f32.vlgmr.msra.gmra.mrb[40].mxu1 %vm3342_vm15, %v3339_v45 }
 0x7f2   : > { %8285 = vmatprep.mubr.msk.f32.mxu1 %vm9823_vm0, %v9824_v2  ;;  %9314 = vmatpush3.bf16.msra.mxu1 %v9311_v43  ;;  %v6901_v43 = vld [vmem:[%s11959_s14 + $0xf0] sm:$0xff] }
 0x7f3   : > { %9316 = vmatprep.subr.bf16.mxu1 %v9315_v50  ;;  %v9371_v45 = vpack.c.bf16 %v6902_v44, %v6901_v43  ;;  %v6946_v43 = vld [vmem:[%s11959_s14 + $0x208] sm:$0xff] }
 0x7f5   : > { %8286 = vmatmul.mubr.msk.f32.gmra.mrb[42].mxu1 %vm3342_vm15, %v3340_v46  ;;  %v6905_v46 = vld [vmem:[%s11959_s14 + $0x100] sm:$0xff] }
 0x7f6   : > { %8288 = vmatprep.mubr.msk.f32.mxu1 %vm9823_vm0, %v9824_v2  ;;  %9318 = vmatpush3.bf16.msra.mxu1 %v9315_v50  ;;  %v6908_v50 = vld [vmem:[%s11959_s14 + $0x118] sm:$0xff] }
 0x7f7   : > { %9320 = vmatprep.subr.bf16.mxu1 %v9319_v53  ;;  %v9379_v51 = vpack.c.bf16 %v6908_v50, %v6907_v49  ;;  %v6949_v49 = vld [vmem:[%s11959_s14 + $0x220] sm:$0xff]  ;;  %v6950_v50 = vld [vmem:[%s11959_s14 + $0x228] sm:$0xff] }
 0x7f9   : > { %8289 = vmatmul.mubr.msk.f32.gmra.mrb[44].mxu1 %vm3342_vm15, %v3341_v47  ;;  %v6906_v47 = vld [vmem:[%s11959_s14 + $0x108] sm:$0xff] }
 0x7fa   : > { %9322 = vmatpush3.bf16.msra.mxu1 %v9319_v53  ;;  %v9375_v48 = vpack.c.bf16 %v6906_v47, %v6905_v46  ;;  %v6909_v53 = vld [vmem:[%s11959_s14 + $0x120] sm:$0xff]  ;;  %v6948_v46 = vld [vmem:[%s11959_s14 + $0x218] sm:$0xff] }
 0x7fb   : > { %9324 = vmatprep.subr.bf16.mxu1 %v9323_v56 }
 0x7fe   : > { %9326 = vmatpush3.bf16.msra.mxu1 %v9323_v56  ;;  %v9383_v56 = vpack.c.bf16 %v6910_v54, %v6909_v53  ;;  %v6951_v53 = vld [vmem:[%s11959_s14 + $0x230] sm:$0xff]  ;;  %v6952_v54 = vld [vmem:[%s11959_s14 + $0x238] sm:$0xff] }
 0x7ff   : > { %9328 = vmatprep.subr.bf16.mxu1 %v9327_v60 }
 0x8c4   : > { %v3422_v61 = vpop.f32.mrb[40].mxu1 }
 0x8c5   : > { %3436 = vst.msk [vmem:[#allocation8] sm:$0xff] %vm813_vm1, %v3422_v61  ;;  %v8284_v62 = vpop.f32.mrb[41].mxu1  ;;  %v6915_v61 = vld [vmem:[%s11959_s14 + $0x140] sm:$0xff] }
 0x8c6   : > { %v6916_v62 = vld [vmem:[%s11959_s14 + $0x148] sm:$0xff] }
 0x8c8   : > { %v3427_v63 = vpop.f32.mrb[42].mxu1 }
 0x8c9   : > { %3437 = vst.msk [vmem:[#allocation8 + $0x8] sm:$0xff] %vm813_vm1, %v3427_v63  ;;  %v8287_v0 = vpop.f32.mrb[43].mxu1  ;;  %v9391_v63 = vpack.c.bf16 %v6916_v62, %v6915_v61  ;;  %v6958_v61 = vld [vmem:[%s11959_s14 + $0x258] sm:$0xff] }
 0x8ca   : > { %v6917_v0 = vld [vmem:[%s11959_s14 + $0x150] sm:$0xff] }
 0x8cc   : > { %v3432_v3 = vpop.f32.mrb[44].mxu1  ;;  %v3439_v12 = vld [vmem:[#allocation8] sm:$0xff] }
 0x8cd   : > { %3438 = vst.msk [vmem:[#allocation8 + $0x10] sm:$0xff] %vm813_vm1, %v3432_v3  ;;  %v8290_v6 = vpop.f32.mrb[45].mxu1  ;;  %v6918_v3 = vld [vmem:[%s11959_s14 + $0x158] sm:$0xff] }
 0x8ce   : > { %v9395_v4 = vpack.c.bf16 %v6918_v3, %v6917_v0  ;;  %v6919_v6 = vld [vmem:[%s11959_s14 + $0x160] sm:$0xff]  ;;  %v6960_v3 = vld [vmem:[%s11959_s14 + $0x268] sm:$0xff] }
 0x8cf   : > { %v6959_v0 = vld [vmem:[%s11959_s14 + $0x260] sm:$0xff] }
 0x8d0   : > { %v3449_v7 = vld [vmem:[#allocation8 + $0x1] sm:$0xff]  ;;  %v3450_v8 = vld [vmem:[#allocation8 + $0x9] sm:$0x7f] }
 0x8d1   : > { %8307 = vmatprep.mubr.msk.f32.mxu1 %vm813_vm1, %v3449_v7  ;;  %v3440_v24 = vld [vmem:[#allocation8 + $0x8] sm:$0x7f]  ;;  %v6920_v7 = vld [vmem:[%s11959_s14 + $0x168] sm:$0xff] }
 0x8d2   : > { %8308 = vmatmul.mubr.msk.f32.vlgmr.msra.gmra.mrb[46].mxu1 %vm813_vm1, %v3450_v8  ;;  %v3622_v27 = vld [vmem:[#allocation8 + $0x2] sm:$0xff] }
 0x8d3   : > { %9330 = vmatpush3.bf16.msra.mxu1 %v9327_v60  ;;  %8326 = vmatprep.mubr.msk.f32.mxu1 %vm813_vm1, %v3439_v12  ;;  %v3716_v41 = vld [vmem:[#allocation8 + $0x3] sm:$0xff]  ;;  %v9387_v60 = vpack.c.bf16 %v6912_v58, %v6911_v57  ;;  %v9403_v12 = vpack.c.bf16 %v6922_v11, %v6921_v10  ;;  %v4385_v10 = vld [vmem:[%s11961_s16] sm:$0xff] }
 0x8d4   : > { %9332 = vmatprep.subr.bf16.mxu1 %v9331_v9  ;;  %v3623_v38 = vld [vmem:[#allocation8 + $0xa] sm:$0x7f]  ;;  %v6956_v57 = vld [vmem:[%s11959_s14 + $0x248] sm:$0xff]  ;;  %8485 = vmatprep.mubr.msk.f32.mxu0 %vm4395_vm3, %v4385_v10  ;;  %v4393_v11 = vld [vmem:[%s11961_s16 + $0x40] sm:$0xff] }
 0x8d5   : > { %v3717_v52 = vld [vmem:[#allocation8 + $0xb] sm:$0x7f] }
 0x8d6   : > { %v3810_v55 = vld [vmem:[#allocation8 + $0x4] sm:$0xff]  ;;  %v3811_v5 = vld [vmem:[#allocation8 + $0xc] sm:$0x7f] }
 0x8d7   : > { %9334 = vmatpush3.bf16.msra.mxu1 %v9331_v9  ;;  %v3904_v8 = vld [vmem:[#allocation8 + $0x5] sm:$0xff]  ;;  %v9399_v9 = vpack.c.bf16 %v6920_v7, %v6919_v6  ;;  %v6962_v7 = vld [vmem:[%s11959_s14 + $0x278] sm:$0xff] }
 0x8d8   : > { %9336 = vmatprep.subr.bf16.mxu1 %v9335_v13  ;;  %v6961_v6 = vld [vmem:[%s11959_s14 + $0x270] sm:$0xff] }
 0x8db   : > { %9338 = vmatpush3.bf16.msra.mxu1 %v9335_v13  ;;  %v6925_v13 = vld [vmem:[%s11959_s14 + $0x180] sm:$0xff] }
 0x8dc   : > { %9340 = vmatprep.subr.bf16.mxu1 %v9339_v17  ;;  %v9407_v15 = vpack.c.bf16 %v6926_v14, %v6925_v13  ;;  %v6446_v13 = vld [vmem:[%s781_s8] sm:$0x1]  ;;  %s789_s8 = scalar_lea.vmem %s11970_s25, %s12001_s30 }
 0x8dd   : > { %v6965_v14 = vld [vmem:[%s11960_s15] ss:$0 sm:$0xff] }
 0x8df   : > { %9342 = vmatpush3.bf16.msra.mxu1 %v9339_v17  ;;  %v6927_v17 = vld [vmem:[%s11959_s14 + $0x190] sm:$0xff] }
 0x8e0   : > { %9344 = vmatprep.subr.bf16.mxu1 %v9343_v20  ;;  %v9411_v19 = vpack.c.bf16 %v6928_v18, %v6927_v17 }
 0x8e2   : > { %8327 = vmatmul.mubr.msk.f32.vlgmr.msra.gmra.mrb[46].mxu1 %vm813_vm1, %v3440_v24  ;;  %v9415_v24 = vpack.c.bf16 %v6930_v22, %v6929_v21  ;;  %v6977_v21 = vld [vmem:[%s11962_s17 + $0x38] sm:$0xff]  ;;  %v6978_v22 = vld [vmem:[%s11962_s17 + $0x40] sm:$0xff] }
 0x8e3   : > { %9346 = vmatpush3.bf16.msra.mxu1 %v9343_v20  ;;  %8345 = vmatprep.mubr.msk.f32.mxu1 %vm813_vm1, %v3622_v27  ;;  %v3905_v20 = vld [vmem:[#allocation8 + $0xd] sm:$0x7f]  ;;  %v9419_v27 = vpack.c.bf16 %v6932_v26, %v6931_v25  ;;  %v6447_v25 = vld [vmem:[%s11964_s19] sm:$0xff]  ;;  %v6448_v26 = vld [vmem:[%s11964_s19 + $0x8] sm:$0xff] }
 0x8e4   : > { %9348 = vmatprep.subr.bf16.mxu1 %v9347_v23 }
 0x8e7   : > { %9350 = vmatpush3.bf16.msra.mxu1 %v9347_v23  ;;  %v3998_v23 = vld [vmem:[#allocation8 + $0x6] sm:$0xff] }
 0x8e8   : > { %9352 = vmatprep.subr.bf16.mxu1 %v9351_v28 }
 0x8eb   : > { %9354 = vmatpush3.bf16.msra.mxu1 %v9351_v28  ;;  %v6935_v28 = vld [vmem:[%s11959_s14 + $0x1c0] sm:$0xff] }
 0x8ec   : > { %9356 = vmatprep.subr.bf16.mxu1 %v9355_v31  ;;  %v9423_v30 = vpack.c.bf16 %v6936_v29, %v6935_v28  ;;  %v4386_v28 = vld [vmem:[%s11961_s16 + $0x8] sm:$0xff] }
 0x8ed   : > { %v4394_v29 = vld [vmem:[%s11961_s16 + $0x48] sm:$0x7] }
 0x8ef   : > { %9358 = vmatpush3.bf16.msra.mxu1 %v9355_v31  ;;  %v6937_v31 = vld [vmem:[%s11959_s14 + $0x1d0] sm:$0xff] }
 0x8f0   : > { %9360 = vmatprep.subr.bf16.mxu1 %v9359_v34  ;;  %v9427_v33 = vpack.c.bf16 %v6938_v32, %v6937_v31  ;;  %v4387_v31 = vld [vmem:[%s11961_s16 + $0x10] sm:$0xff] }
 0x8f1   : > { %v6449_v32 = vld [vmem:[%s11964_s19 + $0x10] sm:$0xff] }
 0x8f2   : > { %8346 = vmatmul.mubr.msk.f32.vlgmr.msra.gmra.mrb[46].mxu1 %vm813_vm1, %v3623_v38  ;;  %v9431_v38 = vpack.c.bf16 %v6940_v36, %v6939_v35  ;;  %v4389_v36 = vld [vmem:[%s11961_s16 + $0x20] sm:$0xff] }
 0x8f3   : > { %9362 = vmatpush3.bf16.msra.mxu1 %v9359_v34  ;;  %8364 = vmatprep.mubr.msk.f32.mxu1 %vm813_vm1, %v3716_v41  ;;  %v3999_v34 = vld [vmem:[#allocation8 + $0xe] sm:$0x7f]  ;;  %v9435_v41 = vpack.c.bf16 %v6942_v40, %v6941_v39 }
 0x8f4   : > { %9364 = vmatprep.subr.bf16.mxu1 %v9363_v37  ;;  %v6980_v39 = vld [vmem:[%s11962_s17 + $0x50] sm:$0xff] }
 0x8f7   : > { %9366 = vmatpush3.bf16.msra.mxu1 %v9363_v37  ;;  %v4092_v37 = vld [vmem:[#allocation8 + $0x7] sm:$0xff] }
 0x8f8   : > { %9368 = vmatprep.subr.bf16.mxu1 %v9367_v42 }
 0x8fb   : > { %9370 = vmatpush3.bf16.msra.mxu1 %v9367_v42  ;;  %v6945_v42 = vld [vmem:[%s11959_s14 + $0x200] sm:$0xff] }
 0x8fc   : > { %9372 = vmatprep.subr.bf16.mxu1 %v9371_v45  ;;  %v9439_v44 = vpack.c.bf16 %v6946_v43, %v6945_v42  ;;  %v6983_v43 = vld [vmem:[%s11962_s17 + $0x68] sm:$0xff] }
 0x8ff   : > { %9374 = vmatpush3.bf16.msra.mxu1 %v9371_v45  ;;  %v6947_v45 = vld [vmem:[%s11959_s14 + $0x210] sm:$0xff] }
 0x900   : > { %9376 = vmatprep.subr.bf16.mxu1 %v9375_v48  ;;  %v9443_v47 = vpack.c.bf16 %v6948_v46, %v6947_v45  ;;  %v4565_v45 = vld [vmem:[%s11962_s17 + $0x8] sm:$0xff] }
 0x902   : > { %8365 = vmatmul.mubr.msk.f32.vlgmr.msra.gmra.mrb[46].mxu1 %vm813_vm1, %v3717_v52  ;;  %v9447_v52 = vpack.c.bf16 %v6950_v50, %v6949_v49  ;;  %v6451_v49 = vld [vmem:[%s11965_s20] sm:$0x1] }
 0x903   : > { %9378 = vmatpush3.bf16.msra.mxu1 %v9375_v48  ;;  %8383 = vmatprep.mubr.msk.f32.mxu1 %vm813_vm1, %v3810_v55  ;;  %v4093_v48 = vld [vmem:[#allocation8 + $0xf] sm:$0x7f]  ;;  %v9451_v55 = vpack.c.bf16 %v6952_v54, %v6951_v53 }
 0x904   : > { %9380 = vmatprep.subr.bf16.mxu1 %v9379_v51 }
 0x907   : > { %9382 = vmatpush3.bf16.msra.mxu1 %v9379_v51  ;;  %v4186_v51 = vld [vmem:[#allocation8 + $0x8] sm:$0xff] }
 0x908   : > { %9384 = vmatprep.subr.bf16.mxu1 %v9383_v56 }
 0x90b   : > { %9386 = vmatpush3.bf16.msra.mxu1 %v9383_v56  ;;  %v6955_v56 = vld [vmem:[%s11959_s14 + $0x240] sm:$0xff] }
 0x90c   : > { %9388 = vmatprep.subr.bf16.mxu1 %v9387_v60  ;;  %v9455_v58 = vpack.c.bf16 %v6956_v57, %v6955_v56 }
 0x90f   : > { %9390 = vmatpush3.bf16.msra.mxu1 %v9387_v60  ;;  %v6957_v60 = vld [vmem:[%s11959_s14 + $0x250] sm:$0xff] }
 0x910   : > { %9392 = vmatprep.subr.bf16.mxu1 %v9391_v63  ;;  %v9459_v62 = vpack.c.bf16 %v6958_v61, %v6957_v60  ;;  %v7160_v61 = vld [vmem:[%s11966_s21] ss:$0 sm:$0xff] }
 0x912   : > { %8384 = vmatmul.mubr.msk.f32.vlgmr.msra.gmra.mrb[46].mxu1 %vm813_vm1, %v3811_v5  ;;  %v9463_v5 = vpack.c.bf16 %v6960_v3, %v6959_v0 }
 0x913   : > { %9394 = vmatpush3.bf16.msra.mxu1 %v9391_v63  ;;  %8402 = vmatprep.mubr.msk.f32.mxu1 %vm813_vm1, %v3904_v8  ;;  %v4187_v63 = vld [vmem:[#allocation8 + $0x10] sm:$0x7f]  ;;  %v9467_v8 = vpack.c.bf16 %v6962_v7, %v6961_v6 }
 0x914   : > { %9396 = vmatprep.subr.bf16.mxu1 %v9395_v4 }
 0x917   : > { %9398 = vmatpush3.bf16.msra.mxu1 %v9395_v4  ;;  %v4280_v4 = vld [vmem:[#allocation8 + $0x9] sm:$0xff] }
 0x918   : > { %9400 = vmatprep.subr.bf16.mxu1 %v9399_v9 }
 0x91b   : > { %9402 = vmatpush3.bf16.msra.mxu1 %v9399_v9  ;;  %v4281_v9 = vld [vmem:[#allocation8 + $0x11] sm:$0x7f] }
 0x91c   : > { %9404 = vmatprep.subr.bf16.mxu1 %v9403_v12 }
 0x91f   : > { %9406 = vmatpush3.bf16.msra.mxu1 %v9403_v12  ;;  %v9829_v12 = vmov 0  }
 0x920   : > { %9408 = vmatprep.subr.bf16.mxu1 %v9407_v15  ;;  %9777 = vset.pattern.permute.xlu0 %v9829_v12 }
 0x921   : > { %6454 = vperm.xlu0 %9777, %v6446_v13  }
 0x922   : > { %8403 = vmatmul.mubr.msk.f32.vlgmr.msra.gmra.mrb[46].mxu1 %vm813_vm1, %v3905_v20 }
 0x923   : > { %9410 = vmatpush3.bf16.msra.mxu1 %v9407_v15  ;;  %8421 = vmatprep.mubr.msk.f32.mxu1 %vm813_vm1, %v3998_v23 }
 0x924   : > { %9412 = vmatprep.subr.bf16.mxu1 %v9411_v19 }
 0x927   : > { %9414 = vmatpush3.bf16.msra.mxu1 %v9411_v19 }
 0x928   : > { %9416 = vmatprep.subr.bf16.mxu1 %v9415_v24 }
 0x92b   : > { %9418 = vmatpush3.bf16.msra.mxu1 %v9415_v24 }
 0x92c   : > { %9420 = vmatprep.subr.bf16.mxu1 %v9419_v27 }
 0x92f   : > { %9422 = vmatpush3.bf16.msra.mxu1 %v9419_v27  ;;  %v9477_v27 = vpack.c.bf16 %v6978_v22, %v6977_v21  ;;  %v4570_v21 = vld [vmem:[%s11962_s17 + $0x30] sm:$0xff] }
 0x930   : > { %9424 = vmatprep.subr.bf16.mxu1 %v9423_v30  ;;  %v7000_v22 = vld [vmem:[%s11962_s17 + $0x70] sm:$0xff] }
 0x932   : > { %8422 = vmatmul.mubr.msk.f32.vlgmr.msra.gmra.mrb[46].mxu1 %vm813_vm1, %v3999_v34  ;;  %v4388_v34 = vld [vmem:[%s11961_s16 + $0x18] sm:$0xff] }
 0x933   : > { %9426 = vmatpush3.bf16.msra.mxu1 %v9423_v30  ;;  %8440 = vmatprep.mubr.msk.f32.mxu1 %vm813_vm1, %v4092_v37  ;;  %v9622_v30 = vpack.c.bf16 %v6448_v26, %v6447_v25  ;;  %v4390_v37 = vld [vmem:[%s11961_s16 + $0x28] sm:$0xff]  ;;  %v7001_v25 = vld [vmem:[%s11962_s17 + $0x78] sm:$0xff] }
 0x934   : > { %9428 = vmatprep.subr.bf16.mxu1 %v9427_v33  ;;  %v9501_v26 = vpack.c.bf16 %v7001_v25, %v7000_v22  ;;  %v7047_v22 = vld [vmem:[%s11962_s17 + $0x128] sm:$0xff]  ;;  %v7048_v25 = vld [vmem:[%s11962_s17 + $0x130] sm:$0xff] }
 0x937   : > { %9430 = vmatpush3.bf16.msra.mxu1 %v9427_v33  ;;  %v6450_v33 = vld [vmem:[%s11964_s19 + $0x18] sm:$0xff] }
 0x938   : > { %9432 = vmatprep.subr.bf16.mxu1 %v9431_v38  ;;  %v9625_v35 = vpack.c.bf16 %v6450_v33, %v6449_v32  ;;  %v7004_v33 = vld [vmem:[%s11962_s17 + $0x90] sm:$0xff] }
 0x93b   : > { %9434 = vmatpush3.bf16.msra.mxu1 %v9431_v38  ;;  %v6979_v38 = vld [vmem:[%s11962_s17 + $0x48] sm:$0xff] }
 0x93c   : > { %9436 = vmatprep.subr.bf16.mxu1 %v9435_v41  ;;  %v9481_v40 = vpack.c.bf16 %v6980_v39, %v6979_v38  ;;  %v7015_v39 = vld [vmem:[%s11962_s17 + $0xa8] sm:$0xff] }
 0x93f   : > { %9438 = vmatpush3.bf16.msra.mxu1 %v9435_v41  ;;  %v6982_v41 = vld [vmem:[%s11962_s17 + $0x60] sm:$0xff] }
 0x940   : > { %9440 = vmatprep.subr.bf16.mxu1 %v9439_v44 }
 0x942   : > { %8441 = vmatmul.mubr.msk.f32.vlgmr.msra.gmra.mrb[46].mxu1 %vm813_vm1, %v4093_v48 }
 0x943   : > { %9442 = vmatpush3.bf16.msra.mxu1 %v9439_v44  ;;  %8459 = vmatprep.mubr.msk.f32.mxu1 %vm813_vm1, %v4186_v51  ;;  %v4564_v44 = vld [vmem:[%s11962_s17] sm:$0xff] }
 0x944   : > { %9444 = vmatprep.subr.bf16.mxu1 %v9443_v47  ;;  %v9489_v46 = vpack.c.bf16 %v4565_v45, %v4564_v44  ;;  %v7018_v44 = vld [vmem:[%s11962_s17 + $0xc0] sm:$0xff] }
 0x947   : > { %9446 = vmatpush3.bf16.msra.mxu1 %v9443_v47 }
 0x948   : > { %9448 = vmatprep.subr.bf16.mxu1 %v9447_v52 }
 0x94b   : > { %9450 = vmatpush3.bf16.msra.mxu1 %v9447_v52 }
 0x94c   : > { %9452 = vmatprep.subr.bf16.mxu1 %v9451_v55 }
 0x94f   : > { %9454 = vmatpush3.bf16.msra.mxu1 %v9451_v55 }
 0x950   : > { %9456 = vmatprep.subr.bf16.mxu1 %v9455_v58 }
 0x952   : > { %8460 = vmatmul.mubr.msk.f32.vlgmr.msra.gmra.mrb[46].mxu1 %vm813_vm1, %v4187_v63 }
 0x953   : > { %9458 = vmatpush3.bf16.msra.mxu1 %v9455_v58  ;;  %8478 = vmatprep.mubr.msk.f32.mxu1 %vm813_vm1, %v4280_v4  ;;  %v4566_v4 = vld [vmem:[%s11962_s17 + $0x10] sm:$0xff] }
 0x954   : > { %9460 = vmatprep.subr.bf16.mxu1 %v9459_v62 }
 0x957   : > { %9462 = vmatpush3.bf16.msra.mxu1 %v9459_v62 }
 0x958   : > { %9464 = vmatprep.subr.bf16.mxu1 %v9463_v5 }
 0x95b   : > { %9466 = vmatpush3.bf16.msra.mxu1 %v9463_v5 }
 0x95c   : > { %9468 = vmatprep.subr.bf16.mxu1 %v9467_v8 }
 0x95f   : > { %9470 = vmatpush3.bf16.msra.mxu1 %v9467_v8  ;;  %v7161_v8 = vld [vmem:[%s11967_s22] ss:$0 sm:$0xff] }
 0x962   : > { %8479 = vmatmul.mubr.msk.f32.vlgmr.msra.gmra.mrb[46].mxu1 %vm813_vm1, %v4281_v9  ;;  %vm4426_vm1 = vcmask 1046528   ;;  %v4568_v9 = vld [vmem:[%s11962_s17 + $0x20] sm:$0xff] }
 0x963   : > { %8497 = vmatprep.mubr.msk.f32.mxu1 %vm4395_vm3, %v4393_v11  ;;  %vm9472_vm5 = vmpackc.low %vm4426_vm1, %vm9828_vm13 }
 0x9a0   : > { %v6455_v47 = vpop.permute.xlu0 %6454 }
 0x9a1   : > { %v6460_v48 = vrot.slane %v6455_v47, %v10895_v16 }
 0x9a3   : > { %v6461_v53 = vmul.f32 %v6460_v48, %v6451_v49  ;;  %v7019_v48 = vld [vmem:[%s11962_s17 + $0xc8] sm:$0xff]  ;;  %v7020_v49 = vld [vmem:[%s11962_s17 + $0xd0] sm:$0xff] }
 0x9a5   : > { %v6466_v57 = vrot.slane %v6461_v53, %v10895_v16  ;;  %v4567_v16 = vld [vmem:[%s11962_s17 + $0x18] sm:$0xff] }
 0x9a6   : > { %v9493_v7 = vpack.c.bf16 %v4567_v16, %v4566_v4  ;;  %v7034_v16 = vld [vmem:[%s11962_s17 + $0x100] sm:$0xff] }
 0xa35   : > { %v8480_v15 = vpop.f32.mrb[46].mxu1 }
 0xa36   : > { %v4382_v17 = vadd.f32 %v8480_v15, %v6965_v14  ;;  %v4363_v18 = vpop.f32.mrb[47].mxu1 }
 0xa37   : > { %v4381_v19 = vadd.f32 %v6965_v14, %v4363_v18  ;;  %v4569_v14 = vld [vmem:[%s11962_s17 + $0x28] sm:$0xff] }
 0xa38   : > { %v4384_v20 = vmax.f32 %v4382_v17, 0.0  ;;  %v9497_v17 = vpack.c.bf16 %v4569_v14, %v4568_v9  ;;  %v7045_v14 = vld [vmem:[%s11962_s17 + $0x118] sm:$0xff] }
 0xa39   : > { %v4383_v23 = vmax.f32 %v4381_v19, 0.0 }
 0xa3b   : > { %v9471_v24 = vpack.c.bf16 %v4384_v20, %v4383_v23 }
 0xa3d   : > { %9473 = vmatprep.subr.msk.bf16.mxu0 %vm9472_vm5, %v9471_v24  ;;  %9627 = vmatprep.subr.msk.bf16.mxu1 %vm9472_vm5, %v9471_v24 }
 0xa3e   : > { %9476 = vmatpush3.bf16.msk.msra.mxu0 %vm9472_vm5, %v9471_v24  ;;  %9628 = vmatpush3.bf16.msk.msra.mxu1 %vm9472_vm5, %v9471_v24 }
 0xa3f   : > { %9621 = vmatprep.subr.bf16.mxu1 %v9822_v1  ;;  %9478 = vmatprep.subr.bf16.mxu0 %v9477_v27 }
 0xa41   : > { %8486 = vmatmul.mubr.msk.f32.vlgmr.msra.gmra.mrb[10].mxu0 %vm4395_vm3, %v4386_v28  ;;  %8498 = vmatmul.mubr.msk.f32.vlgmr.msra.gmra.mrb[48].mxu1 %vm4395_vm3, %v4394_v29  ;;  %v7002_v28 = vld [vmem:[%s11962_s17 + $0x80] sm:$0xff]  ;;  %v7003_v29 = vld [vmem:[%s11962_s17 + $0x88] sm:$0xff] }
 0xa42   : > { %9623 = vmatpush3.bf16.msra.mxu1 %v9622_v30  ;;  %8488 = vmatprep.mubr.msk.f32.mxu0 %vm4395_vm3, %v4387_v31  ;;  %v9505_v31 = vpack.c.bf16 %v7003_v29, %v7002_v28  ;;  %v9541_v28 = vpack.c.bf16 %v7048_v25, %v7047_v22  ;;  %v7077_v22 = vld [vmem:[%s11962_s17 + $0x198] sm:$0xff]  ;;  %v7078_v25 = vld [vmem:[%s11962_s17 + $0x1a0] sm:$0xff] }
 0xa43   : > { %9624 = vmatprep.subr.bf16.mxu1 %v9822_v1  ;;  %8820 = vmatprep.mubr.msk.f32.mxu1 %vm9823_vm0, %v9824_v2  ;;  %v4391_v1 = vld [vmem:[%s11961_s16 + $0x30] sm:$0xff]  ;;  %v4392_v2 = vld [vmem:[%s11961_s16 + $0x38] sm:$0xff]  ;;  %vm4554_vm0 = vcmask 452608  }
 0xa44   : > { %9480 = vmatpush3.bf16.msra.mxu0 %v9477_v27 }
 0xa45   : > { %8489 = vmatmul.mubr.msk.f32.gmra.mrb[12].mxu0 %vm4395_vm3, %v4388_v34  ;;  %9482 = vmatprep.subr.bf16.mxu0 %v9481_v40  ;;  %v7005_v34 = vld [vmem:[%s11962_s17 + $0x98] sm:$0xff] }
 0xa46   : > { %9626 = vmatpush3.bf16.msra.mxu1 %v9625_v35  ;;  %8491 = vmatprep.mubr.msk.f32.mxu0 %vm4395_vm3, %v4389_v36  ;;  %v9509_v36 = vpack.c.bf16 %v7005_v34, %v7004_v33 }
 0xa48   : > { %9484 = vmatpush3.bf16.msra.mxu0 %v9481_v40  ;;  %v7016_v40 = vld [vmem:[%s11962_s17 + $0xb0] sm:$0xff] }
 0xa49   : > { %8492 = vmatmul.mubr.msk.f32.gmra.mrb[14].mxu0 %vm4395_vm3, %v4390_v37  ;;  %8821 = vmatmul.mubr.msk.f32.vlgmr.msra.gmra.mrb[50].mxu1 %vm2627_vm8, %v10850_v59  ;;  %v6981_v59 = vld [vmem:[%s11962_s17 + $0x58] sm:$0xff] }
 0xa4a   : > { %8494 = vmatprep.mubr.msk.f32.mxu0 %vm4395_vm3, %v4391_v1  ;;  %v9485_v42 = vpack.c.bf16 %v6982_v41, %v6981_v59  ;;  %v9513_v41 = vpack.c.bf16 %v7016_v40, %v7015_v39  ;;  %v7051_v39 = vld [vmem:[%s11962_s17 + $0x148] sm:$0xff] }
 0xa4c   : > { %9486 = vmatprep.subr.bf16.mxu0 %v9485_v42 }
 0xa4d   : > { %8495 = vmatmul.mubr.msk.f32.gmra.mrb[16].mxu0 %vm4395_vm3, %v4392_v2  ;;  %v7006_v2 = vld [vmem:[%s11962_s17 + $0xa0] sm:$0xff] }
 0xa4e   : > { %9488 = vmatpush3.bf16.msra.mxu0 %v9485_v42 }
 0xa4f   : > { %8512 = vmatprep.subr.mxu0 %v6983_v43 }
 0xa52   : > { %8513 = vmatpush3.msra.mxu0 %v6983_v43  ;;  %v7017_v43 = vld [vmem:[%s11962_s17 + $0xb8] sm:$0xff] }
 0xa53   : > { %9490 = vmatprep.subr.bf16.mxu0 %v9489_v46 }
 0xb14   : > { %v8487_v50 = vpop.f32.mrb[10].mxu0  ;;  %v8499_v51 = vpop.f32.mrb[48].mxu1 }
 0xb15   : > { %4546 = vst.msk [vmem:[#allocation9 + $0x8] sm:$0xff] %vm1805_vm4, %v8487_v50  ;;  %v4496_v52 = vpop.f32.mrb[11].mxu0  ;;  %v4536_v54 = vpop.f32.mrb[49].mxu1 }
 0xb16   : > { %4555 = vst.msk [vmem:[#allocation9 + $0x48] sm:$0x7] %vm4554_vm0, %v8499_v51  ;;  %v9521_v51 = vpack.c.bf16 %v7020_v49, %v7019_v48  ;;  %v7062_v48 = vld [vmem:[%s11962_s17 + $0x160] sm:$0xff]  ;;  %v7063_v49 = vld [vmem:[%s11962_s17 + $0x168] sm:$0xff] }
 0xb17   : > { %4545 = vst.msk [vmem:[#allocation9] sm:$0xff] %vm1805_vm4, %v4496_v52  ;;  %4553 = vst.msk [vmem:[#allocation9 + $0x40] sm:$0xff] %vm1805_vm4, %v4536_v54  ;;  %v7021_v54 = vld [vmem:[%s11962_s17 + $0xd8] sm:$0xff] }
 0xb18   : > { %v8490_v55 = vpop.f32.mrb[12].mxu0 }
 0xb19   : > { %4548 = vst.msk [vmem:[#allocation9 + $0x18] sm:$0xff] %vm1805_vm4, %v8490_v55  ;;  %v4506_v56 = vpop.f32.mrb[13].mxu0 }
 0xb1a   : > { %4547 = vst.msk [vmem:[#allocation9 + $0x10] sm:$0xff] %vm1805_vm4, %v4506_v56  ;;  %v7030_v56 = vld [vmem:[%s11962_s17 + $0xe0] sm:$0xff] }
 0xb1c   : > { %v8493_v58 = vpop.f32.mrb[14].mxu0  ;;  %v6534_v60 = vpop.f32.mrb[50].mxu1  ;;  %v11546_v32 = vld [vmem:[#allocation9 + $0x8] sm:$0xff] }
 0xb1d   : > { %4550 = vst.msk [vmem:[#allocation9 + $0x28] sm:$0xff] %vm1805_vm4, %v8493_v58  ;;  %v6535_v62 = vadd.f32 %v6534_v60, %v6466_v57  ;;  %v4516_v63 = vpop.f32.mrb[15].mxu0  ;;  %v8822_v0 = vpop.f32.mrb[51].mxu1  ;;  %v7031_v57 = vld [vmem:[%s11962_s17 + $0xe8] sm:$0xff] }
 0xb1e   : > { %v4571_v3 = vld [vmem:[#allocation9 + $0x1] sm:$0xff]  ;;  %4549 = vst.msk [vmem:[#allocation9 + $0x20] sm:$0xff] %vm1805_vm4, %v4516_v63  ;;  %v9525_v60 = vpack.c.bf16 %v7031_v57, %v7030_v56  ;;  %v7033_v63 = vld [vmem:[%s11962_s17 + $0xf8] sm:$0xff]  ;;  %v7064_v57 = vld [vmem:[%s11962_s17 + $0x170] sm:$0xff] }
 0xb1f   : > { %8514 = vmatprep.mubr.msk.f32.mxu0 %vm1805_vm4, %v4571_v3  ;;  %v6545_v5 = vadd.f32 %v7160_v61, %v6535_v62  ;;  %v4556_v30 = vld [vmem:[#allocation9] sm:$0xff]  ;;  %v7032_v62 = vld [vmem:[%s11962_s17 + $0xf0] sm:$0xff] }
 0xb20   : > { %v8496_v6 = vpop.f32.mrb[16].mxu0  ;;  %v11560_v37 = vld [vmem:[#allocation9 + $0x18] sm:$0xff]  ;;  %v4845_v45 = vld [vmem:[#allocation9 + $0x2] sm:$0xff]  ;;  %v9529_v3 = vpack.c.bf16 %v7033_v63, %v7032_v62 }
 0xb21   : > { %v6546_v10 = vmax.f32 %v6545_v5, 0.0  ;;  %4552 = vst.msk [vmem:[#allocation9 + $0x38] sm:$0xff] %vm1805_vm4, %v8496_v6  ;;  %v4526_v11 = vpop.f32.mrb[17].mxu0  ;;  %v11498_v12 = vld [vmem:[#allocation9 + $0x9] sm:$0xff]  ;;  %v11500_v13 = vld [vmem:[#allocation9 + $0x11] sm:$0xff] }
 0xb22   : > { %4551 = vst.msk [vmem:[#allocation9 + $0x30] sm:$0xff] %vm1805_vm4, %v4526_v11  ;;  %8515 = vmatmul.mubr.msk.f32.vlgmr.msra.gmra.mrb[18].mxu0 %vm1805_vm4, %v11498_v12  ;;  %v11556_v35 = vld [vmem:[#allocation9 + $0x10] sm:$0xff]  ;;  %v4998_v0 = vld [vmem:[#allocation9 + $0x3] sm:$0xff] }
 0xb23   : > { %8517 = vmatprep.mubr.msk.f32.mxu0 %vm1805_vm4, %v11500_v13  ;;  %9492 = vmatpush3.bf16.msra.mxu0 %v9489_v46  ;;  %v6554_v15 = vmul.f32 %v7161_v8, %v6546_v10  ;;  %v9517_v46 = vpack.c.bf16 %v7018_v44, %v7017_v43  ;;  %v11596_v47 = vld [vmem:[#allocation9 + $0xa] sm:$0xff]  ;;  %v11606_v50 = vld [vmem:[#allocation9 + $0x12] sm:$0xff] }
 0xb24   : > { %9494 = vmatprep.subr.bf16.mxu0 %v9493_v7  ;;  %v11571_v38 = vld [vmem:[#allocation9 + $0x28] sm:$0xff]  ;;  %v11656_v6 = vld [vmem:[#allocation9 + $0x13] sm:$0xff] }
 0xb25   : > { %v11510_v18 = vld [vmem:[#allocation9 + $0x19] sm:$0xff]  ;;  %v6556_v19 = vsel %vm6555_vm6, %v6554_v15, 0.0  ;;  %v11512_v20 = vld [vmem:[#allocation9 + $0x21] sm:$0xff]  ;;  %v11646_v4 = vld [vmem:[#allocation9 + $0xb] sm:$0xff] }
 0xb26   : > { %8518 = vmatmul.mubr.msk.f32.gmra.mrb[20].mxu0 %vm1805_vm4, %v11510_v18  ;;  %6557 = vadd.xlane.f32.xlu1 %v6556_v19  ;;  %v11564_v1 = vld [vmem:[#allocation9 + $0x20] sm:$0xff]  ;;  %v7035_v5 = vld [vmem:[%s11962_s17 + $0x108] sm:$0xff]  ;;  %v7036_v10 = vld [vmem:[%s11962_s17 + $0x110] sm:$0xff] }
 0xb27   : > { %8520 = vmatprep.mubr.msk.f32.mxu0 %vm1805_vm4, %v11512_v20  ;;  %9496 = vmatpush3.bf16.msra.mxu0 %v9493_v7  ;;  %v11610_v52 = vld [vmem:[#allocation9 + $0x1a] sm:$0xff]  ;;  %v11614_v53 = vld [vmem:[#allocation9 + $0x22] sm:$0xff]  ;;  %v9533_v7 = vpack.c.bf16 %v7035_v5, %v7034_v16  ;;  %v5152_v29 = vld [vmem:[#allocation9 + $0xc] sm:$0xff] }
 0xb28   : > { %9498 = vmatprep.subr.bf16.mxu0 %v9497_v17  ;;  %v11535_v27 = vld [vmem:[#allocation9 + $0x39] sm:$0xff]  ;;  %v11664_v9 = vld [vmem:[#allocation9 + $0x23] sm:$0xff]  ;;  %v5305_v56 = vld [vmem:[#allocation9 + $0xd] sm:$0xff] }
 0xb29   : > { %v11524_v23 = vld [vmem:[#allocation9 + $0x29] sm:$0xff]  ;;  %v11526_v24 = vld [vmem:[#allocation9 + $0x31] sm:$0xff]  ;;  %v11635_v61 = vld [vmem:[#allocation9 + $0x3a] sm:$0xff] }
 0xb2a   : > { %8521 = vmatmul.mubr.msk.f32.gmra.mrb[22].mxu0 %vm1805_vm4, %v11524_v23  ;;  %v11581_v59 = vld [vmem:[#allocation9 + $0x30] sm:$0xff]  ;;  %v11585_v42 = vld [vmem:[#allocation9 + $0x38] sm:$0xff]  ;;  %v7046_v15 = vld [vmem:[%s11962_s17 + $0x120] sm:$0xff] }
 0xb2b   : > { %8523 = vmatprep.mubr.msk.f32.mxu0 %vm1805_vm4, %v11526_v24  ;;  %9500 = vmatpush3.bf16.msra.mxu0 %v9497_v17  ;;  %v11621_v55 = vld [vmem:[#allocation9 + $0x2a] sm:$0xff]  ;;  %v11631_v58 = vld [vmem:[#allocation9 + $0x32] sm:$0xff]  ;;  %v11660_v8 = vld [vmem:[#allocation9 + $0x1b] sm:$0xff]  ;;  %v9537_v19 = vpack.c.bf16 %v7046_v15, %v7045_v14 }
 0xb2c   : > { %8538 = vmatprep.subr.mxu0 %v4570_v21  ;;  %v11671_v11 = vld [vmem:[#allocation9 + $0x2b] sm:$0xff]  ;;  %v11681_v17 = vld [vmem:[#allocation9 + $0x33] sm:$0xff]  ;;  %v7066_v16 = vld [vmem:[%s11962_s17 + $0x180] sm:$0xff] }
 0xb2d   : > { %v5153_v33 = vld [vmem:[#allocation9 + $0x14] sm:$0xff]  ;;  %v5156_v40 = vld [vmem:[#allocation9 + $0x2c] sm:$0xff] }
 0xb2e   : > { %8524 = vmatmul.mubr.msk.f32.gmra.mrb[24].mxu0 %vm1805_vm4, %v11535_v27  ;;  %v7061_v43 = vld [vmem:[%s11962_s17 + $0x158] sm:$0xff]  ;;  %v5309_v5 = vld [vmem:[#allocation9 + $0x2d] sm:$0xff] }
 0xb2f   : > { %8539 = vmatpush3.msra.mxu0 %v4570_v21  ;;  %8540 = vmatprep.mubr.msk.f32.mxu0 %vm1805_vm4, %v4556_v30  ;;  %v11685_v21 = vld [vmem:[#allocation9 + $0x3b] sm:$0xff] }
 0xb30   : > { %9502 = vmatprep.subr.bf16.mxu0 %v9501_v26  ;;  %v7049_v30 = vld [vmem:[%s11962_s17 + $0x138] sm:$0xff] }
 0xb31   : > { %v5157_v44 = vld [vmem:[#allocation9 + $0x34] sm:$0xff] }
 0xb32   : > { %8541 = vmatmul.mubr.msk.f32.vlgmr.msra.gmra.mrb[18].mxu0 %vm1805_vm4, %v11546_v32  ;;  %v5306_v62 = vld [vmem:[#allocation9 + $0x15] sm:$0xff] }
 0xb33   : > { %8543 = vmatprep.mubr.msk.f32.mxu0 %vm1805_vm4, %v11556_v35  ;;  %9504 = vmatpush3.bf16.msra.mxu0 %v9501_v26  ;;  %v5151_v26 = vld [vmem:[#allocation9 + $0x4] sm:$0xff]  ;;  %v5310_v14 = vld [vmem:[#allocation9 + $0x35] sm:$0xff] }
 0xb34   : > { %9506 = vmatprep.subr.bf16.mxu0 %v9505_v31 }
 0xb36   : > { %8544 = vmatmul.mubr.msk.f32.gmra.mrb[20].mxu0 %vm1805_vm4, %v11560_v37 }
 0xb37   : > { %8546 = vmatprep.mubr.msk.f32.mxu0 %vm1805_vm4, %v11564_v1  ;;  %9508 = vmatpush3.bf16.msra.mxu0 %v9505_v31  ;;  %v7050_v31 = vld [vmem:[%s11962_s17 + $0x140] sm:$0xff] }
 0xb38   : > { %9510 = vmatprep.subr.bf16.mxu0 %v9509_v36  ;;  %v9545_v34 = vpack.c.bf16 %v7050_v31, %v7049_v30  ;;  %v7079_v30 = vld [vmem:[%s11962_s17 + $0x1a8] sm:$0xff]  ;;  %v7080_v31 = vld [vmem:[%s11962_s17 + $0x1b0] sm:$0xff] }
 0xb3a   : > { %8547 = vmatmul.mubr.msk.f32.gmra.mrb[22].mxu0 %vm1805_vm4, %v11571_v38 }
 0xb3b   : > { %8549 = vmatprep.mubr.msk.f32.mxu0 %vm1805_vm4, %v11581_v59  ;;  %9512 = vmatpush3.bf16.msra.mxu0 %v9509_v36  ;;  %v5154_v36 = vld [vmem:[#allocation9 + $0x1c] sm:$0xff] }
 0xb3c   : > { %8564 = vmatprep.subr.mxu0 %v7006_v2 }
 0xb3e   : > { %8550 = vmatmul.mubr.msk.f32.gmra.mrb[24].mxu0 %vm1805_vm4, %v11585_v42 }
 0xb3f   : > { %8565 = vmatpush3.msra.mxu0 %v7006_v2  ;;  %8566 = vmatprep.mubr.msk.f32.mxu0 %vm1805_vm4, %v4845_v45  ;;  %v5155_v2 = vld [vmem:[#allocation9 + $0x24] sm:$0xff] }
 0xb40   : > { %9514 = vmatprep.subr.bf16.mxu0 %v9513_v41 }
 0xb42   : > { %8567 = vmatmul.mubr.msk.f32.vlgmr.msra.gmra.mrb[18].mxu0 %vm1805_vm4, %v11596_v47 }
 0xb43   : > { %8569 = vmatprep.mubr.msk.f32.mxu0 %vm1805_vm4, %v11606_v50  ;;  %9516 = vmatpush3.bf16.msra.mxu0 %v9513_v41  ;;  %v7060_v41 = vld [vmem:[%s11962_s17 + $0x150] sm:$0xff] }
 0xb44   : > { %9518 = vmatprep.subr.bf16.mxu0 %v9517_v46  ;;  %v9549_v45 = vpack.c.bf16 %v7061_v43, %v7060_v41  ;;  %v7090_v41 = vld [vmem:[%s11962_s17 + $0x1c0] sm:$0xff]  ;;  %v7091_v43 = vld [vmem:[%s11962_s17 + $0x1c8] sm:$0xff] }
 0xb46   : > { %8570 = vmatmul.mubr.msk.f32.gmra.mrb[20].mxu0 %vm1805_vm4, %v11610_v52 }
 0xb47   : > { %8572 = vmatprep.mubr.msk.f32.mxu0 %vm1805_vm4, %v11614_v53  ;;  %9520 = vmatpush3.bf16.msra.mxu0 %v9517_v46  ;;  %v5158_v46 = vld [vmem:[#allocation9 + $0x3c] sm:$0xff] }
 0xb48   : > { %9522 = vmatprep.subr.bf16.mxu0 %v9521_v51 }
 0xb4a   : > { %8573 = vmatmul.mubr.msk.f32.gmra.mrb[22].mxu0 %vm1805_vm4, %v11621_v55 }
 0xb4b   : > { %8575 = vmatprep.mubr.msk.f32.mxu0 %vm1805_vm4, %v11631_v58  ;;  %9524 = vmatpush3.bf16.msra.mxu0 %v9521_v51  ;;  %v5304_v51 = vld [vmem:[#allocation9 + $0x5] sm:$0xff] }
 0xb4c   : > { %8590 = vmatprep.subr.mxu0 %v7021_v54 }
 0xb4e   : > { %8576 = vmatmul.mubr.msk.f32.gmra.mrb[24].mxu0 %vm1805_vm4, %v11635_v61 }
 0xb4f   : > { %8591 = vmatpush3.msra.mxu0 %v7021_v54  ;;  %8592 = vmatprep.mubr.msk.f32.mxu0 %vm1805_vm4, %v4998_v0  ;;  %v9553_v54 = vpack.c.bf16 %v7063_v49, %v7062_v48  ;;  %v5307_v0 = vld [vmem:[#allocation9 + $0x1d] sm:$0xff]  ;;  %v7092_v48 = vld [vmem:[%s11962_s17 + $0x1d0] sm:$0xff] }
 0xb50   : > { %9526 = vmatprep.subr.bf16.mxu0 %v9525_v60  ;;  %v7093_v49 = vld [vmem:[%s11962_s17 + $0x1d8] sm:$0xff] }
 0xb52   : > { %8593 = vmatmul.mubr.msk.f32.vlgmr.msra.gmra.mrb[18].mxu0 %vm1805_vm4, %v11646_v4 }
 0xb53   : > { %8595 = vmatprep.mubr.msk.f32.mxu0 %vm1805_vm4, %v11656_v6  ;;  %9528 = vmatpush3.bf16.msra.mxu0 %v9525_v60  ;;  %v7065_v60 = vld [vmem:[%s11962_s17 + $0x178] sm:$0xff] }
 0xb54   : > { %9530 = vmatprep.subr.bf16.mxu0 %v9529_v3  ;;  %v9557_v63 = vpack.c.bf16 %v7065_v60, %v7064_v57  ;;  %v7094_v57 = vld [vmem:[%s11962_s17 + $0x1e0] sm:$0xff]  ;;  %v7095_v60 = vld [vmem:[%s11962_s17 + $0x1e8] sm:$0xff] }
 0xb56   : > { %8596 = vmatmul.mubr.msk.f32.gmra.mrb[20].mxu0 %vm1805_vm4, %v11660_v8 }
 0xb57   : > { %8598 = vmatprep.mubr.msk.f32.mxu0 %vm1805_vm4, %v11664_v9  ;;  %9532 = vmatpush3.bf16.msra.mxu0 %v9529_v3  ;;  %v5308_v3 = vld [vmem:[#allocation9 + $0x25] sm:$0xff] }
 0xb58   : > { %9534 = vmatprep.subr.bf16.mxu0 %v9533_v7 }
 0xb5a   : > { %8599 = vmatmul.mubr.msk.f32.gmra.mrb[22].mxu0 %vm1805_vm4, %v11671_v11 }
 0xb5b   : > { %8601 = vmatprep.mubr.msk.f32.mxu0 %vm1805_vm4, %v11681_v17  ;;  %9536 = vmatpush3.bf16.msra.mxu0 %v9533_v7  ;;  %v7075_v7 = vld [vmem:[%s11962_s17 + $0x188] sm:$0xff] }
 0xb5c   : > { %8616 = vmatprep.subr.mxu0 %v7036_v10 }
 0xb5e   : > { %8602 = vmatmul.mubr.msk.f32.gmra.mrb[24].mxu0 %vm1805_vm4, %v11685_v21 }
 0xb5f   : > { %8617 = vmatpush3.msra.mxu0 %v7036_v10  ;;  %8618 = vmatprep.mubr.msk.f32.mxu0 %vm1805_vm4, %v5151_v26  ;;  %v7076_v10 = vld [vmem:[%s11962_s17 + $0x190] sm:$0xff]  ;;  %v5457_v26 = vld [vmem:[#allocation9 + $0x6] sm:$0xff] }
 0xb60   : > { %9538 = vmatprep.subr.bf16.mxu0 %v9537_v19  ;;  %v9561_v15 = vpack.c.bf16 %v7076_v10, %v7075_v7  ;;  %v7105_v7 = vld [vmem:[%s11962_s17 + $0x1f8] sm:$0xff]  ;;  %v7106_v10 = vld [vmem:[%s11962_s17 + $0x200] sm:$0xff] }
 0xb62   : > { %8619 = vmatmul.mubr.msk.f32.vlgmr.msra.gmra.mrb[18].mxu0 %vm1805_vm4, %v5152_v29  ;;  %v5458_v29 = vld [vmem:[#allocation9 + $0xe] sm:$0xff] }
 0xb63   : > { %8621 = vmatprep.mubr.msk.f32.mxu0 %vm1805_vm4, %v5153_v33  ;;  %9540 = vmatpush3.bf16.msra.mxu0 %v9537_v19  ;;  %v5311_v19 = vld [vmem:[#allocation9 + $0x3d] sm:$0xff] }
 0xb64   : > { %9542 = vmatprep.subr.bf16.mxu0 %v9541_v28  ;;  %v5459_v33 = vld [vmem:[#allocation9 + $0x16] sm:$0xff] }
 0xb66   : > { %8622 = vmatmul.mubr.msk.f32.gmra.mrb[20].mxu0 %vm1805_vm4, %v5154_v36  ;;  %v5460_v36 = vld [vmem:[#allocation9 + $0x1e] sm:$0xff] }
 0xb67   : > { %8624 = vmatprep.mubr.msk.f32.mxu0 %vm1805_vm4, %v5155_v2  ;;  %9544 = vmatpush3.bf16.msra.mxu0 %v9541_v28  ;;  %v9565_v28 = vpack.c.bf16 %v7078_v25, %v7077_v22  ;;  %v5461_v2 = vld [vmem:[#allocation9 + $0x26] sm:$0xff]  ;;  %v7108_v25 = vld [vmem:[%s11962_s17 + $0x210] sm:$0xff] }
 0xb68   : > { %9546 = vmatprep.subr.bf16.mxu0 %v9545_v34  ;;  %v7107_v22 = vld [vmem:[%s11962_s17 + $0x208] sm:$0xff] }
 0xb6a   : > { %8625 = vmatmul.mubr.msk.f32.gmra.mrb[22].mxu0 %vm1805_vm4, %v5156_v40  ;;  %v5462_v40 = vld [vmem:[#allocation9 + $0x2e] sm:$0xff] }
 0xb6b   : > { %8627 = vmatprep.mubr.msk.f32.mxu0 %vm1805_vm4, %v5157_v44  ;;  %9548 = vmatpush3.bf16.msra.mxu0 %v9545_v34  ;;  %v9569_v34 = vpack.c.bf16 %v7080_v31, %v7079_v30  ;;  %v5463_v44 = vld [vmem:[#allocation9 + $0x36] sm:$0xff]  ;;  %v7122_v31 = vld [vmem:[%s11962_s17 + $0x240] sm:$0xff] }
 0xb6c   : > { %8642 = vmatprep.subr.mxu0 %v7051_v39 }
 0xb6e   : > { %8628 = vmatmul.mubr.msk.f32.gmra.mrb[24].mxu0 %vm1805_vm4, %v5158_v46  ;;  %v5464_v46 = vld [vmem:[#allocation9 + $0x3e] sm:$0xff] }
 0xb6f   : > { %8643 = vmatpush3.msra.mxu0 %v7051_v39  ;;  %8644 = vmatprep.mubr.msk.f32.mxu0 %vm1805_vm4, %v5304_v51  ;;  %v7081_v39 = vld [vmem:[%s11962_s17 + $0x1b8] sm:$0xff]  ;;  %v5610_v51 = vld [vmem:[#allocation9 + $0x7] sm:$0xff] }
 0xb70   : > { %9550 = vmatprep.subr.bf16.mxu0 %v9549_v45 }
 0xb72   : > { %8645 = vmatmul.mubr.msk.f32.vlgmr.msra.gmra.mrb[18].mxu0 %vm1805_vm4, %v5305_v56  ;;  %v5611_v56 = vld [vmem:[#allocation9 + $0xf] sm:$0xff] }
 0xb73   : > { %8647 = vmatprep.mubr.msk.f32.mxu0 %vm1805_vm4, %v5306_v62  ;;  %9552 = vmatpush3.bf16.msra.mxu0 %v9549_v45  ;;  %v9573_v45 = vpack.c.bf16 %v7091_v43, %v7090_v41  ;;  %v5612_v62 = vld [vmem:[#allocation9 + $0x17] sm:$0xff]  ;;  %v7138_v43 = vld [vmem:[%s11962_s17 + $0x280] sm:$0xff] }
 0xb74   : > { %9554 = vmatprep.subr.bf16.mxu0 %v9553_v54  ;;  %v7137_v41 = vld [vmem:[%s11962_s17 + $0x278] sm:$0xff] }
 0xb76   : > { %8648 = vmatmul.mubr.msk.f32.gmra.mrb[20].mxu0 %vm1805_vm4, %v5307_v0  ;;  %v5613_v0 = vld [vmem:[#allocation9 + $0x1f] sm:$0xff] }
 0xb77   : > { %8650 = vmatprep.mubr.msk.f32.mxu0 %vm1805_vm4, %v5308_v3  ;;  %9556 = vmatpush3.bf16.msra.mxu0 %v9553_v54  ;;  %v9577_v54 = vpack.c.bf16 %v7093_v49, %v7092_v48  ;;  %v5614_v3 = vld [vmem:[#allocation9 + $0x27] sm:$0xff] }
 0xb78   : > { %9558 = vmatprep.subr.bf16.mxu0 %v9557_v63 }
 0xb7a   : > { %8651 = vmatmul.mubr.msk.f32.gmra.mrb[22].mxu0 %vm1805_vm4, %v5309_v5  ;;  %v5615_v5 = vld [vmem:[#allocation9 + $0x2f] sm:$0xff] }
 0xb7b   : > { %8653 = vmatprep.mubr.msk.f32.mxu0 %vm1805_vm4, %v5310_v14  ;;  %9560 = vmatpush3.bf16.msra.mxu0 %v9557_v63  ;;  %v9581_v63 = vpack.c.bf16 %v7095_v60, %v7094_v57  ;;  %v5616_v14 = vld [vmem:[#allocation9 + $0x37] sm:$0xff] }
 0xb7c   : > { %8668 = vmatprep.subr.mxu0 %v7066_v16 }
 0xb7e   : > { %8654 = vmatmul.mubr.msk.f32.gmra.mrb[24].mxu0 %vm1805_vm4, %v5311_v19  ;;  %v5617_v19 = vld [vmem:[#allocation9 + $0x3f] sm:$0xff] }
 0xb7f   : > { %8669 = vmatpush3.msra.mxu0 %v7066_v16  ;;  %8670 = vmatprep.mubr.msk.f32.mxu0 %vm1805_vm4, %v5457_v26  ;;  %v7096_v16 = vld [vmem:[%s11962_s17 + $0x1f0] sm:$0xff]  ;;  %v9589_v26 = vpack.c.bf16 %v7108_v25, %v7107_v22 }
 0xb80   : > { %9562 = vmatprep.subr.bf16.mxu0 %v9561_v15 }
 0xb82   : > { %8671 = vmatmul.mubr.msk.f32.vlgmr.msra.gmra.mrb[18].mxu0 %vm1805_vm4, %v5458_v29  ;;  %v7110_v29 = vld [vmem:[%s11962_s17 + $0x220] sm:$0xff] }
 0xb83   : > { %8673 = vmatprep.mubr.msk.f32.mxu0 %vm1805_vm4, %v5459_v33  ;;  %9564 = vmatpush3.bf16.msra.mxu0 %v9561_v15  ;;  %v9585_v15 = vpack.c.bf16 %v7106_v10, %v7105_v7  ;;  %v7123_v33 = vld [vmem:[%s11962_s17 + $0x248] sm:$0xff] }
 0xb84   : > { %9566 = vmatprep.subr.bf16.mxu0 %v9565_v28 }
 0xb86   : > { %8674 = vmatmul.mubr.msk.f32.gmra.mrb[20].mxu0 %vm1805_vm4, %v5460_v36  ;;  %v7125_v36 = vld [vmem:[%s11962_s17 + $0x258] sm:$0xff] }
 0xb87   : > { %8676 = vmatprep.mubr.msk.f32.mxu0 %vm1805_vm4, %v5461_v2  ;;  %9568 = vmatpush3.bf16.msra.mxu0 %v9565_v28  ;;  %v7109_v28 = vld [vmem:[%s11962_s17 + $0x218] sm:$0xff] }
 0xb88   : > { %9570 = vmatprep.subr.bf16.mxu0 %v9569_v34  ;;  %v9593_v30 = vpack.c.bf16 %v7110_v29, %v7109_v28 }
 0xb8a   : > { %8677 = vmatmul.mubr.msk.f32.gmra.mrb[22].mxu0 %vm1805_vm4, %v5462_v40  ;;  %v7136_v40 = vld [vmem:[%s11962_s17 + $0x270] sm:$0xff] }
 0xb8b   : > { %8679 = vmatprep.mubr.msk.f32.mxu0 %vm1805_vm4, %v5463_v44  ;;  %9572 = vmatpush3.bf16.msra.mxu0 %v9569_v34  ;;  %v7124_v34 = vld [vmem:[%s11962_s17 + $0x250] sm:$0xff] }
 0xb8c   : > { %8694 = vmatprep.subr.mxu0 %v7081_v39  ;;  %v7140_v44 = vld [vmem:[%s11962_s17 + $0x290] sm:$0xff] }
 0xb8e   : > { %8680 = vmatmul.mubr.msk.f32.gmra.mrb[24].mxu0 %vm1805_vm4, %v5464_v46 }
 0xb8f   : > { %8695 = vmatpush3.msra.mxu0 %v7081_v39  ;;  %8696 = vmatprep.mubr.msk.f32.mxu0 %vm1805_vm4, %v5610_v51  ;;  %v9605_v39 = vpack.c.bf16 %v7125_v36, %v7124_v34 }
 0xb90   : > { %9574 = vmatprep.subr.bf16.mxu0 %v9573_v45 }
 0xb92   : > { %8697 = vmatmul.mubr.msk.f32.vlgmr.msra.gmra.mrb[18].mxu0 %vm1805_vm4, %v5611_v56 }
 0xb93   : > { %8699 = vmatprep.mubr.msk.f32.mxu0 %vm1805_vm4, %v5612_v62  ;;  %9576 = vmatpush3.bf16.msra.mxu0 %v9573_v45 }
 0xb94   : > { %9578 = vmatprep.subr.bf16.mxu0 %v9577_v54 }
 0xb96   : > { %8700 = vmatmul.mubr.msk.f32.gmra.mrb[20].mxu0 %vm1805_vm4, %v5613_v0 }
 0xb97   : > { %8702 = vmatprep.mubr.msk.f32.mxu0 %vm1805_vm4, %v5614_v3  ;;  %9580 = vmatpush3.bf16.msra.mxu0 %v9577_v54 }
 0xb98   : > { %9582 = vmatprep.subr.bf16.mxu0 %v9581_v63 }
 0xb9a   : > { %8703 = vmatmul.mubr.msk.f32.gmra.mrb[22].mxu0 %vm1805_vm4, %v5615_v5 }
 0xb9b   : > { %8705 = vmatprep.mubr.msk.f32.mxu0 %vm1805_vm4, %v5616_v14  ;;  %9584 = vmatpush3.bf16.msra.mxu0 %v9581_v63 }
 0xb9c   : > { %8720 = vmatprep.subr.mxu0 %v7096_v16 }
 0xb9e   : > { %8706 = vmatmul.mubr.msk.f32.gmra.mrb[24].mxu0 %vm1805_vm4, %v5617_v19 }
 0xb9f   : > { %8721 = vmatpush3.msra.mxu0 %v7096_v16  ;;  %8722 = vmatprep.mubr.msk.f32.mxu0 %vm1805_vm4, %v11546_v32  ;;  %v7111_v32 = vld [vmem:[%s11962_s17 + $0x228] sm:$0xff] }
 0xba0   : > { %9586 = vmatprep.subr.bf16.mxu0 %v9585_v15 }
 0xba2   : > { %8723 = vmatmul.mubr.msk.f32.vlgmr.msra.gmra.mrb[18].mxu0 %vm1805_vm4, %v11556_v35  ;;  %v7120_v35 = vld [vmem:[%s11962_s17 + $0x230] sm:$0xff] }
 0xba3   : > { %8725 = vmatprep.mubr.msk.f32.mxu0 %vm1805_vm4, %v11560_v37  ;;  %9588 = vmatpush3.bf16.msra.mxu0 %v9585_v15  ;;  %v7121_v37 = vld [vmem:[%s11962_s17 + $0x238] sm:$0xff] }
 0xba4   : > { %9590 = vmatprep.subr.bf16.mxu0 %v9589_v26 }
 0xba6   : > { %8726 = vmatmul.mubr.msk.f32.gmra.mrb[20].mxu0 %vm1805_vm4, %v11564_v1  ;;  %v9597_v1 = vpack.c.bf16 %v7121_v37, %v7120_v35 }
 0xba7   : > { %8728 = vmatprep.mubr.msk.f32.mxu0 %vm1805_vm4, %v11571_v38  ;;  %9592 = vmatpush3.bf16.msra.mxu0 %v9589_v26  ;;  %v5770_v38 = vld [vmem:[#allocation9 + $0x40] sm:$0xff] }
 0xba8   : > { %9594 = vmatprep.subr.bf16.mxu0 %v9593_v30 }
 0xbaa   : > { %8729 = vmatmul.mubr.msk.f32.gmra.mrb[22].mxu0 %vm1805_vm4, %v11581_v59  ;;  %v9601_v59 = vpack.c.bf16 %v7123_v33, %v7122_v31 }
 0xbab   : > { %8731 = vmatprep.mubr.msk.f32.mxu0 %vm1805_vm4, %v11585_v42  ;;  %9596 = vmatpush3.bf16.msra.mxu0 %v9593_v30  ;;  %v7162_v42 = vld [vmem:[#allocation10] ss:$0 sm:$0xff] }
 0xbac   : > { %8746 = vmatprep.subr.mxu0 %v7111_v32 }
 0xbae   : > { %8732 = vmatmul.mubr.msk.f32.gmra.mrb[24].mxu0 %vm1805_vm4, %v5770_v38 }
 0xbaf   : > { %8747 = vmatpush3.msra.mxu0 %v7111_v32  ;;  %8748 = vmatprep.mubr.msk.f32.mxu0 %vm1805_vm4, %v11498_v12 }
 0xbb0   : > { %9598 = vmatprep.subr.bf16.mxu0 %v9597_v1 }
 0xbb2   : > { %8749 = vmatmul.mubr.msk.f32.vlgmr.msra.gmra.mrb[18].mxu0 %vm1805_vm4, %v11500_v13  ;;  %v7126_v13 = vld [vmem:[%s11962_s17 + $0x260] sm:$0xff] }
 0xbb3   : > { %8751 = vmatprep.mubr.msk.f32.mxu0 %vm1805_vm4, %v11510_v18  ;;  %9600 = vmatpush3.bf16.msra.mxu0 %v9597_v1  ;;  %v6558_v12 = vpop.xlane.xlu1 %6557  ;;  %v7135_v18 = vld [vmem:[%s11962_s17 + $0x268] sm:$0xff] }
 0xbb4   : > { %v6566_v2 = vadd.f32 %v7162_v42, %v6558_v12  ;;  %9602 = vmatprep.subr.bf16.mxu0 %v9601_v59 }
 0xbb6   : > { %6568 = vst.msk [vmem:[%s789_s8] sm:$0x1] %vm6567_vm7, %v6566_v2  ;;  %8752 = vmatmul.mubr.msk.f32.gmra.mrb[20].mxu0 %vm1805_vm4, %v11512_v20  ;;  %v9609_v20 = vpack.c.bf16 %v7136_v40, %v7135_v18  ;;  %s786_s8 = scalar_lea.vmem %s11969_s24, %s11999_s4 }
 0xbb7   : > { %8754 = vmatprep.mubr.msk.f32.mxu0 %vm1805_vm4, %v11524_v23  ;;  %9604 = vmatpush3.bf16.msra.mxu0 %v9601_v59  ;;  %v5923_v23 = vld [vmem:[#allocation9 + $0x41] sm:$0xff] }
 0xbb8   : > { %9606 = vmatprep.subr.bf16.mxu0 %v9605_v39 }
 0xbba   : > { %8755 = vmatmul.mubr.msk.f32.gmra.mrb[22].mxu0 %vm1805_vm4, %v11526_v24  ;;  %v9613_v24 = vpack.c.bf16 %v7138_v43, %v7137_v41 }
 0xbbb   : > { %8757 = vmatprep.mubr.msk.f32.mxu0 %vm1805_vm4, %v11535_v27  ;;  %9608 = vmatpush3.bf16.msra.mxu0 %v9605_v39  ;;  %v7139_v27 = vld [vmem:[%s11962_s17 + $0x288] sm:$0xff] }
 0xbbc   : > { %8772 = vmatprep.subr.mxu0 %v7126_v13  ;;  %v9617_v45 = vpack.c.bf16 %v7140_v44, %v7139_v27 }
 0xbbe   : > { %8758 = vmatmul.mubr.msk.f32.gmra.mrb[24].mxu0 %vm1805_vm4, %v5923_v23 }
 0xbbf   : > { %8773 = vmatpush3.msra.mxu0 %v7126_v13  ;;  %8774 = vmatprep.mubr.msk.f32.mxu0 %vm1805_vm4, %v11596_v47  ;;  %v7141_v47 = vld [vmem:[%s11962_s17 + $0x298] sm:$0xff] }
 0xbc0   : > { %9610 = vmatprep.subr.bf16.mxu0 %v9609_v20 }
 0xbc2   : > { %8775 = vmatmul.mubr.msk.f32.vlgmr.msra.gmra.mrb[18].mxu0 %vm1805_vm4, %v11606_v50  ;;  %v6076_v50 = vld [vmem:[#allocation9 + $0x42] sm:$0xff] }
 0xbc3   : > { %8777 = vmatprep.mubr.msk.f32.mxu0 %vm1805_vm4, %v11610_v52  ;;  %9612 = vmatpush3.bf16.msra.mxu0 %v9609_v20  ;;  %v6229_v52 = vld [vmem:[#allocation9 + $0x43] sm:$0xff] }
 0xbc4   : > { %9614 = vmatprep.subr.bf16.mxu0 %v9613_v24 }
 0xbc6   : > { %8778 = vmatmul.mubr.msk.f32.gmra.mrb[20].mxu0 %vm1805_vm4, %v11614_v53  ;;  %v7150_v53 = vld [vmem:[%s11963_s18] ss:$0 sm:$0xff] }
 0xbc7   : > { %8780 = vmatprep.mubr.msk.f32.mxu0 %vm1805_vm4, %v11621_v55  ;;  %9616 = vmatpush3.bf16.msra.mxu0 %v9613_v24 }
 0xbc8   : > { %9618 = vmatprep.subr.bf16.mxu0 %v9617_v45 }
 0xbca   : > { %8781 = vmatmul.mubr.msk.f32.gmra.mrb[22].mxu0 %vm1805_vm4, %v11631_v58 }
 0xbcb   : > { %8783 = vmatprep.mubr.msk.f32.mxu0 %vm1805_vm4, %v11635_v61  ;;  %9620 = vmatpush3.bf16.msra.mxu0 %v9617_v45 }
 0xbcc   : > { %8798 = vmatprep.subr.mxu0 %v7141_v47 }
 0xbce   : > { %8784 = vmatmul.mubr.msk.f32.gmra.mrb[24].mxu0 %vm1805_vm4, %v6076_v50 }
 0xbcf   : > { %8799 = vmatpush3.msra.mxu0 %v7141_v47  ;;  %8800 = vmatprep.mubr.msk.f32.mxu0 %vm1805_vm4, %v11646_v4 }
 0xbd2   : > { %8801 = vmatmul.mubr.msk.f32.vlgmr.msra.gmra.mrb[18].mxu0 %vm1805_vm4, %v11656_v6 }
 0xbd3   : > { %8803 = vmatprep.mubr.msk.f32.mxu0 %vm1805_vm4, %v11660_v8 }
 0xbd6   : > { %8804 = vmatmul.mubr.msk.f32.gmra.mrb[20].mxu0 %vm1805_vm4, %v11664_v9 }
 0xbd7   : > { %8806 = vmatprep.mubr.msk.f32.mxu0 %vm1805_vm4, %v11671_v11 }
 0xbda   : > { %8807 = vmatmul.mubr.msk.f32.gmra.mrb[22].mxu0 %vm1805_vm4, %v11681_v17 }
 0xbdb   : > { %8809 = vmatprep.mubr.msk.f32.mxu0 %vm1805_vm4, %v11685_v21 }
 0xbde   : > { %8810 = vmatmul.mubr.msk.f32.gmra.mrb[24].mxu0 %vm1805_vm4, %v6229_v52 }
 0xca5   : > { %v8802_v55 = vpop.f32.mrb[18].mxu0 }
 0xca6   : > { %v6383_v58 = vadd.f32 %v8802_v55, %v7150_v53  ;;  %v6328_v61 = vpop.f32.mrb[19].mxu0 }
 0xca7   : > { %v6382_v4 = vadd.f32 %v7150_v53, %v6328_v61 }
 0xca8   : > { %v7152_v6 = vmul.f32 -1.442695, %v6383_v58 }
 0xca9   : > { %v7151_v8 = vmul.f32 -1.442695, %v6382_v4  ;;  %v8805_v9 = vpop.f32.mrb[20].mxu0 }
 0xcaa   : > { %9782 = vpow2.f32 %v7152_v6  ;;  %v6385_v11 = vadd.f32 %v8805_v9, %v7150_v53  ;;  %v6338_v17 = vpop.f32.mrb[21].mxu0 }
 0xcab   : > { %9784 = vpow2.f32 %v7151_v8  ;;  %v6384_v46 = vadd.f32 %v7150_v53, %v6338_v17 }
 0xcac   : > { %v7154_v21 = vmul.f32 -1.442695, %v6385_v11 }
 0xcad   : > { %v7153_v48 = vmul.f32 -1.442695, %v6384_v46  ;;  %v8808_v49 = vpop.f32.mrb[22].mxu0 }
 0xcae   : > { %9786 = vpow2.f32 %v7154_v21  ;;  %v6387_v51 = vadd.f32 %v8808_v49, %v7150_v53  ;;  %v6348_v54 = vpop.f32.mrb[23].mxu0 }
 0xcaf   : > { %9788 = vpow2.f32 %v7153_v48  ;;  %v6386_v56 = vadd.f32 %v7150_v53, %v6348_v54 }
 0xcb0   : > { %v7156_v57 = vmul.f32 -1.442695, %v6387_v51 }
 0xcb1   : > { %v7155_v60 = vmul.f32 -1.442695, %v6386_v56  ;;  %v8811_v62 = vpop.f32.mrb[24].mxu0 }
 0xcb2   : > { %9790 = vpow2.f32 %v7156_v57  ;;  %v6389_v63 = vadd.f32 %v8811_v62, %v7150_v53  ;;  %v6358_v0 = vpop.f32.mrb[25].mxu0 }
 0xcb3   : > { %9792 = vpow2.f32 %v7155_v60  ;;  %v6388_v3 = vadd.f32 %v7150_v53, %v6358_v0 }
 0xcb4   : > { %v9783_v16 = vpop.eup %9782  ;;  %v7158_v5 = vmul.f32 -1.442695, %v6389_v63 }
 0xcb5   : > { %v9785_v7 = vpop.eup %9784  ;;  %v6415_v10 = vadd.f32 1.0, %v9783_v16  ;;  %v7157_v14 = vmul.f32 -1.442695, %v6388_v3 }
 0xcb6   : > { %v6414_v15 = vadd.f32 1.0, %v9785_v7  ;;  %9794 = vpow2.f32 %v7158_v5 }
 0xcb7   : > { %9796 = vrcp.f32 %v6415_v10 }
 0xcb8   : > { %v9787_v19 = vpop.eup %9786  ;;  %9798 = vrcp.f32 %v6414_v15 }
 0xcb9   : > { %v9789_v22 = vpop.eup %9788  ;;  %v6417_v25 = vadd.f32 1.0, %v9787_v19  ;;  %9800 = vpow2.f32 %v7157_v14 }
 0xcba   : > { %v6416_v26 = vadd.f32 1.0, %v9789_v22 }
 0xcbb   : > { %9802 = vrcp.f32 %v6417_v25 }
 0xcbc   : > { %v9791_v28 = vpop.eup %9790  ;;  %9804 = vrcp.f32 %v6416_v26 }
 0xcbd   : > { %v9793_v29 = vpop.eup %9792  ;;  %v6419_v30 = vadd.f32 1.0, %v9791_v28 }
 0xcbe   : > { %v6418_v32 = vadd.f32 1.0, %v9793_v29 }
 0xcbf   : > { %9806 = vrcp.f32 %v6419_v30 }
 0xcc0   : > { %v9795_v35 = vpop.eup %9794  ;;  %9808 = vrcp.f32 %v6418_v32 }
 0xcc1   : > { %v9797_v37 = vpop.eup %9796  ;;  %v6421_v1 = vadd.f32 1.0, %v9795_v35 }
 0xcc2   : > { %v9799_v38 = vpop.eup %9798  ;;  %6439 = vst.msk [vmem:[%s786_s8 + $0x8] sm:$0xff] %vm999_vm2, %v9797_v37 }
 0xcc3   : > { %v9801_v31 = vpop.eup %9800  ;;  %6438 = vst.msk [vmem:[%s786_s8] sm:$0xff] %vm999_vm2, %v9799_v38  ;;  %9810 = vrcp.f32 %v6421_v1 }
 0xcc4   : > { %v6420_v33 = vadd.f32 1.0, %v9801_v31 }
 0xcc5   : > { %v9803_v59 = vpop.eup %9802 }
 0xcc6   : > { %v9805_v42 = vpop.eup %9804  ;;  %6441 = vst.msk [vmem:[%s786_s8 + $0x18] sm:$0xff] %vm999_vm2, %v9803_v59  ;;  %9812 = vrcp.f32 %v6420_v33 }
 0xcc7   : > { %6440 = vst.msk [vmem:[%s786_s8 + $0x10] sm:$0xff] %vm999_vm2, %v9805_v42 }
 0xcc9   : > { %v9807_v34 = vpop.eup %9806 }
 0xcca   : > { %v9809_v36 = vpop.eup %9808  ;;  %6443 = vst.msk [vmem:[%s786_s8 + $0x28] sm:$0xff] %vm999_vm2, %v9807_v34 }
 0xccb   : > { %6442 = vst.msk [vmem:[%s786_s8 + $0x20] sm:$0xff] %vm999_vm2, %v9809_v36 }
 0xccd   : > { %v9811_v12 = vpop.eup %9810 }
 0xcce   : > { %6445 = vst.msk [vmem:[%s786_s8 + $0x38] sm:$0xff] %vm999_vm2, %v9811_v12 }
 0xcd0   : > { %v9813_v2 = vpop.eup %9812 }
 0xcd1   : > { %6444 = vst.msk [vmem:[%s786_s8 + $0x30] sm:$0xff] %vm999_vm2, %v9813_v2 }
 0xcd2 PF: > { %s38_s6 = sadd.s32 1, %s9820_s6  }
 0xcd3   : > { %p35_p4 = scmp.ge.s32.totalorder %s38_s6, 4  }
 0xcd5   :  { %37 = sbr.rel (!%p35_p4) target bundleno = 11 (0xb), region = 194 }

</bundles_post_ra>
